<compile_context>
chip_gen: v7x
topology: tpu7x:2x2x1
jax: 0.10.0
libtpu: 0.0.40
codegen_flags: <defaults>
</compile_context>

<pallas_src>
import functools

import jax
import jax.numpy as jnp
from jax.experimental import pallas as pl
from jax.experimental.pallas import tpu as pltpu


@functools.lru_cache(maxsize=None)
def _vmem_limit_bytes():
    # ~75% of physical VMEM: headroom for Mosaic scratch on v7x (64 MiB total)
    # while letting v5e/v6e (128 MiB) take ~2x larger tiles.
    try:
        return int(pltpu.get_tpu_info().vmem_capacity_bytes * 3 // 4)
    except Exception:  # no TPU visible at trace time (e.g. interpret mode)
        return 48 * 1024 * 1024


# ----------------------------------------------------------------------------
# Kernel 1: 3x3 conv (stride 1, pad 1) as ONE 27-wide MXU contraction.
#
# The wrapper flattens the zero-padded image to (B, (H+3)*(W+2), Cin).  For a
# tap (ki,kj) the pixels needed by ALL outputs form a contiguous row slab of
# length H*(W+2) starting at ki*(W+2)+kj; the 9 slabs are concatenated along
# the channel axis in VMEM and contracted against the (9*Cin, Cout) weight in
# a single jnp.dot (f32 accumulation).  The 2 junk wrap-columns per image row
# are stripped by the wrapper.
# ----------------------------------------------------------------------------
def _conv3x3_kernel(xp_ref, w_ref, b_ref, o_ref, *, H, W, relu):
    Wp = W + 2
    M = H * Wp
    cols = []
    for ki in range(3):
        for kj in range(3):
            off = ki * Wp + kj
            cols.append(xp_ref[0, off:off + M, :])          # (M, Cin) bf16
    x27 = jnp.concatenate(cols, axis=-1)                    # (M, 9*Cin) bf16
    y = jnp.dot(x27, w_ref[...],
                preferred_element_type=jnp.float32) + b_ref[...]
    if relu:
        y = jnp.maximum(y, 0.0)
    o_ref[0] = y.astype(o_ref.dtype)


def conv3x3(x_nhwc, w_hwio, b, *, relu=False, out_dtype=jnp.float32):
    """x_nhwc: (B,H,W,Cin); w_hwio: (3,3,Cin,Cout) -> (B,H,W,Cout) out_dtype."""
    B, H, W, Cin = x_nhwc.shape
    Cout = w_hwio.shape[-1]
    Wp = W + 2
    M = H * Wp                   # output rows per image incl. 2 junk cols/row
    # One extra zero bottom-row so the last tap's slab (offset 2*Wp+2) stays
    # in bounds even for the junk wrap rows (previous version read OOB here).
    P = (H + 3) * Wp

    xp = jnp.pad(x_nhwc, ((0, 0), (1, 2), (1, 1), (0, 0)))
    xp = xp.reshape(B, P, Cin).astype(jnp.bfloat16)
    w = w_hwio.reshape(9 * Cin, Cout).astype(jnp.bfloat16)  # tap-major rows

    cost = pl.CostEstimate(
        flops=2 * B * M * 9 * Cin * Cout,
        transcendentals=0,
        bytes_accessed=(xp.size * 2 + w.size * 2
                        + B * M * Cout * jnp.dtype(out_dtype).itemsize),
    )

    out = pl.pallas_call(
        functools.partial(_conv3x3_kernel, H=H, W=W, relu=relu),
        out_shape=jax.ShapeDtypeStruct((B, M, Cout), out_dtype),
        grid_spec=pltpu.PrefetchScalarGridSpec(
            num_scalar_prefetch=0,
            grid=(B,),
            in_specs=[
                pl.BlockSpec((1, P, Cin), lambda bb: (bb, 0, 0)),
                pl.BlockSpec((9 * Cin, Cout), lambda bb: (0, 0)),
                pl.BlockSpec((1, Cout), lambda bb: (0, 0)),
            ],
            out_specs=pl.BlockSpec((1, M, Cout), lambda bb: (bb, 0, 0)),
        ),
        compiler_params=pltpu.CompilerParams(
            dimension_semantics=("parallel",),
            vmem_limit_bytes=_vmem_limit_bytes()),
        cost_estimate=cost,
    )(xp, w, b.reshape(1, Cout).astype(jnp.float32))

    # TODO(synk): at real resolutions fold this pad/strip into a row-tiled
    #             kernel (halo rows per block) to drop two HBM passes per conv
    #             and bound per-step VMEM.
    return out.reshape(B, H, Wp, Cout)[:, :, :W, :]


# ----------------------------------------------------------------------------
# Kernel 2: fused quant_conv(+folded BN) -> vector quantization ->
# post_quant_conv over row tiles.  z / z_q stay in VMEM; outputs are the bf16
# post-quant activations and a lane-dense per-tile squared-error partial.
# ----------------------------------------------------------------------------
def _quant_vq_postquant_kernel(h_ref, wq_ref, bq_ref, e_ref, e2_ref,
                               wp_ref, bp_ref, out_ref, err_ref, *, n_valid):
    i = pl.program_id(0)
    tn = h_ref.shape[0]

    # quant_conv (1x1) with eval-mode SyncBatchNorm folded into wq/bq
    z = jnp.dot(h_ref[...], wq_ref[...],
                preferred_element_type=jnp.float32) + bq_ref[...]      # (tn, D)

    # --- vector quantization ---
    e = e_ref[...]                                                     # (K, D) f32
    # ||z||^2 is argmin-irrelevant; the z.e matmul runs in bf16 (cheap on MXU),
    # the codebook gather below stays exact f32.
    ze = jax.lax.dot_general(z.astype(jnp.bfloat16), e.astype(jnp.bfloat16),
                             (((1,), (1,)), ((), ())),
                             preferred_element_type=jnp.float32)       # (tn, K)
    d = e2_ref[...] - 2.0 * ze
    idx = jnp.argmin(d, axis=1, keepdims=True)          # first min, torch parity
    iota_k = jax.lax.broadcasted_iota(jnp.int32, d.shape, 1)
    onehot = (iota_k == idx).astype(jnp.float32)                       # (tn, K)
    zq = jnp.dot(onehot, e, preferred_element_type=jnp.float32)        # exact rows

    # per-tile commitment-error partial; mask rows past the true N (ragged tail)
    row = i * tn + jax.lax.broadcasted_iota(jnp.int32, (tn, 1), 0)
    diffv = jnp.where(row < n_valid, zq - z, 0.0)
    err = jnp.sum(diffv * diffv, keepdims=True)                        # (1, 1)
    err_ref[...] = jnp.broadcast_to(err, (1, 128))

    # post_quant_conv (1x1)
    y = jnp.dot(zq.astype(jnp.bfloat16), wp_ref[...],
                preferred_element_type=jnp.float32) + bp_ref[...]      # (tn, z_ch)
    out_ref[...] = y.astype(out_ref.dtype)


def quant_vq_postquant(h_flat, wq, bq, e, e2, wp, bp, *, tn_max=2048):
    """Fused quant_conv(+BN) -> VQ -> post_quant_conv over (N, z_ch) rows."""
    N, z_ch = h_flat.shape
    K, D = e.shape

    # Even grid with >= 2 steps: keeps both v7x TensorCores busy and gives the
    # pipeline something to overlap; tn_max bounds per-step VMEM on v7x.
    G = max(2, pl.cdiv(N, tn_max))
    G += G % 2
    tn = ((pl.cdiv(N, G) + 7) // 8) * 8              # sublane-aligned tile
    G = pl.cdiv(N, tn)
    G += G % 2
    Np = G * tn
    if Np != N:
        h_flat = jnp.pad(h_flat, ((0, Np - N), (0, 0)))

    cost = pl.CostEstimate(
        flops=2 * Np * (z_ch * D + 2 * D * K + D * z_ch),
        transcendentals=0,
        bytes_accessed=(2 * Np * z_ch * 2 + (z_ch * D + D * z_ch) * 2
                        + K * D * 4),
    )

    out, err = pl.pallas_call(
        functools.partial(_quant_vq_postquant_kernel, n_valid=N),
        out_shape=(jax.ShapeDtypeStruct((Np, z_ch), jnp.bfloat16),
                   jax.ShapeDtypeStruct((1, G * 128), jnp.float32)),
        grid_spec=pltpu.PrefetchScalarGridSpec(
            num_scalar_prefetch=0,
            grid=(G,),
            in_specs=[
                pl.BlockSpec((tn, z_ch), lambda i: (i, 0)),
                # TODO(synk): mark the invariant operands below as
                #             single-buffered (pipeline_mode=pl.Buffered(1))
                #             once available; matters for VQGAN-scale codebooks.
                pl.BlockSpec((z_ch, D), lambda i: (0, 0)),
                pl.BlockSpec((1, D), lambda i: (0, 0)),
                pl.BlockSpec((K, D), lambda i: (0, 0)),
                pl.BlockSpec((1, K), lambda i: (0, 0)),
                pl.BlockSpec((D, z_ch), lambda i: (0, 0)),
                pl.BlockSpec((1, z_ch), lambda i: (0, 0)),
            ],
            out_specs=(
                pl.BlockSpec((tn, z_ch), lambda i: (i, 0)),
                pl.BlockSpec((1, 128), lambda i: (0, i)),   # lane-dense partials
            ),
        ),
        compiler_params=pltpu.CompilerParams(
            dimension_semantics=("parallel",),
            vmem_limit_bytes=_vmem_limit_bytes()),
        cost_estimate=cost,
    )(h_flat.astype(jnp.bfloat16),
      wq.astype(jnp.bfloat16),
      bq.reshape(1, D).astype(jnp.float32),
      e.astype(jnp.float32),
      e2.reshape(1, K).astype(jnp.float32),
      wp.astype(jnp.bfloat16),
      bp.reshape(1, z_ch).astype(jnp.float32))

    sq_err = jnp.sum(err.reshape(G, 128)[:, 0])
    return out[:N], sq_err


# ----------------------------------------------------------------------------
# Parameters & forward pass
# ----------------------------------------------------------------------------
def make_params(key, *, in_ch, z_ch, embed_dim, n_embed):
    ks = jax.random.split(key, 8)
    p = {}
    p["enc_w"] = (0.1 * jax.random.normal(ks[0], (3, 3, in_ch, z_ch))
                  ).astype(jnp.float32)
    p["enc_b"] = jnp.zeros((z_ch,), jnp.float32)
    p["qconv_w"] = (0.1 * jax.random.normal(ks[1], (z_ch, embed_dim))
                    ).astype(jnp.float32)
    p["qconv_b"] = jnp.zeros((embed_dim,), jnp.float32)
    # SyncBatchNorm (eval-mode fold): PyTorch default init
    p["bn_gamma"] = jnp.ones((embed_dim,), jnp.float32)
    p["bn_beta"] = jnp.zeros((embed_dim,), jnp.float32)
    p["bn_mean"] = jnp.zeros((embed_dim,), jnp.float32)
    p["bn_var"] = jnp.ones((embed_dim,), jnp.float32)
    p["codebook"] = jax.random.uniform(
        ks[2], (n_embed, embed_dim), jnp.float32,
        minval=-1.0 / n_embed, maxval=1.0 / n_embed)
    p["pqconv_w"] = (0.1 * jax.random.normal(ks[3], (embed_dim, z_ch))
                     ).astype(jnp.float32)
    p["pqconv_b"] = jnp.zeros((z_ch,), jnp.float32)
    p["dec_w"] = (0.1 * jax.random.normal(ks[4], (3, 3, z_ch, in_ch))
                  ).astype(jnp.float32)
    p["dec_b"] = jnp.zeros((in_ch,), jnp.float32)
    return p


def vqbase_forward(params, x_nchw, *, beta=0.25, bn_eps=1e-5, tn_max=2048):
    B, C, H, W = x_nchw.shape
    x = jnp.transpose(x_nchw, (0, 2, 3, 1)).astype(jnp.float32)       # NHWC

    # encoder (simplified, see TODO above): 3x3 conv + ReLU, emitted directly
    # in bf16 since the quant kernel consumes bf16 (no extra HBM cast pass).
    h = conv3x3(x, params["enc_w"], params["enc_b"], relu=True,
                out_dtype=jnp.bfloat16)                               # (B,H,W,z_ch)

    z_ch = h.shape[-1]
    D = params["qconv_w"].shape[1]
    N = B * H * W

    # fold eval-mode SyncBatchNorm into the quant_conv weights/bias (one-time)
    bn_scale = params["bn_gamma"] * jax.lax.rsqrt(params["bn_var"] + bn_eps)
    bn_shift = params["bn_beta"] - params["bn_mean"] * bn_scale
    wq = params["qconv_w"] * bn_scale[None, :]
    bq = params["qconv_b"] * bn_scale + bn_shift
    e = params["codebook"].astype(jnp.float32)
    e2 = jnp.sum(e * e, axis=1)[None, :]                              # (1, K) once

    # fused quant_conv+BN -> VQ -> post_quant_conv (straight-through forward)
    pq_flat, sq_err = quant_vq_postquant(
        h.reshape(N, z_ch), wq, bq, e, e2,
        params["pqconv_w"], params["pqconv_b"], tn_max=tn_max)
    diff = (1.0 + beta) * sq_err / (N * D)
    pq = pq_flat.reshape(B, H, W, z_ch)                               # bf16

    # decoder (simplified, see TODO above): 3x3 conv, final output in f32
    dec = conv3x3(pq, params["dec_w"], params["dec_b"], relu=False,
                  out_dtype=jnp.float32)

    return jnp.transpose(dec, (0, 3, 1, 2)), diff                     # back to NCHW


if __name__ == "__main__":
    # small shapes: batch=2, image channels=3, spatial=16x16,
    # z_channels=8, embed_dim=16, n_embed=32
    B, C, H, W = 2, 3, 16, 16
    Z_CH, EMBED_DIM, N_EMBED = 8, 16, 32

    key = jax.random.PRNGKey(0)
    kx, kp = jax.random.split(key)
    x = jax.random.normal(kx, (B, C, H, W), jnp.float32)
    params = make_params(kp, in_ch=C, z_ch=Z_CH,
                         embed_dim=EMBED_DIM, n_embed=N_EMBED)

    dec, diff = jax.jit(vqbase_forward)(params, x)
    dec = jax.block_until_ready(dec)
    diff = jax.block_until_ready(diff)

    assert dec.shape == (B, C, H, W) and dec.dtype == jnp.float32
    assert diff.shape == () and bool(jnp.isfinite(diff))
    print("KERNEL_OK")
</pallas_src>

<mosaic_0001>
module attributes {stable_mosaic.version = 11 : i64} {
  func.func @_conv3x3_kernel(%arg0: i32, %arg1: memref<1x342x3xbf16, #tpu.memory_space<vmem>>, %arg2: memref<27x8xbf16, #tpu.memory_space<vmem>>, %arg3: memref<1x8xf32, #tpu.memory_space<vmem>>, %arg4: memref<1x288x8xbf16, #tpu.memory_space<vmem>>) attributes {dimension_semantics = [#tpu.dimension_semantics<parallel>], iteration_bounds = array<i64: 2>, scalar_prefetch = 0 : i64, scratch_operands = 0 : i64, tpu.core_type = #tpu.core_type<tc>, window_params = [{transform_indices = @transform_0, window_bounds = array<i64: 1, 342, 3>}, {pipeline_mode = #tpu.pipeline_mode<synchronous>, transform_indices = @transform_1, window_bounds = array<i64: 27, 8>}, {pipeline_mode = #tpu.pipeline_mode<synchronous>, transform_indices = @transform_2, window_bounds = array<i64: 1, 8>}, {transform_indices = @transform_3, window_bounds = array<i64: 1, 288, 8>}]} {
    %c0 = arith.constant 0 : index
    %c0_0 = arith.constant 0 : index
    %c0_1 = arith.constant 0 : index
    %0 = vector.load %arg1[%c0, %c0_0, %c0_1] : memref<1x342x3xbf16, #tpu.memory_space<vmem>>, vector<1x288x3xbf16>
    %1 = vector.shape_cast %0 : vector<1x288x3xbf16> to vector<288x3xbf16>
    %c0_2 = arith.constant 0 : index
    %c1 = arith.constant 1 : index
    %c0_3 = arith.constant 0 : index
    %2 = vector.load %arg1[%c0_2, %c1, %c0_3] : memref<1x342x3xbf16, #tpu.memory_space<vmem>>, vector<1x288x3xbf16>
    %3 = vector.shape_cast %2 : vector<1x288x3xbf16> to vector<288x3xbf16>
    %c0_4 = arith.constant 0 : index
    %c2 = arith.constant 2 : index
    %c0_5 = arith.constant 0 : index
    %4 = vector.load %arg1[%c0_4, %c2, %c0_5] : memref<1x342x3xbf16, #tpu.memory_space<vmem>>, vector<1x288x3xbf16>
    %5 = vector.shape_cast %4 : vector<1x288x3xbf16> to vector<288x3xbf16>
    %c0_6 = arith.constant 0 : index
    %c18 = arith.constant 18 : index
    %c0_7 = arith.constant 0 : index
    %6 = vector.load %arg1[%c0_6, %c18, %c0_7] : memref<1x342x3xbf16, #tpu.memory_space<vmem>>, vector<1x288x3xbf16>
    %7 = vector.shape_cast %6 : vector<1x288x3xbf16> to vector<288x3xbf16>
    %c0_8 = arith.constant 0 : index
    %c19 = arith.constant 19 : index
    %c0_9 = arith.constant 0 : index
    %8 = vector.load %arg1[%c0_8, %c19, %c0_9] : memref<1x342x3xbf16, #tpu.memory_space<vmem>>, vector<1x288x3xbf16>
    %9 = vector.shape_cast %8 : vector<1x288x3xbf16> to vector<288x3xbf16>
    %c0_10 = arith.constant 0 : index
    %c20 = arith.constant 20 : index
    %c0_11 = arith.constant 0 : index
    %10 = vector.load %arg1[%c0_10, %c20, %c0_11] : memref<1x342x3xbf16, #tpu.memory_space<vmem>>, vector<1x288x3xbf16>
    %11 = vector.shape_cast %10 : vector<1x288x3xbf16> to vector<288x3xbf16>
    %c0_12 = arith.constant 0 : index
    %c36 = arith.constant 36 : index
    %c0_13 = arith.constant 0 : index
    %12 = vector.load %arg1[%c0_12, %c36, %c0_13] : memref<1x342x3xbf16, #tpu.memory_space<vmem>>, vector<1x288x3xbf16>
    %13 = vector.shape_cast %12 : vector<1x288x3xbf16> to vector<288x3xbf16>
    %c0_14 = arith.constant 0 : index
    %c37 = arith.constant 37 : index
    %c0_15 = arith.constant 0 : index
    %14 = vector.load %arg1[%c0_14, %c37, %c0_15] : memref<1x342x3xbf16, #tpu.memory_space<vmem>>, vector<1x288x3xbf16>
    %15 = vector.shape_cast %14 : vector<1x288x3xbf16> to vector<288x3xbf16>
    %c0_16 = arith.constant 0 : index
    %c38 = arith.constant 38 : index
    %c0_17 = arith.constant 0 : index
    %16 = vector.load %arg1[%c0_16, %c38, %c0_17] : memref<1x342x3xbf16, #tpu.memory_space<vmem>>, vector<1x288x3xbf16>
    %17 = vector.shape_cast %16 : vector<1x288x3xbf16> to vector<288x3xbf16>
    %18 = tpu.concatenate %1, %3, %5, %7, %9, %11, %13, %15, %17 in 1 : vector<288x3xbf16>, vector<288x3xbf16>, vector<288x3xbf16>, vector<288x3xbf16>, vector<288x3xbf16>, vector<288x3xbf16>, vector<288x3xbf16>, vector<288x3xbf16>, vector<288x3xbf16> -> vector<288x27xbf16>
    %c0_18 = arith.constant 0 : index
    %c0_19 = arith.constant 0 : index
    %19 = vector.load %arg2[%c0_18, %c0_19] : memref<27x8xbf16, #tpu.memory_space<vmem>>, vector<27x8xbf16>
    %cst = arith.constant dense<0.000000e+00> : vector<288x8xf32>
    %20 = tpu.matmul %18, %19, %cst {dimension_numbers = #tpu.dot_dimension_numbers<[1], [0], [0], [1], [0, 0, 1, 1], [], []>} : vector<288x27xbf16>, vector<27x8xbf16>, vector<288x8xf32> -> vector<288x8xf32>
    %c0_20 = arith.constant 0 : index
    %c0_21 = arith.constant 0 : index
    %21 = vector.load %arg3[%c0_20, %c0_21] : memref<1x8xf32, #tpu.memory_space<vmem>>, vector<1x8xf32>
    %22 = vector.broadcast %21 : vector<1x8xf32> to vector<288x8xf32>
    %23 = arith.addf %20, %22 : vector<288x8xf32>
    %cst_22 = arith.constant 0.000000e+00 : f32
    %24 = vector.broadcast %cst_22 : f32 to vector<288x8xf32>
    %25 = arith.maximumf %23, %24 : vector<288x8xf32>
    %26 = arith.truncf %25 : vector<288x8xf32> to vector<288x8xbf16>
    %c0_23 = arith.constant 0 : index
    %c0_24 = arith.constant 0 : index
    %c0_25 = arith.constant 0 : index
    %27 = vector.load %arg4[%c0_23, %c0_24, %c0_25] : memref<1x288x8xbf16, #tpu.memory_space<vmem>>, vector<1x288x8xbf16>
    %28 = vector.shape_cast %27 : vector<1x288x8xbf16> to vector<288x8xbf16>
    %29 = vector.shape_cast %26 : vector<288x8xbf16> to vector<1x288x8xbf16>
    tpu.vector_store %arg4[%c0_23, %c0_24, %c0_25], %29 {strides = array<i32>} : memref<1x288x8xbf16, #tpu.memory_space<vmem>>, vector<1x288x8xbf16>,
    return
  }
  func.func @transform_0(%arg0: i32) -> (i32, i32, i32) {
    %c0_i32 = arith.constant 0 : i32
    %c0_i32_0 = arith.constant 0 : i32
    %c0_i32_1 = arith.constant 0 : i32
    return %arg0, %c0_i32, %c0_i32_0 : i32, i32, i32
  }
  func.func @transform_1(%arg0: i32) -> (i32, i32) {
    %c0_i32 = arith.constant 0 : i32
    %c0_i32_0 = arith.constant 0 : i32
    %c0_i32_1 = arith.constant 0 : i32
    return %c0_i32, %c0_i32_0 : i32, i32
  }
  func.func @transform_2(%arg0: i32) -> (i32, i32) {
    %c0_i32 = arith.constant 0 : i32
    %c0_i32_0 = arith.constant 0 : i32
    %c0_i32_1 = arith.constant 0 : i32
    return %c0_i32, %c0_i32_0 : i32, i32
  }
  func.func @transform_3(%arg0: i32) -> (i32, i32, i32) {
    %c0_i32 = arith.constant 0 : i32
    %c0_i32_0 = arith.constant 0 : i32
    %c0_i32_1 = arith.constant 0 : i32
    return %arg0, %c0_i32, %c0_i32_0 : i32, i32, i32
  }
}

module attributes {stable_mosaic.version = 11 : i64} {
  func.func @_quant_vq_postquant_kernel(%arg0: i32, %arg1: memref<256x8xbf16, #tpu.memory_space<vmem>>, %arg2: memref<8x16xbf16, #tpu.memory_space<vmem>>, %arg3: memref<1x16xf32, #tpu.memory_space<vmem>>, %arg4: memref<32x16xf32, #tpu.memory_space<vmem>>, %arg5: memref<1x32xf32, #tpu.memory_space<vmem>>, %arg6: memref<16x8xbf16, #tpu.memory_space<vmem>>, %arg7: memref<1x8xf32, #tpu.memory_space<vmem>>, %arg8: memref<256x8xbf16, #tpu.memory_space<vmem>>, %arg9: memref<1x128xf32, #tpu.memory_space<vmem>>) attributes {dimension_semantics = [#tpu.dimension_semantics<parallel>], iteration_bounds = array<i64: 2>, scalar_prefetch = 0 : i64, scratch_operands = 0 : i64, tpu.core_type = #tpu.core_type<tc>, window_params = [{transform_indices = @transform_0, window_bounds = array<i64: 256, 8>}, {pipeline_mode = #tpu.pipeline_mode<synchronous>, transform_indices = @transform_1, window_bounds = array<i64: 8, 16>}, {pipeline_mode = #tpu.pipeline_mode<synchronous>, transform_indices = @transform_2, window_bounds = array<i64: 1, 16>}, {pipeline_mode = #tpu.pipeline_mode<synchronous>, transform_indices = @transform_3, window_bounds = array<i64: 32, 16>}, {pipeline_mode = #tpu.pipeline_mode<synchronous>, transform_indices = @transform_4, window_bounds = array<i64: 1, 32>}, {pipeline_mode = #tpu.pipeline_mode<synchronous>, transform_indices = @transform_5, window_bounds = array<i64: 16, 8>}, {pipeline_mode = #tpu.pipeline_mode<synchronous>, transform_indices = @transform_6, window_bounds = array<i64: 1, 8>}, {transform_indices = @transform_7, window_bounds = array<i64: 256, 8>}, {transform_indices = @transform_8, window_bounds = array<i64: 1, 128>}]} {
    %c0 = arith.constant 0 : index
    %c0_0 = arith.constant 0 : index
    %0 = vector.load %arg1[%c0, %c0_0] : memref<256x8xbf16, #tpu.memory_space<vmem>>, vector<256x8xbf16>
    %c0_1 = arith.constant 0 : index
    %c0_2 = arith.constant 0 : index
    %1 = vector.load %arg2[%c0_1, %c0_2] : memref<8x16xbf16, #tpu.memory_space<vmem>>, vector<8x16xbf16>
    %cst = arith.constant dense<0.000000e+00> : vector<256x16xf32>
    %2 = tpu.matmul %0, %1, %cst {dimension_numbers = #tpu.dot_dimension_numbers<[1], [0], [0], [1], [0, 0, 1, 1], [], []>} : vector<256x8xbf16>, vector<8x16xbf16>, vector<256x16xf32> -> vector<256x16xf32>
    %c0_3 = arith.constant 0 : index
    %c0_4 = arith.constant 0 : index
    %3 = vector.load %arg3[%c0_3, %c0_4] : memref<1x16xf32, #tpu.memory_space<vmem>>, vector<1x16xf32>
    %4 = vector.broadcast %3 : vector<1x16xf32> to vector<256x16xf32>
    %5 = arith.addf %2, %4 : vector<256x16xf32>
    %c0_5 = arith.constant 0 : index
    %c0_6 = arith.constant 0 : index
    %6 = vector.load %arg4[%c0_5, %c0_6] : memref<32x16xf32, #tpu.memory_space<vmem>>, vector<32x16xf32>
    %7 = arith.truncf %5 : vector<256x16xf32> to vector<256x16xbf16>
    %8 = arith.truncf %6 : vector<32x16xf32> to vector<32x16xbf16>
    %cst_7 = arith.constant dense<0.000000e+00> : vector<256x32xf32>
    %9 = tpu.matmul %7, %8, %cst_7 {dimension_numbers = #tpu.dot_dimension_numbers<[1], [1], [0], [0], [0, 0, 1, 0], [], []>} : vector<256x16xbf16>, vector<32x16xbf16>, vector<256x32xf32> -> vector<256x32xf32>
    %c0_8 = arith.constant 0 : index
    %c0_9 = arith.constant 0 : index
    %10 = vector.load %arg5[%c0_8, %c0_9] : memref<1x32xf32, #tpu.memory_space<vmem>>, vector<1x32xf32>
    %cst_10 = arith.constant 2.000000e+00 : f32
    %11 = vector.broadcast %cst_10 : f32 to vector<256x32xf32>
    %12 = arith.mulf %11, %9 : vector<256x32xf32>
    %13 = vector.broadcast %10 : vector<1x32xf32> to vector<256x32xf32>
    %14 = arith.subf %13, %12 : vector<256x32xf32>
    %15 = tpu.reduce_index %14 {axis = 1 : i32, kind = #tpu.reduction_kind<arg_min>} : vector<256x32xf32> -> vector<256xi32>
    %16 = vector.shape_cast %15 : vector<256xi32> to vector<256x1xi32>
    %17 = tpu.iota {dimensions = array<i32: 1>} : vector<256x32xi32>
    %18 = vector.broadcast %16 : vector<256x1xi32> to vector<256x32xi32>
    %19 = arith.cmpi eq, %17, %18 : vector<256x32xi32>
    %20 = arith.extui %19 : vector<256x32xi1> to vector<256x32xi32>
    %21 = arith.sitofp %20 : vector<256x32xi32> to vector<256x32xf32>
    %cst_11 = arith.constant dense<0.000000e+00> : vector<256x16xf32>
    %22 = tpu.matmul %21, %6, %cst_11 {dimension_numbers = #tpu.dot_dimension_numbers<[1], [0], [0], [1], [0, 0, 1, 1], [], []>} : vector<256x32xf32>, vector<32x16xf32>, vector<256x16xf32> -> vector<256x16xf32>
    %c256_i32 = arith.constant 256 : i32
    %23 = arith.muli %arg0, %c256_i32 : i32
    %24 = tpu.iota {dimensions = array<i32: 0>} : vector<256x1xi32>
    %25 = vector.broadcast %23 : i32 to vector<256x1xi32>
    %26 = arith.addi %25, %24 : vector<256x1xi32>
    %c512_i32 = arith.constant 512 : i32
    %27 = vector.broadcast %c512_i32 : i32 to vector<256x1xi32>
    %28 = arith.cmpi slt, %26, %27 : vector<256x1xi32>
    %29 = arith.subf %22, %5 : vector<256x16xf32>
    %cst_12 = arith.constant 0.000000e+00 : f32
    %30 = vector.shape_cast %28 : vector<256x1xi1> to vector<256x1xi1>
    %31 = vector.broadcast %30 : vector<256x1xi1> to vector<256x16xi1>
    %32 = vector.broadcast %cst_12 : f32 to vector<256x16xf32>
    %33 = arith.select %31, %29, %32 : vector<256x16xi1>, vector<256x16xf32>
    %34 = arith.mulf %33, %33 : vector<256x16xf32>
    %35 = vector.shape_cast %34 : vector<256x16xf32> to vector<1x256x16xf32>
    %cst_13 = arith.constant dense<0.000000e+00> : vector<1xf32>
    %36 = vector.multi_reduction <add>, %35, %cst_13 [1, 2] : vector<1x256x16xf32> to vector<1xf32>
    %37 = vector.shape_cast %36 : vector<1xf32> to vector<1x1x1xf32>
    %38 = vector.extract %37[0, 0, 0] : f32 from vector<1x1x1xf32>
    %39 = vector.broadcast %38 : f32 to vector<1x1xf32>
    %40 = vector.shape_cast %39 : vector<1x1xf32> to vector<1x1xf32>
    %41 = vector.broadcast %40 : vector<1x1xf32> to vector<1x128xf32>
    %c0_14 = arith.constant 0 : index
    %c0_15 = arith.constant 0 : index
    %42 = vector.load %arg9[%c0_14, %c0_15] : memref<1x128xf32, #tpu.memory_space<vmem>>, vector<1x128xf32>
    tpu.vector_store %arg9[%c0_14, %c0_15], %41 {strides = array<i32>} : memref<1x128xf32, #tpu.memory_space<vmem>>, vector<1x128xf32>,
    %43 = arith.truncf %22 : vector<256x16xf32> to vector<256x16xbf16>
    %c0_16 = arith.constant 0 : index
    %c0_17 = arith.constant 0 : index
    %44 = vector.load %arg6[%c0_16, %c0_17] : memref<16x8xbf16, #tpu.memory_space<vmem>>, vector<16x8xbf16>
    %cst_18 = arith.constant dense<0.000000e+00> : vector<256x8xf32>
    %45 = tpu.matmul %43, %44, %cst_18 {dimension_numbers = #tpu.dot_dimension_numbers<[1], [0], [0], [1], [0, 0, 1, 1], [], []>} : vector<256x16xbf16>, vector<16x8xbf16>, vector<256x8xf32> -> vector<256x8xf32>
    %c0_19 = arith.constant 0 : index
    %c0_20 = arith.constant 0 : index
    %46 = vector.load %arg7[%c0_19, %c0_20] : memref<1x8xf32, #tpu.memory_space<vmem>>, vector<1x8xf32>
    %47 = vector.broadcast %46 : vector<1x8xf32> to vector<256x8xf32>
    %48 = arith.addf %45, %47 : vector<256x8xf32>
    %49 = arith.truncf %48 : vector<256x8xf32> to vector<256x8xbf16>
    %c0_21 = arith.constant 0 : index
    %c0_22 = arith.constant 0 : index
    %50 = vector.load %arg8[%c0_21, %c0_22] : memref<256x8xbf16, #tpu.memory_space<vmem>>, vector<256x8xbf16>
    tpu.vector_store %arg8[%c0_21, %c0_22], %49 {strides = array<i32>} : memref<256x8xbf16, #tpu.memory_space<vmem>>, vector<256x8xbf16>,
    return
  }
  func.func @transform_0(%arg0: i32) -> (i32, i32) {
    %c0_i32 = arith.constant 0 : i32
    %c0_i32_0 = arith.constant 0 : i32
    return %arg0, %c0_i32 : i32, i32
  }
  func.func @transform_1(%arg0: i32) -> (i32, i32) {
    %c0_i32 = arith.constant 0 : i32
    %c0_i32_0 = arith.constant 0 : i32
    %c0_i32_1 = arith.constant 0 : i32
    return %c0_i32, %c0_i32_0 : i32, i32
  }
  func.func @transform_2(%arg0: i32) -> (i32, i32) {
    %c0_i32 = arith.constant 0 : i32
    %c0_i32_0 = arith.constant 0 : i32
    %c0_i32_1 = arith.constant 0 : i32
    return %c0_i32, %c0_i32_0 : i32, i32
  }
  func.func @transform_3(%arg0: i32) -> (i32, i32) {
    %c0_i32 = arith.constant 0 : i32
    %c0_i32_0 = arith.constant 0 : i32
    %c0_i32_1 = arith.constant 0 : i32
    return %c0_i32, %c0_i32_0 : i32, i32
  }
  func.func @transform_4(%arg0: i32) -> (i32, i32) {
    %c0_i32 = arith.constant 0 : i32
    %c0_i32_0 = arith.constant 0 : i32
    %c0_i32_1 = arith.constant 0 : i32
    return %c0_i32, %c0_i32_0 : i32, i32
  }
  func.func @transform_5(%arg0: i32) -> (i32, i32) {
    %c0_i32 = arith.constant 0 : i32
    %c0_i32_0 = arith.constant 0 : i32
    %c0_i32_1 = arith.constant 0 : i32
    return %c0_i32, %c0_i32_0 : i32, i32
  }
  func.func @transform_6(%arg0: i32) -> (i32, i32) {
    %c0_i32 = arith.constant 0 : i32
    %c0_i32_0 = arith.constant 0 : i32
    %c0_i32_1 = arith.constant 0 : i32
    return %c0_i32, %c0_i32_0 : i32, i32
  }
  func.func @transform_7(%arg0: i32) -> (i32, i32) {
    %c0_i32 = arith.constant 0 : i32
    %c0_i32_0 = arith.constant 0 : i32
    return %arg0, %c0_i32 : i32, i32
  }
  func.func @transform_8(%arg0: i32) -> (i32, i32) {
    %c0_i32 = arith.constant 0 : i32
    %c0_i32_0 = arith.constant 0 : i32
    return %c0_i32, %arg0 : i32, i32
  }
}

module attributes {stable_mosaic.version = 11 : i64} {
  func.func @_conv3x3_kernel(%arg0: i32, %arg1: memref<1x342x8xbf16, #tpu.memory_space<vmem>>, %arg2: memref<72x3xbf16, #tpu.memory_space<vmem>>, %arg3: memref<1x3xf32, #tpu.memory_space<vmem>>, %arg4: memref<1x288x3xf32, #tpu.memory_space<vmem>>) attributes {dimension_semantics = [#tpu.dimension_semantics<parallel>], iteration_bounds = array<i64: 2>, scalar_prefetch = 0 : i64, scratch_operands = 0 : i64, tpu.core_type = #tpu.core_type<tc>, window_params = [{transform_indices = @transform_0, window_bounds = array<i64: 1, 342, 8>}, {pipeline_mode = #tpu.pipeline_mode<synchronous>, transform_indices = @transform_1, window_bounds = array<i64: 72, 3>}, {pipeline_mode = #tpu.pipeline_mode<synchronous>, transform_indices = @transform_2, window_bounds = array<i64: 1, 3>}, {transform_indices = @transform_3, window_bounds = array<i64: 1, 288, 3>}]} {
    %c0 = arith.constant 0 : index
    %c0_0 = arith.constant 0 : index
    %c0_1 = arith.constant 0 : index
    %0 = vector.load %arg1[%c0, %c0_0, %c0_1] : memref<1x342x8xbf16, #tpu.memory_space<vmem>>, vector<1x288x8xbf16>
    %1 = vector.shape_cast %0 : vector<1x288x8xbf16> to vector<288x8xbf16>
    %c0_2 = arith.constant 0 : index
    %c1 = arith.constant 1 : index
    %c0_3 = arith.constant 0 : index
    %2 = vector.load %arg1[%c0_2, %c1, %c0_3] : memref<1x342x8xbf16, #tpu.memory_space<vmem>>, vector<1x288x8xbf16>
    %3 = vector.shape_cast %2 : vector<1x288x8xbf16> to vector<288x8xbf16>
    %c0_4 = arith.constant 0 : index
    %c2 = arith.constant 2 : index
    %c0_5 = arith.constant 0 : index
    %4 = vector.load %arg1[%c0_4, %c2, %c0_5] : memref<1x342x8xbf16, #tpu.memory_space<vmem>>, vector<1x288x8xbf16>
    %5 = vector.shape_cast %4 : vector<1x288x8xbf16> to vector<288x8xbf16>
    %c0_6 = arith.constant 0 : index
    %c18 = arith.constant 18 : index
    %c0_7 = arith.constant 0 : index
    %6 = vector.load %arg1[%c0_6, %c18, %c0_7] : memref<1x342x8xbf16, #tpu.memory_space<vmem>>, vector<1x288x8xbf16>
    %7 = vector.shape_cast %6 : vector<1x288x8xbf16> to vector<288x8xbf16>
    %c0_8 = arith.constant 0 : index
    %c19 = arith.constant 19 : index
    %c0_9 = arith.constant 0 : index
    %8 = vector.load %arg1[%c0_8, %c19, %c0_9] : memref<1x342x8xbf16, #tpu.memory_space<vmem>>, vector<1x288x8xbf16>
    %9 = vector.shape_cast %8 : vector<1x288x8xbf16> to vector<288x8xbf16>
    %c0_10 = arith.constant 0 : index
    %c20 = arith.constant 20 : index
    %c0_11 = arith.constant 0 : index
    %10 = vector.load %arg1[%c0_10, %c20, %c0_11] : memref<1x342x8xbf16, #tpu.memory_space<vmem>>, vector<1x288x8xbf16>
    %11 = vector.shape_cast %10 : vector<1x288x8xbf16> to vector<288x8xbf16>
    %c0_12 = arith.constant 0 : index
    %c36 = arith.constant 36 : index
    %c0_13 = arith.constant 0 : index
    %12 = vector.load %arg1[%c0_12, %c36, %c0_13] : memref<1x342x8xbf16, #tpu.memory_space<vmem>>, vector<1x288x8xbf16>
    %13 = vector.shape_cast %12 : vector<1x288x8xbf16> to vector<288x8xbf16>
    %c0_14 = arith.constant 0 : index
    %c37 = arith.constant 37 : index
    %c0_15 = arith.constant 0 : index
    %14 = vector.load %arg1[%c0_14, %c37, %c0_15] : memref<1x342x8xbf16, #tpu.memory_space<vmem>>, vector<1x288x8xbf16>
    %15 = vector.shape_cast %14 : vector<1x288x8xbf16> to vector<288x8xbf16>
    %c0_16 = arith.constant 0 : index
    %c38 = arith.constant 38 : index
    %c0_17 = arith.constant 0 : index
    %16 = vector.load %arg1[%c0_16, %c38, %c0_17] : memref<1x342x8xbf16, #tpu.memory_space<vmem>>, vector<1x288x8xbf16>
    %17 = vector.shape_cast %16 : vector<1x288x8xbf16> to vector<288x8xbf16>
    %18 = tpu.concatenate %1, %3, %5, %7, %9, %11, %13, %15, %17 in 1 : vector<288x8xbf16>, vector<288x8xbf16>, vector<288x8xbf16>, vector<288x8xbf16>, vector<288x8xbf16>, vector<288x8xbf16>, vector<288x8xbf16>, vector<288x8xbf16>, vector<288x8xbf16> -> vector<288x72xbf16>
    %c0_18 = arith.constant 0 : index
    %c0_19 = arith.constant 0 : index
    %19 = vector.load %arg2[%c0_18, %c0_19] : memref<72x3xbf16, #tpu.memory_space<vmem>>, vector<72x3xbf16>
    %cst = arith.constant dense<0.000000e+00> : vector<288x3xf32>
    %20 = tpu.matmul %18, %19, %cst {dimension_numbers = #tpu.dot_dimension_numbers<[1], [0], [0], [1], [0, 0, 1, 1], [], []>} : vector<288x72xbf16>, vector<72x3xbf16>, vector<288x3xf32> -> vector<288x3xf32>
    %c0_20 = arith.constant 0 : index
    %c0_21 = arith.constant 0 : index
    %21 = vector.load %arg3[%c0_20, %c0_21] : memref<1x3xf32, #tpu.memory_space<vmem>>, vector<1x3xf32>
    %22 = vector.broadcast %21 : vector<1x3xf32> to vector<288x3xf32>
    %23 = arith.addf %20, %22 : vector<288x3xf32>
    %c0_22 = arith.constant 0 : index
    %c0_23 = arith.constant 0 : index
    %c0_24 = arith.constant 0 : index
    %24 = vector.load %arg4[%c0_22, %c0_23, %c0_24] : memref<1x288x3xf32, #tpu.memory_space<vmem>>, vector<1x288x3xf32>
    %25 = vector.shape_cast %24 : vector<1x288x3xf32> to vector<288x3xf32>
    %26 = vector.shape_cast %23 : vector<288x3xf32> to vector<1x288x3xf32>
    tpu.vector_store %arg4[%c0_22, %c0_23, %c0_24], %26 {strides = array<i32>} : memref<1x288x3xf32, #tpu.memory_space<vmem>>, vector<1x288x3xf32>,
    return
  }
  func.func @transform_0(%arg0: i32) -> (i32, i32, i32) {
    %c0_i32 = arith.constant 0 : i32
    %c0_i32_0 = arith.constant 0 : i32
    %c0_i32_1 = arith.constant 0 : i32
    return %arg0, %c0_i32, %c0_i32_0 : i32, i32, i32
  }
  func.func @transform_1(%arg0: i32) -> (i32, i32) {
    %c0_i32 = arith.constant 0 : i32
    %c0_i32_0 = arith.constant 0 : i32
    %c0_i32_1 = arith.constant 0 : i32
    return %c0_i32, %c0_i32_0 : i32, i32
  }
  func.func @transform_2(%arg0: i32) -> (i32, i32) {
    %c0_i32 = arith.constant 0 : i32
    %c0_i32_0 = arith.constant 0 : i32
    %c0_i32_1 = arith.constant 0 : i32
    return %c0_i32, %c0_i32_0 : i32, i32
  }
  func.func @transform_3(%arg0: i32) -> (i32, i32, i32) {
    %c0_i32 = arith.constant 0 : i32
    %c0_i32_0 = arith.constant 0 : i32
    %c0_i32_1 = arith.constant 0 : i32
    return %arg0, %c0_i32, %c0_i32_0 : i32, i32, i32
  }
}

</mosaic_0001>

<bundles_post_ra>
// kernel: vqbase_forward.4
= control target key start
LH: loop header
LB: loop body
LE: loop exit
PB: predicated region body
PF: predicated region fallthrough
CT: control target
= control target key end

     0   :  { %s2842_s27 = smov 0   ;;  %s3556_s0 = inlined_call_operand.vmem [shape: bf16[512,8], index: 0, kind: input, shape index: {}]   ;;  %s3557_s1 = inlined_call_operand.vmem [shape: bf16[8,16], index: 1, kind: input, shape index: {}]   ;;  %s3558_s2 = inlined_call_operand.vmem [shape: f32[1,16], index: 2, kind: input, shape index: {}]   ;;  %s3559_s3 = inlined_call_operand.vmem [shape: f32[32,16], index: 3, kind: input, shape index: {}]   ;;  %s3560_s4 = inlined_call_operand.vmem [shape: f32[1,32], index: 4, kind: input, shape index: {}]   ;;  %s3561_s5 = inlined_call_operand.vmem [shape: bf16[16,8], index: 5, kind: input, shape index: {}]   ;;  %s3562_s6 = inlined_call_operand.vmem [shape: f32[1,8], index: 6, kind: input, shape index: {}]   ;;  %s3563_s7 = inlined_call_operand.vmem [shape: bf16[512,8], index: 7, kind: output, shape index: {0}]   ;;  %s3564_s8 = inlined_call_operand.vmem [shape: f32[1,256], index: 8, kind: output, shape index: {1}]  }
   0x1 LB: > { %s2848_s28 = sadd.s32 4294967295, %s2794_s27   ;;  %p2297_p0 = scmp.ge.s32.totalorder %s2794_s27, 1  ;;  %s2794_s27 = sphi %s2842_s27, %s19_s27  }
   0x2   : > { %p266_p1 = scmp.lt.s32.totalorder %s2794_s27, 3 }
   0x4   : > { %p267_p2 = pnand %p2297_p0, %p266_p1 }
   0x5   : > { %v351_v0 = vld [vmem:[%s3557_s1] sm:$0xf] (!%p267_p2)  ;;  %vm488_vm0 = vcmask (!%p267_p2), 1043456   ;;  %s2298_s9 = sshll.u32 (!%p267_p2), %s2848_s28, 5  ;;  %v654_v3 = vld [vmem:[%s3559_s3 + $0x8] sm:$0xff] (!%p267_p2)  ;;  %vm675_vm1 = vcmask (!%p267_p2), 130048  }
   0x6   : > { %270 = sbr.rel (%p267_p2) target bundleno = 1099 (0x44b), region = 48  ;;  %v653_v1 = vld [vmem:[%s3559_s3] sm:$0xff] (!%p267_p2)  ;;  %2757 = vmatprep.subr.msk.bf16.mxu0 (!%p267_p2), %vm488_vm0, %v351_v0  ;;  %v490_v2 = vsel (!%p267_p2), %vm488_vm0, %v351_v0, 0  ;;  %p304_p3 = scmp.lt.s32.totalorder (!%p267_p2), %s2298_s9, 63  ;;  %vm439_vm2 = vcmask (!%p267_p2), 64512   ;;  %v655_v22 = vld [vmem:[%s3559_s3 + $0x10] sm:$0xff] (!%p267_p2) }
   0x7   : > { %2590 = vmatpush3.bf16.msra.mxu0 (!%p267_p2), %v490_v2  ;;  %v673_v4 = vpack.c.bf16 (!%p267_p2), %v654_v3, %v653_v1  ;;  %v656_v23 = vld [vmem:[%s3559_s3 + $0x18] sm:$0xff] (!%p267_p2)  ;;  %v2917_v27 = vld [vmem:[%s3558_s2] ss:$0 sm:$0xff] (!%p267_p2)  ;;  %vm962_vm3 = vcmask (!%p267_p2), 261120   ;;  %s2416_s30 = sshll.u32 (!%p267_p2), %s2848_s28, 8  ;;  %p315_p4 = scmp.lt.s32.totalorder (!%p267_p2), %s2848_s28, 1 }
   0x8   : > { %v674_v24 = vpack.c.bf16 (!%p267_p2), %v656_v23, %v655_v22 }
   0x9   : > { %2758 = vmatprep.subr.msk.bf16.mxu1 (!%p267_p2), %vm675_vm1, %v673_v4  ;;  %v725_v5 = vsel (!%p267_p2), %vm675_vm1, %v673_v4, 0  ;;  %2750 = vmatprep.subr.bf16.mxu0 (!%p267_p2), %v673_v4 }
   0xa   : > { %2624 = vmatpush3.bf16.xpose.msra.mxu1 (!%p267_p2), %v725_v5  ;;  %v728_v25 = vsel (!%p267_p2), %vm675_vm1, %v674_v24, 0 }
   0xb   : > { %2759 = vmatprep.subr.msk.bf16.mxu1 (!%p267_p2), %vm675_vm1, %v674_v24 }
   0xd   : > { %s3566_s9 = smov (!%p304_p3, %s2298_s9), 63  ;;  %s3568_s28 = smov (!%p315_p4, %s2848_s28), 1 }
   0xe   : > { %s2299_s14 = sshll.u32 %s3566_s9, 2  ;;  %s317_s16 = scalar_lea.vmem %s3564_s8, %s3568_s28 }
   0xf   : > { %s2872_s17 = scalar_lea.vmem %s3556_s0, %s2299_s14  ;;  %s3451_s15 = scalar_lea.vmem %s3563_s7, %s2299_s14 }
  0x10   : > { %v2771_v6 = vld [vmem:[%s2872_s17] sm:$0xff]   ;;  %v2772_v7 = vld [vmem:[%s2872_s17 + $0x8] sm:$0xff]   ;;  %v2773_v8 = vld [vmem:[%s2872_s17 + $0x10] sm:$0xff]  }
  0x11   : > { %2591 = vmatprep.mubr.msk.bf16.mxu0 %vm439_vm2, %v2771_v6  ;;  %v2774_v9 = vld [vmem:[%s2872_s17 + $0x18] sm:$0xff]   ;;  %v2775_v10 = vld [vmem:[%s2872_s17 + $0x20] sm:$0xff]   ;;  %v2776_v11 = vld [vmem:[%s2872_s17 + $0x28] sm:$0xff]  }
  0x12   : > { %2592 = vmatmul.mubr.msk.bf16.vlgmr.msra.gmra.mrb[0].mxu0 %vm439_vm2, %v2772_v7  ;;  %v2777_v12 = vld [vmem:[%s2872_s17 + $0x30] sm:$0xff]   ;;  %v2778_v13 = vld [vmem:[%s2872_s17 + $0x38] sm:$0xff]   ;;  %v2779_v14 = vld [vmem:[%s2872_s17 + $0x40] sm:$0xff]   ;;  %2626 = vmatpush3.bf16.xpose.msra.mxu1 %v728_v25 }
  0x13   : > { %2595 = vmatprep.mubr.msk.bf16.mxu0 %vm439_vm2, %v2773_v8  ;;  %2752 = vmatpush3.bf16.msra.mxu0 %v673_v4  ;;  %v2780_v15 = vld [vmem:[%s2872_s17 + $0x48] sm:$0xff]   ;;  %v2781_v16 = vld [vmem:[%s2872_s17 + $0x50] sm:$0xff]   ;;  %v2782_v17 = vld [vmem:[%s2872_s17 + $0x58] sm:$0xff]  }
  0x14   : > { %v2783_v18 = vld [vmem:[%s2872_s17 + $0x60] sm:$0xff]   ;;  %v2784_v19 = vld [vmem:[%s2872_s17 + $0x68] sm:$0xff]   ;;  %v2785_v20 = vld [vmem:[%s2872_s17 + $0x70] sm:$0xff]   ;;  %2754 = vmatprep.subr.bf16.mxu0 %v674_v24 }
  0x15   : > { %v2786_v21 = vld [vmem:[%s2872_s17 + $0x78] sm:$0xff]  }
  0x17   : > { %2756 = vmatpush3.bf16.msra.mxu0 %v674_v24 }
  0x1a   : > { %2596 = vmatmul.mubr.msk.bf16.gmra.mrb[4].mxu0 %vm439_vm2, %v2774_v9 }
  0x1b   : > { %2599 = vmatprep.mubr.msk.bf16.mxu0 %vm439_vm2, %v2775_v10 }
  0x22   : > { %2600 = vmatmul.mubr.msk.bf16.gmra.mrb[8].mxu0 %vm439_vm2, %v2776_v11 }
  0x23   : > { %2603 = vmatprep.mubr.msk.bf16.mxu0 %vm439_vm2, %v2777_v12 }
  0x2a   : > { %2604 = vmatmul.mubr.msk.bf16.gmra.mrb[12].mxu0 %vm439_vm2, %v2778_v13 }
  0x2b   : > { %2607 = vmatprep.mubr.msk.bf16.mxu0 %vm439_vm2, %v2779_v14 }
  0x32   : > { %2608 = vmatmul.mubr.msk.bf16.gmra.mrb[16].mxu0 %vm439_vm2, %v2780_v15 }
  0x33   : > { %2611 = vmatprep.mubr.msk.bf16.mxu0 %vm439_vm2, %v2781_v16 }
  0x3a   : > { %2612 = vmatmul.mubr.msk.bf16.gmra.mrb[20].mxu0 %vm439_vm2, %v2782_v17 }
  0x3b   : > { %2615 = vmatprep.mubr.msk.bf16.mxu0 %vm439_vm2, %v2783_v18 }
  0x42   : > { %2616 = vmatmul.mubr.msk.bf16.gmra.mrb[24].mxu0 %vm439_vm2, %v2784_v19 }
  0x43   : > { %2619 = vmatprep.mubr.msk.bf16.mxu0 %vm439_vm2, %v2785_v20 }
  0x4a   : > { %2620 = vmatmul.mubr.msk.bf16.gmra.mrb[28].mxu0 %vm439_vm2, %v2786_v21 }
  0xe5   : > { %v2593_v26 = vpop.f32.mrb[0].mxu0 }
  0xe6   : > { %v526_v28 = vpop.f32.mrb[1].mxu0  ;;  %v2929_v34 = vadd.f32 %v2593_v26, %v2917_v27 }
  0xe7   : > { %v2594_v29 = vpop.f32.mrb[2].mxu0  ;;  %v2923_v32 = vadd.f32 %v2917_v27, %v526_v28 }
  0xe8   : > { %v2920_v30 = vadd.f32 %v2594_v29, %v2917_v27  ;;  %v529_v31 = vpop.f32.mrb[3].mxu0 }
  0xe9   : > { %v2926_v33 = vadd.f32 %v2917_v27, %v529_v31 }
  0xea   : > { %v658_v36 = vpack.c.bf16 %v2920_v30, %v2929_v34 }
  0xeb   : > { %v657_v35 = vpack.c.bf16 %v2926_v33, %v2923_v32 }
  0xed   : > { %v2597_v37 = vpop.f32.mrb[4].mxu0  ;;  %2627 = vmatprep.mubr.msk.bf16.mxu1 %vm675_vm1, %v657_v35 }
  0xee   : > { %v542_v38 = vpop.f32.mrb[5].mxu0  ;;  %2628 = vmatmul.mubr.msk.bf16.vlgmr.msra.gmra.mrb[0].mxu1 %vm675_vm1, %v658_v36  ;;  %v2941_v41 = vadd.f32 %v2597_v37, %v2917_v27 }
  0xef   : > { %v2938_v39 = vadd.f32 %v2917_v27, %v542_v38  ;;  %v2598_v40 = vpop.f32.mrb[6].mxu0 }
  0xf0   : > { %v2944_v42 = vadd.f32 %v2598_v40, %v2917_v27  ;;  %v545_v43 = vpop.f32.mrb[7].mxu0 }
  0xf1   : > { %v2947_v44 = vadd.f32 %v2917_v27, %v545_v43 }
  0xf2   : > { %v660_v46 = vpack.c.bf16 %v2944_v42, %v2941_v41 }
  0xf3   : > { %v659_v45 = vpack.c.bf16 %v2947_v44, %v2938_v39 }
  0xf5   : > { %v2601_v47 = vpop.f32.mrb[8].mxu0  ;;  %2631 = vmatprep.mubr.msk.bf16.mxu1 %vm675_vm1, %v659_v45 }
  0xf6   : > { %v558_v48 = vpop.f32.mrb[9].mxu0  ;;  %2632 = vmatmul.mubr.msk.bf16.gmra.mrb[4].mxu1 %vm675_vm1, %v660_v46  ;;  %v2959_v51 = vadd.f32 %v2601_v47, %v2917_v27 }
  0xf7   : > { %v2956_v49 = vadd.f32 %v2917_v27, %v558_v48  ;;  %v2602_v50 = vpop.f32.mrb[10].mxu0 }
  0xf8   : > { %v2962_v52 = vadd.f32 %v2602_v50, %v2917_v27  ;;  %v561_v53 = vpop.f32.mrb[11].mxu0 }
  0xf9   : > { %v2965_v54 = vadd.f32 %v2917_v27, %v561_v53 }
  0xfa   : > { %v662_v56 = vpack.c.bf16 %v2962_v52, %v2959_v51 }
  0xfb   : > { %v661_v55 = vpack.c.bf16 %v2965_v54, %v2956_v49 }
  0xfd   : > { %v2605_v57 = vpop.f32.mrb[12].mxu0  ;;  %2635 = vmatprep.mubr.msk.bf16.mxu1 %vm675_vm1, %v661_v55 }
  0xfe   : > { %v574_v58 = vpop.f32.mrb[13].mxu0  ;;  %2636 = vmatmul.mubr.msk.bf16.gmra.mrb[8].mxu1 %vm675_vm1, %v662_v56  ;;  %v2977_v61 = vadd.f32 %v2605_v57, %v2917_v27  ;;  %v3066_v57 = vld [vmem:[%s3560_s4] ss:$0 sm:$0xff] }
  0xff   : > { %v2974_v59 = vadd.f32 %v2917_v27, %v574_v58  ;;  %v2606_v60 = vpop.f32.mrb[14].mxu0 }
 0x100   : > { %v2980_v62 = vadd.f32 %v2606_v60, %v2917_v27  ;;  %v577_v63 = vpop.f32.mrb[15].mxu0 }
 0x101   : > { %v2983_v0 = vadd.f32 %v2917_v27, %v577_v63 }
 0x102   : > { %v664_v2 = vpack.c.bf16 %v2980_v62, %v2977_v61 }
 0x103   : > { %v663_v1 = vpack.c.bf16 %v2983_v0, %v2974_v59 }
 0x105   : > { %v2609_v3 = vpop.f32.mrb[16].mxu0  ;;  %2639 = vmatprep.mubr.msk.bf16.mxu1 %vm675_vm1, %v663_v1 }
 0x106   : > { %v590_v4 = vpop.f32.mrb[17].mxu0  ;;  %2640 = vmatmul.mubr.msk.bf16.gmra.mrb[12].mxu1 %vm675_vm1, %v664_v2  ;;  %v2995_v7 = vadd.f32 %v2609_v3, %v2917_v27 }
 0x107   : > { %v2992_v5 = vadd.f32 %v2917_v27, %v590_v4  ;;  %v2610_v6 = vpop.f32.mrb[18].mxu0 }
 0x108   : > { %v2998_v8 = vadd.f32 %v2610_v6, %v2917_v27  ;;  %v593_v9 = vpop.f32.mrb[19].mxu0 }
 0x109   : > { %v3001_v10 = vadd.f32 %v2917_v27, %v593_v9 }
 0x10a   : > { %v666_v12 = vpack.c.bf16 %v2998_v8, %v2995_v7 }
 0x10b   : > { %v665_v11 = vpack.c.bf16 %v3001_v10, %v2992_v5 }
 0x10d   : > { %v2613_v13 = vpop.f32.mrb[20].mxu0  ;;  %2643 = vmatprep.mubr.msk.bf16.mxu1 %vm675_vm1, %v665_v11 }
 0x10e   : > { %v606_v14 = vpop.f32.mrb[21].mxu0  ;;  %2644 = vmatmul.mubr.msk.bf16.gmra.mrb[16].mxu1 %vm675_vm1, %v666_v12  ;;  %v3013_v17 = vadd.f32 %v2613_v13, %v2917_v27 }
 0x10f   : > { %v3010_v15 = vadd.f32 %v2917_v27, %v606_v14  ;;  %v2614_v16 = vpop.f32.mrb[22].mxu0 }
 0x110   : > { %v3016_v18 = vadd.f32 %v2614_v16, %v2917_v27  ;;  %v609_v19 = vpop.f32.mrb[23].mxu0 }
 0x111   : > { %v3019_v20 = vadd.f32 %v2917_v27, %v609_v19 }
 0x112   : > { %v668_v22 = vpack.c.bf16 %v3016_v18, %v3013_v17 }
 0x113   : > { %v667_v21 = vpack.c.bf16 %v3019_v20, %v3010_v15 }
 0x115   : > { %v2617_v23 = vpop.f32.mrb[24].mxu0  ;;  %2647 = vmatprep.mubr.msk.bf16.mxu1 %vm675_vm1, %v667_v21 }
 0x116   : > { %v622_v24 = vpop.f32.mrb[25].mxu0  ;;  %2648 = vmatmul.mubr.msk.bf16.gmra.mrb[20].mxu1 %vm675_vm1, %v668_v22  ;;  %v3031_v28 = vadd.f32 %v2617_v23, %v2917_v27 }
 0x117   : > { %v3028_v25 = vadd.f32 %v2917_v27, %v622_v24  ;;  %v2618_v26 = vpop.f32.mrb[26].mxu0 }
 0x118   : > { %v3034_v29 = vadd.f32 %v2618_v26, %v2917_v27  ;;  %v625_v31 = vpop.f32.mrb[27].mxu0 }
 0x119   : > { %v3037_v35 = vadd.f32 %v2917_v27, %v625_v31 }
 0x11a   : > { %v670_v37 = vpack.c.bf16 %v3034_v29, %v3031_v28 }
 0x11b   : > { %v669_v36 = vpack.c.bf16 %v3037_v35, %v3028_v25 }
 0x11d   : > { %v2621_v38 = vpop.f32.mrb[28].mxu0  ;;  %2651 = vmatprep.mubr.msk.bf16.mxu1 %vm675_vm1, %v669_v36 }
 0x11e   : > { %v638_v40 = vpop.f32.mrb[29].mxu0  ;;  %2652 = vmatmul.mubr.msk.bf16.gmra.mrb[24].mxu1 %vm675_vm1, %v670_v37  ;;  %v3049_v46 = vadd.f32 %v2621_v38, %v2917_v27 }
 0x11f   : > { %v3046_v43 = vadd.f32 %v2917_v27, %v638_v40  ;;  %v2622_v45 = vpop.f32.mrb[30].mxu0 }
 0x120   : > { %v3052_v47 = vadd.f32 %v2622_v45, %v2917_v27  ;;  %v641_v48 = vpop.f32.mrb[31].mxu0 }
 0x121   : > { %v3055_v50 = vadd.f32 %v2917_v27, %v641_v48 }
 0x122   : > { %v672_v55 = vpack.c.bf16 %v3052_v47, %v3049_v46 }
 0x123   : > { %v671_v53 = vpack.c.bf16 %v3055_v50, %v3046_v43 }
 0x125   : > { %2655 = vmatprep.mubr.msk.bf16.mxu1 %vm675_vm1, %v671_v53 }
 0x126   : > { %2656 = vmatmul.mubr.msk.bf16.gmra.mrb[28].mxu1 %vm675_vm1, %v672_v55 }
 0x1c1   : > { %v2629_v56 = vpop.f32.mrb[0].mxu1 }
 0x1c2   : > { %v894_v58 = vmul.f32 2.0, %v2629_v56  ;;  %v764_v60 = vpop.f32.mrb[1].mxu1 }
 0x1c3   : > { %v892_v27 = vmul.f32 2.0, %v764_v60  ;;  %v2630_v63 = vpop.f32.mrb[2].mxu1 }
 0x1c4   : > { %v895_v1 = vmul.f32 2.0, %v2630_v63  ;;  %v767_v2 = vpop.f32.mrb[3].mxu1  ;;  %v932_v3 = vsub.f32 %v3066_v57, %v894_v58 }
 0x1c5   : > { %v893_v4 = vmul.f32 2.0, %v767_v2  ;;  %v930_v6 = vsub.f32 %v3066_v57, %v892_v27 }
 0x1c6   : > { %v969_v9 = vsel %vm962_vm3, %v932_v3, inf  ;;  %v933_v11 = vsub.f32 %v3066_v57, %v895_v1 }
 0x1c7   : > { %970 = vmin.index.xlane.f32.xlu1 %v969_v9  ;;  %v963_v12 = vsel %vm962_vm3, %v930_v6, inf  ;;  %v931_v13 = vsub.f32 %v3066_v57, %v893_v4 }
 0x1c8   : > { %964 = vmin.index.xlane.f32.xlu0 %v963_v12  ;;  %v972_v19 = vsel %vm962_vm3, %v933_v11, inf }
 0x1c9   : > { %v2633_v14 = vpop.f32.mrb[4].mxu1  ;;  %v966_v24 = vsel %vm962_vm3, %v931_v13, inf }
 0x1ca   : > { %v780_v16 = vpop.f32.mrb[5].mxu1  ;;  %v898_v21 = vmul.f32 2.0, %v2633_v14 }
 0x1cb   : > { %v896_v22 = vmul.f32 2.0, %v780_v16  ;;  %973 = vmin.index.xlane.f32.xlu1 %v972_v19  ;;  %v2634_v23 = vpop.f32.mrb[6].mxu1 }
 0x1cc   : > { %967 = vmin.index.xlane.f32.xlu0 %v966_v24  ;;  %v783_v26 = vpop.f32.mrb[7].mxu1  ;;  %v899_v31 = vmul.f32 2.0, %v2634_v23  ;;  %v936_v45 = vsub.f32 %v3066_v57, %v898_v21 }
 0x1cd   : > { %v897_v36 = vmul.f32 2.0, %v783_v26  ;;  %v934_v37 = vsub.f32 %v3066_v57, %v896_v22 }
 0x1ce   : > { %v937_v55 = vsub.f32 %v3066_v57, %v899_v31  ;;  %v981_v63 = vsel %vm962_vm3, %v936_v45, inf }
 0x1cf   : > { %v975_v38 = vsel %vm962_vm3, %v934_v37, inf  ;;  %v935_v40 = vsub.f32 %v3066_v57, %v897_v36 }
 0x1d0   : > { %976 = vmin.index.xlane.f32.xlu0 %v975_v38  ;;  %v984_v4 = vsel %vm962_vm3, %v937_v55, inf }
 0x1d1   : > { %v2637_v48 = vpop.f32.mrb[8].mxu1  ;;  %v978_v53 = vsel %vm962_vm3, %v935_v40, inf }
 0x1d2   : > { %979 = vmin.index.xlane.f32.xlu1 %v978_v53  ;;  %v796_v56 = vpop.f32.mrb[9].mxu1  ;;  %v902_v58 = vmul.f32 2.0, %v2637_v48 }
 0x1d3   : > { %v900_v60 = vmul.f32 2.0, %v796_v56  ;;  %v2638_v27 = vpop.f32.mrb[10].mxu1 }
 0x1d4   : > { %982 = vmin.index.xlane.f32.xlu0 %v981_v63  ;;  %v799_v1 = vpop.f32.mrb[11].mxu1  ;;  %v903_v2 = vmul.f32 2.0, %v2638_v27  ;;  %v940_v12 = vsub.f32 %v3066_v57, %v902_v58 }
 0x1d5   : > { %v901_v3 = vmul.f32 2.0, %v799_v1  ;;  %v938_v6 = vsub.f32 %v3066_v57, %v900_v60 }
 0x1d6   : > { %985 = vmin.index.xlane.f32.xlu1 %v984_v4  ;;  %v941_v16 = vsub.f32 %v3066_v57, %v903_v2  ;;  %v993_v24 = vsel %vm962_vm3, %v940_v12, inf }
 0x1d7   : > { %v987_v9 = vsel %vm962_vm3, %v938_v6, inf  ;;  %v939_v11 = vsub.f32 %v3066_v57, %v901_v3 }
 0x1d8   : > { %988 = vmin.index.xlane.f32.xlu0 %v987_v9  ;;  %v996_v37 = vsel %vm962_vm3, %v941_v16, inf }
 0x1d9   : > { %v2641_v13 = vpop.f32.mrb[12].mxu1  ;;  %v990_v14 = vsel %vm962_vm3, %v939_v11, inf }
 0x1da   : > { %991 = vmin.index.xlane.f32.xlu1 %v990_v14  ;;  %v812_v19 = vpop.f32.mrb[13].mxu1  ;;  %v906_v21 = vmul.f32 2.0, %v2641_v13 }
 0x1db   : > { %v904_v22 = vmul.f32 2.0, %v812_v19  ;;  %v2642_v23 = vpop.f32.mrb[14].mxu1 }
 0x1dc   : > { %994 = vmin.index.xlane.f32.xlu0 %v993_v24  ;;  %v815_v26 = vpop.f32.mrb[15].mxu1  ;;  %v907_v31 = vmul.f32 2.0, %v2642_v23  ;;  %v944_v48 = vsub.f32 %v3066_v57, %v906_v21 }
 0x1dd   : > { %v905_v36 = vmul.f32 2.0, %v815_v26  ;;  %v942_v38 = vsub.f32 %v3066_v57, %v904_v22 }
 0x1de   : > { %997 = vmin.index.xlane.f32.xlu1 %v996_v37  ;;  %v945_v56 = vsub.f32 %v3066_v57, %v907_v31  ;;  %v1005_v1 = vsel %vm962_vm3, %v944_v48, inf }
 0x1df   : > { %v999_v40 = vsel %vm962_vm3, %v942_v38, inf  ;;  %v943_v45 = vsub.f32 %v3066_v57, %v905_v36 }
 0x1e0   : > { %1000 = vmin.index.xlane.f32.xlu0 %v999_v40  ;;  %v1008_v6 = vsel %vm962_vm3, %v945_v56, inf }
 0x1e1   : > { %v2645_v53 = vpop.f32.mrb[16].mxu1  ;;  %v1002_v55 = vsel %vm962_vm3, %v943_v45, inf }
 0x1e2   : > { %1003 = vmin.index.xlane.f32.xlu1 %v1002_v55  ;;  %v828_v58 = vpop.f32.mrb[17].mxu1  ;;  %v910_v60 = vmul.f32 2.0, %v2645_v53 }
 0x1e3   : > { %v908_v27 = vmul.f32 2.0, %v828_v58  ;;  %v2646_v63 = vpop.f32.mrb[18].mxu1 }
 0x1e4   : > { %1006 = vmin.index.xlane.f32.xlu0 %v1005_v1  ;;  %v831_v2 = vpop.f32.mrb[19].mxu1  ;;  %v911_v3 = vmul.f32 2.0, %v2646_v63  ;;  %v948_v13 = vsub.f32 %v3066_v57, %v910_v60 }
 0x1e5   : > { %v909_v4 = vmul.f32 2.0, %v831_v2  ;;  %v946_v9 = vsub.f32 %v3066_v57, %v908_v27 }
 0x1e6   : > { %1009 = vmin.index.xlane.f32.xlu1 %v1008_v6  ;;  %v949_v19 = vsub.f32 %v3066_v57, %v911_v3  ;;  %v1017_v26 = vsel %vm962_vm3, %v948_v13, inf }
 0x1e7   : > { %v1011_v11 = vsel %vm962_vm3, %v946_v9, inf  ;;  %v947_v12 = vsub.f32 %v3066_v57, %v909_v4 }
 0x1e8   : > { %1012 = vmin.index.xlane.f32.xlu0 %v1011_v11  ;;  %v1020_v38 = vsel %vm962_vm3, %v949_v19, inf }
 0x1e9   : > { %v2649_v14 = vpop.f32.mrb[20].mxu1  ;;  %v1014_v16 = vsel %vm962_vm3, %v947_v12, inf }
 0x1ea   : > { %1015 = vmin.index.xlane.f32.xlu1 %v1014_v16  ;;  %v844_v21 = vpop.f32.mrb[21].mxu1  ;;  %v914_v22 = vmul.f32 2.0, %v2649_v14 }
 0x1eb   : > { %v912_v23 = vmul.f32 2.0, %v844_v21  ;;  %v2650_v24 = vpop.f32.mrb[22].mxu1 }
 0x1ec   : > { %1018 = vmin.index.xlane.f32.xlu0 %v1017_v26  ;;  %v847_v31 = vpop.f32.mrb[23].mxu1  ;;  %v915_v36 = vmul.f32 2.0, %v2650_v24  ;;  %v952_v53 = vsub.f32 %v3066_v57, %v914_v22 }
 0x1ed   : > { %v913_v37 = vmul.f32 2.0, %v847_v31  ;;  %v950_v40 = vsub.f32 %v3066_v57, %v912_v23 }
 0x1ee   : > { %1021 = vmin.index.xlane.f32.xlu1 %v1020_v38  ;;  %v953_v58 = vsub.f32 %v3066_v57, %v915_v36  ;;  %v1029_v2 = vsel %vm962_vm3, %v952_v53, inf }
 0x1ef   : > { %v1023_v45 = vsel %vm962_vm3, %v950_v40, inf  ;;  %v951_v48 = vsub.f32 %v3066_v57, %v913_v37 }
 0x1f0   : > { %1024 = vmin.index.xlane.f32.xlu0 %v1023_v45  ;;  %v1032_v9 = vsel %vm962_vm3, %v953_v58, inf }
 0x1f1   : > { %v2653_v55 = vpop.f32.mrb[24].mxu1  ;;  %v1026_v56 = vsel %vm962_vm3, %v951_v48, inf }
 0x1f2   : > { %1027 = vmin.index.xlane.f32.xlu1 %v1026_v56  ;;  %v860_v60 = vpop.f32.mrb[25].mxu1  ;;  %v918_v27 = vmul.f32 2.0, %v2653_v55 }
 0x1f3   : > { %v916_v63 = vmul.f32 2.0, %v860_v60  ;;  %v2654_v1 = vpop.f32.mrb[26].mxu1 }
 0x1f4   : > { %1030 = vmin.index.xlane.f32.xlu0 %v1029_v2  ;;  %v863_v3 = vpop.f32.mrb[27].mxu1  ;;  %v919_v4 = vmul.f32 2.0, %v2654_v1  ;;  %v956_v14 = vsub.f32 %v3066_v57, %v918_v27  ;;  %v1059_v1 = vlaneseq }
 0x1f5   : > { %v917_v6 = vmul.f32 2.0, %v863_v3  ;;  %v954_v11 = vsub.f32 %v3066_v57, %v916_v63  ;;  %v2787_v63 = vld [vmem:[%s3561_s5] sm:$0xff]  }
 0x1f6   : > { %1033 = vmin.index.xlane.f32.xlu1 %v1032_v9  ;;  %v957_v21 = vsub.f32 %v3066_v57, %v919_v4  ;;  %v1041_v31 = vsel %vm962_vm3, %v956_v14, inf  ;;  %2715 = vmatprep.subr.bf16.mxu1 %v2787_v63  ;;  %v3136_v2 = vand.u32 127, %v1059_v1 }
 0x1f7   : > { %v1035_v12 = vsel %vm962_vm3, %v954_v11, inf  ;;  %v955_v13 = vsub.f32 %v3066_v57, %v917_v6  ;;  %2716 = vmatpush3.bf16.msra.mxu1 %v2787_v63 }
 0x1f8   : > { %1036 = vmin.index.xlane.f32.xlu0 %v1035_v12  ;;  %v1044_v40 = vsel %vm962_vm3, %v957_v21, inf }
 0x1f9   : > { %v2657_v16 = vpop.f32.mrb[28].mxu1  ;;  %v1038_v19 = vsel %vm962_vm3, %v955_v13, inf }
 0x1fa   : > { %1039 = vmin.index.xlane.f32.xlu1 %v1038_v19  ;;  %v876_v22 = vpop.f32.mrb[29].mxu1  ;;  %v922_v23 = vmul.f32 2.0, %v2657_v16 }
 0x1fb   : > { %v920_v24 = vmul.f32 2.0, %v876_v22  ;;  %v2658_v26 = vpop.f32.mrb[30].mxu1 }
 0x1fc   : > { %1042 = vmin.index.xlane.f32.xlu0 %v1041_v31  ;;  %v879_v36 = vpop.f32.mrb[31].mxu1  ;;  %v923_v37 = vmul.f32 2.0, %v2658_v26  ;;  %v960_v55 = vsub.f32 %v3066_v57, %v922_v23 }
 0x1fd   : > { %v921_v38 = vmul.f32 2.0, %v879_v36  ;;  %v958_v45 = vsub.f32 %v3066_v57, %v920_v24 }
 0x1fe   : > { %1045 = vmin.index.xlane.f32.xlu1 %v1044_v40  ;;  %v961_v58 = vsub.f32 %v3066_v57, %v923_v37  ;;  %v1053_v60 = vsel %vm962_vm3, %v960_v55, inf }
 0x1ff   : > { %v1047_v48 = vsel %vm962_vm3, %v958_v45, inf  ;;  %v959_v53 = vsub.f32 %v3066_v57, %v921_v38  ;;  %v2796_v57 = vmov 0.0  }
 0x200   : > { %1048 = vmin.index.xlane.f32.xlu0 %v1047_v48  ;;  %v1056_v27 = vsel %vm962_vm3, %v961_v58, inf }
 0x201   : > { %v1050_v56 = vsel %vm962_vm3, %v959_v53, inf }
 0x202   : > { %1051 = vmin.index.xlane.f32.xlu1 %v1050_v56 }
 0x204   : > { %1054 = vmin.index.xlane.f32.xlu0 %v1053_v60 }
 0x206   : > { %1057 = vmin.index.xlane.f32.xlu1 %v1056_v27 }
 0x254   : > { %v971_v3 = vpop.xlane.xlu1 %970 }
 0x255   : > { %v965_v4 = vpop.xlane.xlu0 %964  ;;  %vm1063_vm5 = vcmp.eq.s32.totalorder %v3136_v2, %v971_v3 }
 0x256   : > { %vm1061_vm4 = vcmp.eq.s32.totalorder %v3136_v2, %v965_v4  ;;  %v2354_v13 = vsel %vm1063_vm5, 1.0, %v2796_v57 }
 0x257   : > { %v2352_v6 = vsel %vm1061_vm4, 1.0, %v2796_v57 }
 0x258   : > { %2667 = vmatprep.mubr.msk.f32.mxu0 %vm962_vm3, %v2352_v6  ;;  %v974_v9 = vpop.xlane.xlu1 %973 }
 0x259   : > { %v968_v11 = vpop.xlane.xlu0 %967  ;;  %vm1064_vm7 = vcmp.eq.s32.totalorder %v3136_v2, %v974_v9 }
 0x25a   : > { %vm1062_vm6 = vcmp.eq.s32.totalorder %v3136_v2, %v968_v11  ;;  %v2355_v16 = vsel %vm1064_vm7, 1.0, %v2796_v57 }
 0x25b   : > { %v2353_v12 = vsel %vm1062_vm6, 1.0, %v2796_v57 }
 0x25c   : > { %2668 = vmatmul.mubr.msk.f32.vlgmr.msra.gmra.mrb[32].mxu0 %vm962_vm3, %v2353_v12 }
 0x25d   : > { %2670 = vmatprep.mubr.msk.f32.mxu0 %vm962_vm3, %v2354_v13  ;;  %v977_v14 = vpop.xlane.xlu0 %976 }
 0x25e   : > { %vm1065_vm8 = vcmp.eq.s32.totalorder %v3136_v2, %v977_v14 }
 0x25f   : > { %v2356_v19 = vsel %vm1065_vm8, 1.0, %v2796_v57  ;;  %v980_v21 = vpop.xlane.xlu1 %979 }
 0x260   : > { %vm1066_vm9 = vcmp.eq.s32.totalorder %v3136_v2, %v980_v21  ;;  %2671 = vmatmul.mubr.msk.f32.gmra.mrb[34].mxu0 %vm962_vm3, %v2355_v16 }
 0x261   : > { %2673 = vmatprep.mubr.msk.f32.mxu0 %vm962_vm3, %v2356_v19  ;;  %v983_v22 = vpop.xlane.xlu0 %982  ;;  %v2357_v23 = vsel %vm1066_vm9, 1.0, %v2796_v57 }
 0x262   : > { %vm1067_vm10 = vcmp.eq.s32.totalorder %v3136_v2, %v983_v22 }
 0x263   : > { %v2358_v24 = vsel %vm1067_vm10, 1.0, %v2796_v57  ;;  %v986_v26 = vpop.xlane.xlu1 %985 }
 0x264   : > { %vm1068_vm11 = vcmp.eq.s32.totalorder %v3136_v2, %v986_v26  ;;  %2674 = vmatmul.mubr.msk.f32.gmra.mrb[36].mxu0 %vm962_vm3, %v2357_v23 }
 0x265   : > { %2676 = vmatprep.mubr.msk.f32.mxu0 %vm962_vm3, %v2358_v24  ;;  %v989_v31 = vpop.xlane.xlu0 %988  ;;  %v2359_v36 = vsel %vm1068_vm11, 1.0, %v2796_v57 }
 0x266   : > { %vm1069_vm12 = vcmp.eq.s32.totalorder %v3136_v2, %v989_v31 }
 0x267   : > { %v2360_v37 = vsel %vm1069_vm12, 1.0, %v2796_v57  ;;  %v992_v38 = vpop.xlane.xlu1 %991 }
 0x268   : > { %vm1070_vm13 = vcmp.eq.s32.totalorder %v3136_v2, %v992_v38  ;;  %2677 = vmatmul.mubr.msk.f32.gmra.mrb[38].mxu0 %vm962_vm3, %v2359_v36 }
 0x269   : > { %2679 = vmatprep.mubr.msk.f32.mxu0 %vm962_vm3, %v2360_v37  ;;  %v995_v40 = vpop.xlane.xlu0 %994  ;;  %v2361_v45 = vsel %vm1070_vm13, 1.0, %v2796_v57 }
 0x26a   : > { %vm1071_vm14 = vcmp.eq.s32.totalorder %v3136_v2, %v995_v40 }
 0x26b   : > { %v2362_v48 = vsel %vm1071_vm14, 1.0, %v2796_v57  ;;  %v998_v53 = vpop.xlane.xlu1 %997 }
 0x26c   : > { %vm1072_vm15 = vcmp.eq.s32.totalorder %v3136_v2, %v998_v53  ;;  %2680 = vmatmul.mubr.msk.f32.gmra.mrb[40].mxu0 %vm962_vm3, %v2361_v45 }
 0x26d   : > { %2682 = vmatprep.mubr.msk.f32.mxu0 %vm962_vm3, %v2362_v48  ;;  %v1001_v55 = vpop.xlane.xlu0 %1000  ;;  %v2363_v56 = vsel %vm1072_vm15, 1.0, %v2796_v57 }
 0x26e   : > { %vm1073_vm0 = vcmp.eq.s32.totalorder %v3136_v2, %v1001_v55 }
 0x26f   : > { %v2364_v58 = vsel %vm1073_vm0, 1.0, %v2796_v57  ;;  %v1004_v60 = vpop.xlane.xlu1 %1003 }
 0x270   : > { %vm1074_vm2 = vcmp.eq.s32.totalorder %v3136_v2, %v1004_v60  ;;  %2683 = vmatmul.mubr.msk.f32.gmra.mrb[42].mxu0 %vm962_vm3, %v2363_v56 }
 0x271   : > { %2685 = vmatprep.mubr.msk.f32.mxu0 %vm962_vm3, %v2364_v58  ;;  %v1007_v27 = vpop.xlane.xlu0 %1006  ;;  %v2365_v63 = vsel %vm1074_vm2, 1.0, %v2796_v57 }
 0x272   : > { %vm1075_vm4 = vcmp.eq.s32.totalorder %v3136_v2, %v1007_v27 }
 0x273   : > { %v2366_v3 = vsel %vm1075_vm4, 1.0, %v2796_v57  ;;  %v1010_v4 = vpop.xlane.xlu1 %1009 }
 0x274   : > { %vm1076_vm5 = vcmp.eq.s32.totalorder %v3136_v2, %v1010_v4  ;;  %2686 = vmatmul.mubr.msk.f32.gmra.mrb[44].mxu0 %vm962_vm3, %v2365_v63 }
 0x275   : > { %2688 = vmatprep.mubr.msk.f32.mxu0 %vm962_vm3, %v2366_v3  ;;  %v1013_v6 = vpop.xlane.xlu0 %1012  ;;  %v2367_v9 = vsel %vm1076_vm5, 1.0, %v2796_v57 }
 0x276   : > { %vm1077_vm6 = vcmp.eq.s32.totalorder %v3136_v2, %v1013_v6 }
 0x277   : > { %v2368_v11 = vsel %vm1077_vm6, 1.0, %v2796_v57  ;;  %v1016_v12 = vpop.xlane.xlu1 %1015 }
 0x278   : > { %vm1078_vm7 = vcmp.eq.s32.totalorder %v3136_v2, %v1016_v12  ;;  %2689 = vmatmul.mubr.msk.f32.gmra.mrb[46].mxu0 %vm962_vm3, %v2367_v9 }
 0x279   : > { %2691 = vmatprep.mubr.msk.f32.mxu0 %vm962_vm3, %v2368_v11  ;;  %v1019_v13 = vpop.xlane.xlu0 %1018  ;;  %v2369_v14 = vsel %vm1078_vm7, 1.0, %v2796_v57 }
 0x27a   : > { %vm1079_vm8 = vcmp.eq.s32.totalorder %v3136_v2, %v1019_v13  ;;  %v3235_v13 = vshrl.u32 %v1059_v1, 7 }
 0x27b   : > { %v2370_v16 = vsel %vm1079_vm8, 1.0, %v2796_v57  ;;  %v1022_v19 = vpop.xlane.xlu1 %1021 }
 0x27c   : > { %vm1080_vm9 = vcmp.eq.s32.totalorder %v3136_v2, %v1022_v19  ;;  %2692 = vmatmul.mubr.msk.f32.gmra.mrb[48].mxu0 %vm962_vm3, %v2369_v14  ;;  %v1481_v14 = vadd.s32 8, %v3235_v13  ;;  %v1483_v19 = vadd.s32 24, %v3235_v13  ;;  %v1487_v1 = vadd.s32 56, %v3235_v13 }
 0x27d   : > { %2694 = vmatprep.mubr.msk.f32.mxu0 %vm962_vm3, %v2370_v16  ;;  %v1025_v21 = vpop.xlane.xlu0 %1024  ;;  %v2371_v22 = vsel %vm1080_vm9, 1.0, %v2796_v57  ;;  %v3239_v16 = vstv %s2416_s30 }
 0x27e   : > { %vm1081_vm10 = vcmp.eq.s32.totalorder %v3136_v2, %v1025_v21  ;;  %v1485_v21 = vadd.s32 40, %v3235_v13 }
 0x27f   : > { %v2372_v23 = vsel %vm1081_vm10, 1.0, %v2796_v57  ;;  %v1028_v24 = vpop.xlane.xlu1 %1027 }
 0x280   : > { %vm1082_vm11 = vcmp.eq.s32.totalorder %v3136_v2, %v1028_v24  ;;  %2695 = vmatmul.mubr.msk.f32.gmra.mrb[50].mxu0 %vm962_vm3, %v2371_v22  ;;  %v1484_v22 = vadd.s32 32, %v3235_v13  ;;  %v1516_v24 = vadd.s32 %v3239_v16, %v1483_v19 }
 0x281   : > { %2697 = vmatprep.mubr.msk.f32.mxu0 %vm962_vm3, %v2372_v23  ;;  %v1031_v26 = vpop.xlane.xlu0 %1030  ;;  %v2373_v31 = vsel %vm1082_vm11, 1.0, %v2796_v57  ;;  %v1513_v23 = vadd.s32 %v3239_v16, %v3235_v13 }
 0x282   : > { %vm1083_vm12 = vcmp.eq.s32.totalorder %v3136_v2, %v1031_v26  ;;  %vm1548_vm9 = vcmp.lt.s32.totalorder %v1516_v24, 512 }
 0x283   : > { %v2374_v36 = vsel %vm1083_vm12, 1.0, %v2796_v57  ;;  %v1034_v37 = vpop.xlane.xlu1 %1033  ;;  %vm1545_vm8 = vcmp.lt.s32.totalorder %v1513_v23, 512 }
 0x284   : > { %vm1084_vm13 = vcmp.eq.s32.totalorder %v3136_v2, %v1034_v37  ;;  %2698 = vmatmul.mubr.msk.f32.gmra.mrb[52].mxu0 %vm962_vm3, %v2373_v31  ;;  %v1518_v31 = vadd.s32 %v3239_v16, %v1485_v21  ;;  %v1517_v37 = vadd.s32 %v3239_v16, %v1484_v22 }
 0x285   : > { %2700 = vmatprep.mubr.msk.f32.mxu0 %vm962_vm3, %v2374_v36  ;;  %v1037_v38 = vpop.xlane.xlu0 %1036  ;;  %v2375_v40 = vsel %vm1084_vm13, 1.0, %v2796_v57 }
 0x286   : > { %vm1085_vm14 = vcmp.eq.s32.totalorder %v3136_v2, %v1037_v38  ;;  %vm1550_vm11 = vcmp.lt.s32.totalorder %v1518_v31, 512  ;;  %vm1549_vm12 = vcmp.lt.s32.totalorder %v1517_v37, 512 }
 0x287   : > { %v2376_v45 = vsel %vm1085_vm14, 1.0, %v2796_v57  ;;  %v1040_v48 = vpop.xlane.xlu1 %1039 }
 0x288   : > { %vm1086_vm15 = vcmp.eq.s32.totalorder %v3136_v2, %v1040_v48  ;;  %2701 = vmatmul.mubr.msk.f32.gmra.mrb[54].mxu0 %vm962_vm3, %v2375_v40  ;;  %v1486_v48 = vadd.s32 48, %v3235_v13 }
 0x289   : > { %2703 = vmatprep.mubr.msk.f32.mxu0 %vm962_vm3, %v2376_v45  ;;  %v1043_v53 = vpop.xlane.xlu0 %1042  ;;  %v2377_v55 = vsel %vm1086_vm15, 1.0, %v2796_v57  ;;  %v3255_v45 = vadd.s32 %v3239_v16, %v1487_v1 }
 0x28a   : > { %vm1087_vm0 = vcmp.eq.s32.totalorder %v3136_v2, %v1043_v53 }
 0x28b   : > { %v2378_v56 = vsel %vm1087_vm0, 1.0, %v2796_v57  ;;  %v1046_v58 = vpop.xlane.xlu1 %1045  ;;  %vm1552_vm13 = vcmp.lt.s32.totalorder %v3255_v45, 512 }
 0x28c   : > { %vm1088_vm2 = vcmp.eq.s32.totalorder %v3136_v2, %v1046_v58  ;;  %2704 = vmatmul.mubr.msk.f32.gmra.mrb[56].mxu0 %vm962_vm3, %v2377_v55 }
 0x28d   : > { %2706 = vmatprep.mubr.msk.f32.mxu0 %vm962_vm3, %v2378_v56  ;;  %v1049_v60 = vpop.xlane.xlu0 %1048  ;;  %v2379_v27 = vsel %vm1088_vm2, 1.0, %v2796_v57  ;;  %v1489_v56 = vadd.s32 72, %v3235_v13 }
 0x28e   : > { %vm1089_vm4 = vcmp.eq.s32.totalorder %v3136_v2, %v1049_v60  ;;  %v1488_v60 = vadd.s32 64, %v3235_v13 }
 0x28f   : > { %v2380_v63 = vsel %vm1089_vm4, 1.0, %v2796_v57  ;;  %v1052_v3 = vpop.xlane.xlu1 %1051  ;;  %v1522_v19 = vadd.s32 %v3239_v16, %v1489_v56 }
 0x290   : > { %vm1090_vm5 = vcmp.eq.s32.totalorder %v3136_v2, %v1052_v3  ;;  %2707 = vmatmul.mubr.msk.f32.gmra.mrb[58].mxu0 %vm962_vm3, %v2379_v27  ;;  %v1491_v3 = vadd.s32 88, %v3235_v13 }
 0x291   : > { %2709 = vmatprep.mubr.msk.f32.mxu0 %vm962_vm3, %v2380_v63  ;;  %v1055_v4 = vpop.xlane.xlu0 %1054  ;;  %v2381_v6 = vsel %vm1090_vm5, 1.0, %v2796_v57  ;;  %vm1554_vm15 = vcmp.lt.s32.totalorder %v1522_v19, 512 }
 0x292   : > { %vm1091_vm6 = vcmp.eq.s32.totalorder %v3136_v2, %v1055_v4 }
 0x293   : > { %v2382_v9 = vsel %vm1091_vm6, 1.0, %v2796_v57  ;;  %v1058_v11 = vpop.xlane.xlu1 %1057 }
 0x294   : > { %vm1092_vm7 = vcmp.eq.s32.totalorder %v3136_v2, %v1058_v11  ;;  %2710 = vmatmul.mubr.msk.f32.gmra.mrb[60].mxu0 %vm962_vm3, %v2381_v6  ;;  %v1482_v2 = vadd.s32 16, %v3235_v13 }
 0x295   : > { %v2383_v12 = vsel %vm1092_vm7, 1.0, %v2796_v57  ;;  %2712 = vmatprep.mubr.msk.f32.mxu0 %vm962_vm3, %v2382_v9  ;;  %v1514_v57 = vadd.s32 %v3239_v16, %v1481_v14  ;;  %v1519_v9 = vadd.s32 %v3239_v16, %v1486_v48 }
 0x296   : > { %v1515_v26 = vadd.s32 %v3239_v16, %v1482_v2 }
 0x297   : > { %vm1551_vm14 = vcmp.lt.s32.totalorder %v1519_v9, 512 }
 0x298   : > { %2713 = vmatmul.mubr.msk.f32.gmra.mrb[62].mxu0 %vm962_vm3, %v2383_v12  ;;  %vm1546_vm3 = vcmp.lt.s32.totalorder %v1514_v57, 512  ;;  %vm1547_vm10 = vcmp.lt.s32.totalorder %v1515_v26, 512  ;;  %v3272_v57 = vadd.s32 %v3239_v16, %v1488_v60  ;;  %v1492_v26 = vadd.s32 96, %v3235_v13 }
 0x29a   : > { %vm1553_vm0 = vcmp.lt.s32.totalorder %v3272_v57, 512 }
 0x32f   : > { %v2669_v36 = vpop.f32.mrb[32].mxu0 }
 0x330   : > { %v1578_v38 = vsub.f32 %v2669_v36, %v2926_v33  ;;  %v1319_v40 = vpop.f32.mrb[33].mxu0 }
 0x331   : > { %v1577_v53 = vsub.f32 %v1319_v40, %v2923_v32  ;;  %v1811_v55 = vpack.c.bf16 %v2669_v36, %v1319_v40  ;;  %v1493_v36 = vadd.s32 104, %v3235_v13 }
 0x332   : > { %v1674_v58 = vsel %vm1546_vm3, %v1578_v38, 0.0 }
 0x333   : > { %v1706_v27 = vmul.f32 %v1674_v58, %v1674_v58  ;;  %v1673_v33 = vsel %vm1545_vm8, %v1577_v53, 0.0  ;;  %v2672_v63 = vpop.f32.mrb[34].mxu0  ;;  %2717 = vmatprep.mubr.msk.bf16.mxu1 %vm675_vm1, %v1811_v55 }
 0x334   : > { %v1705_v4 = vmul.f32 %v1673_v33, %v1673_v33  ;;  %v1580_v32 = vsub.f32 %v2672_v63, %v2920_v30  ;;  %v1329_v6 = vpop.f32.mrb[35].mxu0  ;;  %v1490_v30 = vadd.s32 80, %v3235_v13 }
 0x335   : > { %v1738_v11 = vsel %vm675_vm1, %v1706_v27, 0.0  ;;  %v1579_v12 = vsub.f32 %v1329_v6, %v2929_v34  ;;  %v1812_v14 = vpack.c.bf16 %v2672_v63, %v1329_v6  ;;  %v3278_v34 = vadd.s32 %v3239_v16, %v1491_v3 }
 0x336   : > { %v1737_v2 = vsel %vm675_vm1, %v1705_v4, 0.0  ;;  %v1676_v21 = vsel %vm1548_vm9, %v1580_v32, 0.0  ;;  %v1523_v60 = vadd.s32 %v3239_v16, %v1490_v30  ;;  %v1495_v63 = vadd.s32 120, %v3235_v13 }
 0x337   : > { %v1739_v22 = vadd.f32 %v1738_v11, %v1737_v2  ;;  %v1675_v23 = vsel %vm1547_vm10, %v1579_v12, 0.0  ;;  %v2675_v1 = vpop.f32.mrb[36].mxu0  ;;  %2718 = vmatmul.mubr.msk.bf16.vlgmr.msra.gmra.mrb[32].mxu1 %vm675_vm1, %v1812_v14  ;;  %v1708_v38 = vmul.f32 %v1676_v21, %v1676_v21  ;;  %vm1556_vm2 = vcmp.lt.s32.totalorder %v3278_v34, 512 }
 0x338   : > { %v1707_v40 = vmul.f32 %v1675_v23, %v1675_v23  ;;  %v1582_v24 = vsub.f32 %v2675_v1, %v2947_v44  ;;  %v1339_v48 = vpop.f32.mrb[37].mxu0  ;;  %v3299_v14 = vadd.s32 %v3239_v16, %v1492_v26  ;;  %vm1555_vm4 = vcmp.lt.s32.totalorder %v1523_v60, 512 }
 0x339   : > { %v1581_v53 = vsub.f32 %v1339_v48, %v2938_v39  ;;  %v1813_v55 = vpack.c.bf16 %v2675_v1, %v1339_v48  ;;  %v3292_v39 = vadd.s32 %v3239_v16, %v1493_v36  ;;  %v1742_v31 = vsel %vm675_vm1, %v1708_v38, 0.0 }
 0x33a   : > { %v1740_v56 = vsel %vm675_vm1, %v1707_v40, 0.0  ;;  %v1678_v58 = vsel %vm1550_vm11, %v1582_v24, 0.0  ;;  %v1494_v30 = vadd.s32 112, %v3235_v13  ;;  %v1497_v1 = vadd.s32 136, %v3235_v13 }
 0x33b   : > { %v1741_v27 = vadd.f32 %v1740_v56, %v1739_v22  ;;  %v1677_v33 = vsel %vm1549_vm12, %v1581_v53, 0.0  ;;  %v2678_v44 = vpop.f32.mrb[38].mxu0  ;;  %2721 = vmatprep.mubr.msk.bf16.mxu1 %vm675_vm1, %v1813_v55  ;;  %v1710_v3 = vmul.f32 %v1678_v58, %v1678_v58  ;;  %vm1558_vm5 = vcmp.lt.s32.totalorder %v3292_v39, 512 }
 0x33c   : > { %v1709_v4 = vmul.f32 %v1677_v33, %v1677_v33  ;;  %v1584_v32 = vsub.f32 %v2678_v44, %v2944_v42  ;;  %v1349_v6 = vpop.f32.mrb[39].mxu0  ;;  %vm1557_vm6 = vcmp.lt.s32.totalorder %v3299_v14, 512  ;;  %v1527_v56 = vadd.s32 %v3239_v16, %v1494_v30 }
 0x33d   : > { %v1743_v11 = vadd.f32 %v1742_v31, %v1741_v27  ;;  %v1583_v37 = vsub.f32 %v1349_v6, %v2941_v41  ;;  %v1814_v12 = vpack.c.bf16 %v2678_v44, %v1349_v6  ;;  %v3309_v41 = vadd.s32 %v3239_v16, %v1495_v63 }
 0x33e   : > { %v1744_v2 = vsel %vm675_vm1, %v1709_v4, 0.0  ;;  %v1680_v21 = vsel %vm1552_vm13, %v1584_v32, 0.0  ;;  %v1746_v36 = vsel %vm675_vm1, %v1710_v3, 0.0  ;;  %v1496_v58 = vadd.s32 128, %v3235_v13 }
 0x33f   : > { %v1745_v22 = vadd.f32 %v1744_v2, %v1743_v11  ;;  %v1679_v23 = vsel %vm1551_vm14, %v1583_v37, 0.0  ;;  %v2681_v42 = vpop.f32.mrb[40].mxu0  ;;  %2722 = vmatmul.mubr.msk.bf16.gmra.mrb[36].mxu1 %vm675_vm1, %v1814_v12  ;;  %v1712_v45 = vmul.f32 %v1680_v21, %v1680_v21  ;;  %vm1560_vm7 = vcmp.lt.s32.totalorder %v3309_v41, 512 }
 0x340   : > { %v1711_v38 = vmul.f32 %v1679_v23, %v1679_v23  ;;  %v1586_v40 = vsub.f32 %v2681_v42, %v2965_v54  ;;  %v1359_v24 = vpop.f32.mrb[41].mxu0  ;;  %v1499_v6 = vadd.s32 152, %v3235_v13  ;;  %vm1559_vm3 = vcmp.lt.s32.totalorder %v1527_v56, 512 }
 0x341   : > { %v1747_v48 = vadd.f32 %v1746_v36, %v1745_v22  ;;  %v1585_v9 = vsub.f32 %v1359_v24, %v2956_v49  ;;  %v1815_v53 = vpack.c.bf16 %v2681_v42, %v1359_v24  ;;  %v3325_v49 = vadd.s32 %v3239_v16, %v1497_v1 }
 0x342   : > { %v1748_v55 = vsel %vm675_vm1, %v1711_v38, 0.0  ;;  %v1682_v26 = vsel %vm1554_vm15, %v1586_v40, 0.0  ;;  %v1750_v44 = vsel %vm675_vm1, %v1712_v45, 0.0  ;;  %v1529_v12 = vadd.s32 %v3239_v16, %v1496_v58 }
 0x343   : > { %v1749_v27 = vadd.f32 %v1748_v55, %v1747_v48  ;;  %v1681_v33 = vsel %vm1553_vm0, %v1585_v9, 0.0  ;;  %v2684_v54 = vpop.f32.mrb[42].mxu0  ;;  %2725 = vmatprep.mubr.msk.bf16.mxu1 %vm675_vm1, %v1815_v53  ;;  %v1714_v19 = vmul.f32 %v1682_v26, %v1682_v26  ;;  %vm1562_vm8 = vcmp.lt.s32.totalorder %v3325_v49, 512 }
 0x344   : > { %v1713_v63 = vmul.f32 %v1681_v33, %v1681_v33  ;;  %v1588_v31 = vsub.f32 %v2684_v54, %v2962_v52  ;;  %v1369_v3 = vpop.f32.mrb[43].mxu0  ;;  %v1532_v60 = vadd.s32 %v3239_v16, %v1499_v6  ;;  %vm1561_vm9 = vcmp.lt.s32.totalorder %v1529_v12, 512 }
 0x345   : > { %v1751_v4 = vadd.f32 %v1750_v44, %v1749_v27  ;;  %v1587_v32 = vsub.f32 %v1369_v3, %v2959_v51  ;;  %v1816_v57 = vpack.c.bf16 %v2684_v54, %v1369_v3  ;;  %v1498_v51 = vadd.s32 144, %v3235_v13 }
 0x346   : > { %v1752_v11 = vsel %vm675_vm1, %v1713_v63, 0.0  ;;  %v1684_v37 = vsel %vm1556_vm2, %v1588_v31, 0.0  ;;  %v1754_v52 = vsel %vm675_vm1, %v1714_v19, 0.0  ;;  %v1501_v24 = vadd.s32 168, %v3235_v13 }
 0x347   : > { %v1753_v2 = vadd.f32 %v1752_v11, %v1751_v4  ;;  %v1683_v21 = vsel %vm1555_vm4, %v1587_v32, 0.0  ;;  %v2687_v30 = vpop.f32.mrb[44].mxu0  ;;  %2726 = vmatmul.mubr.msk.bf16.gmra.mrb[40].mxu1 %vm675_vm1, %v1816_v57  ;;  %v1716_v22 = vmul.f32 %v1684_v37, %v1684_v37  ;;  %v1500_v53 = vadd.s32 160, %v3235_v13 }
 0x348   : > { %v1715_v23 = vmul.f32 %v1683_v21, %v1683_v21  ;;  %v1590_v34 = vsub.f32 %v2687_v30, %v2983_v0  ;;  %v1379_v42 = vpop.f32.mrb[45].mxu0  ;;  %vm1564_vm10 = vcmp.lt.s32.totalorder %v1532_v60, 512  ;;  %v1534_v63 = vadd.s32 %v3239_v16, %v1501_v24 }
 0x349   : > { %v1755_v1 = vadd.f32 %v1754_v52, %v1753_v2  ;;  %v1589_v36 = vsub.f32 %v1379_v42, %v2974_v59  ;;  %v1817_v45 = vpack.c.bf16 %v2687_v30, %v1379_v42  ;;  %v1531_v59 = vadd.s32 %v3239_v16, %v1498_v51 }
 0x34a   : > { %v1756_v38 = vsel %vm675_vm1, %v1715_v23, 0.0  ;;  %v1686_v40 = vsel %vm1558_vm5, %v1590_v34, 0.0  ;;  %v1758_v55 = vsel %vm675_vm1, %v1716_v22, 0.0  ;;  %v1503_v31 = vadd.s32 184, %v3235_v13 }
 0x34b   : > { %v1757_v48 = vadd.f32 %v1756_v38, %v1755_v1  ;;  %v1685_v9 = vsel %vm1557_vm6, %v1589_v36, 0.0  ;;  %v2690_v0 = vpop.f32.mrb[46].mxu0  ;;  %2729 = vmatprep.mubr.msk.bf16.mxu1 %vm675_vm1, %v1817_v45  ;;  %v1718_v26 = vmul.f32 %v1686_v40, %v1686_v40  ;;  %vm1563_vm11 = vcmp.lt.s32.totalorder %v1531_v59, 512 }
 0x34c   : > { %v1717_v58 = vmul.f32 %v1685_v9, %v1685_v9  ;;  %v1592_v39 = vsub.f32 %v2690_v0, %v2980_v62  ;;  %v1389_v27 = vpop.f32.mrb[47].mxu0  ;;  %v1502_v56 = vadd.s32 176, %v3235_v13  ;;  %vm1566_vm12 = vcmp.lt.s32.totalorder %v1534_v63, 512 }
 0x34d   : > { %v1759_v33 = vadd.f32 %v1758_v55, %v1757_v48  ;;  %v1591_v54 = vsub.f32 %v1389_v27, %v2977_v61  ;;  %v1818_v44 = vpack.c.bf16 %v2690_v0, %v1389_v27  ;;  %v1533_v61 = vadd.s32 %v3239_v16, %v1500_v53 }
 0x34e   : > { %v1760_v14 = vsel %vm675_vm1, %v1717_v58, 0.0  ;;  %v1688_v19 = vsel %vm1560_vm7, %v1592_v39, 0.0  ;;  %v1762_v62 = vsel %vm675_vm1, %v1718_v26, 0.0  ;;  %v1536_v52 = vadd.s32 %v3239_v16, %v1503_v31 }
 0x34f   : > { %v1761_v3 = vadd.f32 %v1760_v14, %v1759_v33  ;;  %v1687_v4 = vsel %vm1559_vm3, %v1591_v54, 0.0  ;;  %v2693_v32 = vpop.f32.mrb[48].mxu0  ;;  %2730 = vmatmul.mubr.msk.bf16.gmra.mrb[44].mxu1 %vm675_vm1, %v1818_v44  ;;  %v1720_v57 = vmul.f32 %v1688_v19, %v1688_v19  ;;  %vm1565_vm13 = vcmp.lt.s32.totalorder %v1533_v61, 512 }
 0x350   : > { %v1719_v6 = vmul.f32 %v1687_v4, %v1687_v4  ;;  %v1594_v41 = vsub.f32 %v2693_v32, %v3001_v10  ;;  %v1399_v11 = vpop.f32.mrb[49].mxu0  ;;  %v1535_v12 = vadd.s32 %v3239_v16, %v1502_v56  ;;  %vm1568_vm14 = vcmp.lt.s32.totalorder %v1536_v52, 512 }
 0x351   : > { %v1763_v37 = vadd.f32 %v1762_v62, %v1761_v3  ;;  %v1593_v2 = vsub.f32 %v1399_v11, %v2992_v5  ;;  %v1819_v21 = vpack.c.bf16 %v2693_v32, %v1399_v11  ;;  %v1505_v5 = vadd.s32 200, %v3235_v13 }
 0x352   : > { %v1764_v30 = vsel %vm675_vm1, %v1719_v6, 0.0  ;;  %v1690_v51 = vsel %vm1562_vm8, %v1594_v41, 0.0  ;;  %v1766_v10 = vsel %vm675_vm1, %v1720_v57, 0.0  ;;  %v1504_v9 = vadd.s32 192, %v3235_v13 }
 0x353   : > { %v1765_v22 = vadd.f32 %v1764_v30, %v1763_v37  ;;  %v1689_v23 = vsel %vm1561_vm9, %v1593_v2, 0.0  ;;  %v2696_v34 = vpop.f32.mrb[50].mxu0  ;;  %2733 = vmatprep.mubr.msk.bf16.mxu1 %vm675_vm1, %v1819_v21  ;;  %v1722_v42 = vmul.f32 %v1690_v51, %v1690_v51  ;;  %v1506_v59 = vadd.s32 208, %v3235_v13 }
 0x354   : > { %v1721_v1 = vmul.f32 %v1689_v23, %v1689_v23  ;;  %v1596_v36 = vsub.f32 %v2696_v34, %v2998_v8  ;;  %v1409_v49 = vpop.f32.mrb[51].mxu0  ;;  %v1538_v8 = vadd.s32 %v3239_v16, %v1505_v5  ;;  %vm1567_vm15 = vcmp.lt.s32.totalorder %v1535_v12, 512 }
 0x355   : > { %v1767_v45 = vadd.f32 %v1766_v10, %v1765_v22  ;;  %v1595_v38 = vsub.f32 %v1409_v49, %v2995_v7  ;;  %v1820_v40 = vpack.c.bf16 %v2696_v34, %v1409_v49  ;;  %v1507_v7 = vadd.s32 216, %v3235_v13 }
 0x356   : > { %v1768_v24 = vsel %vm675_vm1, %v1721_v1, 0.0  ;;  %v1692_v48 = vsel %vm1564_vm10, %v1596_v36, 0.0  ;;  %v1770_v26 = vsel %vm675_vm1, %v1722_v42, 0.0  ;;  %v1537_v31 = vadd.s32 %v3239_v16, %v1504_v9 }
 0x357   : > { %v1769_v0 = vadd.f32 %v1768_v24, %v1767_v45  ;;  %v1691_v53 = vsel %vm1563_vm11, %v1595_v38, 0.0  ;;  %v2699_v55 = vpop.f32.mrb[52].mxu0  ;;  %2734 = vmatmul.mubr.msk.bf16.gmra.mrb[48].mxu1 %vm675_vm1, %v1820_v40  ;;  %v1724_v58 = vmul.f32 %v1692_v48, %v1692_v48  ;;  %vm1570_vm0 = vcmp.lt.s32.totalorder %v1538_v8, 512 }
 0x358   : > { %v1723_v39 = vmul.f32 %v1691_v53, %v1691_v53  ;;  %v1598_v60 = vsub.f32 %v2699_v55, %v3019_v20  ;;  %v1419_v27 = vpop.f32.mrb[53].mxu0  ;;  %v1540_v20 = vadd.s32 %v3239_v16, %v1507_v7  ;;  %v1539_v61 = vadd.s32 %v3239_v16, %v1506_v59 }
 0x359   : > { %v1771_v33 = vadd.f32 %v1770_v26, %v1769_v0  ;;  %v1597_v54 = vsub.f32 %v1419_v27, %v3010_v15  ;;  %v1821_v44 = vpack.c.bf16 %v2699_v55, %v1419_v27  ;;  %v1774_v15 = vsel %vm675_vm1, %v1724_v58, 0.0 }
 0x35a   : > { %v1772_v14 = vsel %vm675_vm1, %v1723_v39, 0.0  ;;  %v1694_v19 = vsel %vm1566_vm12, %v1598_v60, 0.0  ;;  %v1509_v56 = vadd.s32 232, %v3235_v13  ;;  %v1508_v30 = vadd.s32 224, %v3235_v13 }
 0x35b   : > { %v1773_v3 = vadd.f32 %v1772_v14, %v1771_v33  ;;  %v1693_v4 = vsel %vm1565_vm13, %v1597_v54, 0.0  ;;  %v2702_v32 = vpop.f32.mrb[54].mxu0  ;;  %2737 = vmatprep.mubr.msk.bf16.mxu1 %vm675_vm1, %v1821_v44  ;;  %v1726_v62 = vmul.f32 %v1694_v19, %v1694_v19  ;;  %vm1569_vm2 = vcmp.lt.s32.totalorder %v1537_v31, 512 }
 0x35c   : > { %v1725_v57 = vmul.f32 %v1693_v4, %v1693_v4  ;;  %v1600_v6 = vsub.f32 %v2702_v32, %v3016_v18  ;;  %v1429_v63 = vpop.f32.mrb[55].mxu0  ;;  %vm1572_vm4 = vcmp.lt.s32.totalorder %v1540_v20, 512  ;;  %vm1571_vm5 = vcmp.lt.s32.totalorder %v1539_v61, 512 }
 0x35d   : > { %v1775_v41 = vadd.f32 %v1774_v15, %v1773_v3  ;;  %v1599_v11 = vsub.f32 %v1429_v63, %v3013_v17  ;;  %v1822_v37 = vpack.c.bf16 %v2702_v32, %v1429_v63  ;;  %v1778_v17 = vsel %vm675_vm1, %v1726_v62, 0.0 }
 0x35e   : > { %v1776_v2 = vsel %vm675_vm1, %v1725_v57, 0.0  ;;  %v1696_v21 = vsel %vm1568_vm14, %v1600_v6, 0.0  ;;  %v1542_v45 = vadd.s32 %v3239_v16, %v1509_v56  ;;  %v1541_v38 = vadd.s32 %v3239_v16, %v1508_v30 }
 0x35f   : > { %v1777_v51 = vadd.f32 %v1776_v2, %v1775_v41  ;;  %v1695_v22 = vsel %vm1567_vm15, %v1599_v11, 0.0  ;;  %v2705_v23 = vpop.f32.mrb[56].mxu0  ;;  %2738 = vmatmul.mubr.msk.bf16.gmra.mrb[52].mxu1 %vm675_vm1, %v1822_v37  ;;  %v1728_v18 = vmul.f32 %v1696_v21, %v1696_v21 }
 0x360   : > { %v1727_v34 = vmul.f32 %v1695_v22, %v1695_v22  ;;  %v1602_v5 = vsub.f32 %v2705_v23, %v3037_v35  ;;  %v1439_v52 = vpop.f32.mrb[57].mxu0  ;;  %v1511_v35 = vadd.s32 248, %v3235_v13  ;;  %vm1574_vm6 = vcmp.lt.s32.totalorder %v1542_v45, 512 }
 0x361   : > { %v1779_v10 = vadd.f32 %v1778_v17, %v1777_v51  ;;  %v1601_v42 = vsub.f32 %v1439_v52, %v3028_v25  ;;  %v1823_v1 = vpack.c.bf16 %v2705_v23, %v1439_v52  ;;  %v1510_v25 = vadd.s32 240, %v3235_v13  ;;  %v3443_v52 = vld [vmem:[%s3562_s6] ss:$0 sm:$0xff] }
 0x362   : > { %v1780_v36 = vsel %vm675_vm1, %v1727_v34, 0.0  ;;  %v1698_v49 = vsel %vm1570_vm0, %v1602_v5, 0.0  ;;  %v1782_v48 = vsel %vm675_vm1, %v1728_v18, 0.0  ;;  %vm1573_vm7 = vcmp.lt.s32.totalorder %v1541_v38, 512 }
 0x363   : > { %v1781_v40 = vadd.f32 %v1780_v36, %v1779_v10  ;;  %v1697_v12 = vsel %vm1569_vm2, %v1601_v42, 0.0  ;;  %v2708_v24 = vpop.f32.mrb[58].mxu0  ;;  %2741 = vmatprep.mubr.msk.bf16.mxu1 %vm675_vm1, %v1823_v1  ;;  %v1730_v9 = vmul.f32 %v1698_v49, %v1698_v49  ;;  %v1544_v33 = vadd.s32 %v3239_v16, %v1511_v35 }
 0x364   : > { %v1729_v0 = vmul.f32 %v1697_v12, %v1697_v12  ;;  %v1604_v53 = vsub.f32 %v2708_v24, %v3034_v29  ;;  %v1449_v55 = vpop.f32.mrb[59].mxu0  ;;  %v1543_v29 = vadd.s32 %v3239_v16, %v1510_v25 }
 0x365   : > { %v1783_v8 = vadd.f32 %v1782_v48, %v1781_v40  ;;  %v1603_v7 = vsub.f32 %v1449_v55, %v3031_v28  ;;  %v1824_v26 = vpack.c.bf16 %v2708_v24, %v1449_v55  ;;  %v1786_v54 = vsel %vm675_vm1, %v1730_v9, 0.0 }
 0x366   : > { %v1784_v58 = vsel %vm675_vm1, %v1729_v0, 0.0  ;;  %v1700_v39 = vsel %vm1572_vm4, %v1604_v53, 0.0  ;;  %vm1576_vm3 = vcmp.lt.s32.totalorder %v1544_v33, 512  ;;  %vm1575_vm8 = vcmp.lt.s32.totalorder %v1543_v29, 512 }
 0x367   : > { %v1785_v60 = vadd.f32 %v1784_v58, %v1783_v8  ;;  %v1699_v13 = vsel %vm1571_vm5, %v1603_v7, 0.0  ;;  %v2711_v27 = vpop.f32.mrb[60].mxu0  ;;  %2742 = vmatmul.mubr.msk.bf16.gmra.mrb[56].mxu1 %vm675_vm1, %v1824_v26  ;;  %v1732_v28 = vmul.f32 %v1700_v39, %v1700_v39 }
 0x368   : > { %v1731_v44 = vmul.f32 %v1699_v13, %v1699_v13  ;;  %v1606_v59 = vsub.f32 %v2711_v27, %v3055_v50  ;;  %v1459_v14 = vpop.f32.mrb[61].mxu0 }
 0x369   : > { %v1787_v19 = vadd.f32 %v1786_v54, %v1785_v60  ;;  %v1605_v31 = vsub.f32 %v1459_v14, %v3046_v43  ;;  %v1825_v3 = vpack.c.bf16 %v2711_v27, %v1459_v14  ;;  %v1790_v16 = vsel %vm675_vm1, %v1732_v28, 0.0 }
 0x36a   : > { %v1788_v4 = vsel %vm675_vm1, %v1731_v44, 0.0  ;;  %v1702_v32 = vsel %vm1574_vm6, %v1606_v59, 0.0 }
 0x36b   : > { %v1789_v20 = vadd.f32 %v1788_v4, %v1787_v19  ;;  %v1701_v15 = vsel %vm1573_vm7, %v1605_v31, 0.0  ;;  %v2714_v62 = vpop.f32.mrb[62].mxu0  ;;  %2745 = vmatprep.mubr.msk.bf16.mxu1 %vm675_vm1, %v1825_v3  ;;  %v1734_v50 = vmul.f32 %v1702_v32, %v1702_v32 }
 0x36c   : > { %v1733_v57 = vmul.f32 %v1701_v15, %v1701_v15  ;;  %v1608_v6 = vsub.f32 %v2714_v62, %v3052_v47  ;;  %v1469_v43 = vpop.f32.mrb[63].mxu0 }
 0x36d   : > { %v1791_v63 = vadd.f32 %v1790_v16, %v1789_v20  ;;  %v1607_v41 = vsub.f32 %v1469_v43, %v3049_v46  ;;  %v1826_v11 = vpack.c.bf16 %v2714_v62, %v1469_v43  ;;  %v1794_v56 = vsel %vm675_vm1, %v1734_v50, 0.0 }
 0x36e   : > { %v1792_v37 = vsel %vm675_vm1, %v1733_v57, 0.0  ;;  %v1704_v61 = vsel %vm1576_vm3, %v1608_v6, 0.0 }
 0x36f   : > { %v1793_v2 = vadd.f32 %v1792_v37, %v1791_v63  ;;  %v1703_v21 = vsel %vm1575_vm8, %v1607_v41, 0.0  ;;  %2746 = vmatmul.mubr.msk.bf16.gmra.mrb[60].mxu1 %vm675_vm1, %v1826_v11  ;;  %v1736_v30 = vmul.f32 %v1704_v61, %v1704_v61 }
 0x370   : > { %v1735_v51 = vmul.f32 %v1703_v21, %v1703_v21 }
 0x371   : > { %v1795_v22 = vadd.f32 %v1794_v56, %v1793_v2  ;;  %v1798_v17 = vsel %vm675_vm1, %v1736_v30, 0.0 }
 0x372   : > { %v1796_v47 = vsel %vm675_vm1, %v1735_v51, 0.0  ;;  %vm2179_vm1 = vcmask 60416  }
 0x373   : > { %v1797_v23 = vadd.f32 %v1796_v47, %v1795_v22 }
 0x375   : > { %v1799_v46 = vadd.f32 %v1798_v17, %v1797_v23 }
 0x377   : > { %1800 = vadd.xlane.f32.xlu0 %v1799_v46 }
 0x404   : > { %v1801_v18 = vpop.xlane.xlu0 %1800 }
 0x405   : > { %v1802_v34 = vrot.slane %v1801_v18, 4 }
 0x407   : > { %v1803_v5 = vadd.f32 %v1802_v34, %v1801_v18 }
 0x409   : > { %v1804_v10 = vrot.slane %v1803_v5, 2 }
 0x40a   : > { %v2719_v42 = vpop.f32.mrb[32].mxu1 }
 0x40b   : > { %v1933_v1 = vadd.f32 %v2719_v42, %v3443_v52  ;;  %v1924_v36 = vpop.f32.mrb[33].mxu1  ;;  %v1805_v49 = vadd.f32 %v1804_v10, %v1803_v5 }
 0x40c   : > { %v1925_v45 = vadd.f32 %v3443_v52, %v1924_v36  ;;  %v2720_v38 = vpop.f32.mrb[34].mxu1 }
 0x40d   : > { %v2471_v40 = vpack.c.bf16 %v1933_v1, %v1933_v1  ;;  %v1936_v12 = vadd.f32 %v2720_v38, %v3443_v52  ;;  %v1927_v24 = vpop.f32.mrb[35].mxu1  ;;  %v1806_v35 = vrot.slane %v1805_v49, 1 }
 0x40e   : > { %v2469_v25 = vpack.c.bf16 %v1925_v45, %v1925_v45  ;;  %v1928_v48 = vadd.f32 %v3443_v52, %v1927_v24 }
 0x40f   : > { %2182 = vst.msk [vmem:[%s3451_s15 + $0x8] sm:$0xf] %vm2179_vm1, %v2471_v40  ;;  %v2472_v9 = vpack.c.bf16 %v1936_v12, %v1936_v12  ;;  %v1807_v0 = vadd.f32 %v1806_v35, %v1805_v49 }
 0x410   : > { %2180 = vst.msk [vmem:[%s3451_s15] sm:$0xf] %vm2179_vm1, %v2469_v25  ;;  %v2470_v53 = vpack.c.bf16 %v1928_v48, %v1928_v48 }
 0x411   : > { %2183 = vst.msk [vmem:[%s3451_s15 + $0xc] sm:$0xf] %vm2179_vm1, %v2472_v9 }
 0x412   : > { %2760 = vpush %v1807_v0  ;;  %v2723_v55 = vpop.f32.mrb[36].mxu1 }
 0x413   : > { %2181 = vst.msk [vmem:[%s3451_s15 + $0x4] sm:$0xf] %vm2179_vm1, %v2470_v53  ;;  %v1949_v8 = vadd.f32 %v2723_v55, %v3443_v52  ;;  %v1940_v7 = vpop.f32.mrb[37].mxu1 }
 0x414   : > { %v1941_v26 = vadd.f32 %v3443_v52, %v1940_v7  ;;  %v2724_v58 = vpop.f32.mrb[38].mxu1 }
 0x415   : > { %v2475_v39 = vpack.c.bf16 %v1949_v8, %v1949_v8  ;;  %v1952_v60 = vadd.f32 %v2724_v58, %v3443_v52  ;;  %v1943_v13 = vpop.f32.mrb[39].mxu1 }
 0x416   : > { %v2473_v27 = vpack.c.bf16 %v1941_v26, %v1941_v26  ;;  %v1944_v33 = vadd.f32 %v3443_v52, %v1943_v13 }
 0x417   : > { %2186 = vst.msk [vmem:[%s3451_s15 + $0x18] sm:$0xf] %vm2179_vm1, %v2475_v39  ;;  %v2476_v29 = vpack.c.bf16 %v1952_v60, %v1952_v60 }
 0x418   : > { %2184 = vst.msk [vmem:[%s3451_s15 + $0x10] sm:$0xf] %vm2179_vm1, %v2473_v27  ;;  %v2474_v54 = vpack.c.bf16 %v1944_v33, %v1944_v33 }
 0x419   : > { %2187 = vst.msk [vmem:[%s3451_s15 + $0x1c] sm:$0xf] %vm2179_vm1, %v2476_v29 }
 0x41a   : > { %2185 = vst.msk [vmem:[%s3451_s15 + $0x14] sm:$0xf] %vm2179_vm1, %v2474_v54  ;;  %v2727_v28 = vpop.f32.mrb[40].mxu1 }
 0x41b   : > { %v1965_v44 = vadd.f32 %v2727_v28, %v3443_v52  ;;  %v1956_v59 = vpop.f32.mrb[41].mxu1 }
 0x41c   : > { %v1957_v14 = vadd.f32 %v3443_v52, %v1956_v59  ;;  %v2728_v19 = vpop.f32.mrb[42].mxu1 }
 0x41d   : > { %v2479_v31 = vpack.c.bf16 %v1965_v44, %v1965_v44  ;;  %v1968_v3 = vadd.f32 %v2728_v19, %v3443_v52  ;;  %v1959_v4 = vpop.f32.mrb[43].mxu1 }
 0x41e   : > { %v2477_v32 = vpack.c.bf16 %v1957_v14, %v1957_v14  ;;  %v1960_v20 = vadd.f32 %v3443_v52, %v1959_v4 }
 0x41f   : > { %2190 = vst.msk [vmem:[%s3451_s15 + $0x28] sm:$0xf] %vm2179_vm1, %v2479_v31  ;;  %v2480_v15 = vpack.c.bf16 %v1968_v3, %v1968_v3 }
 0x420   : > { %2188 = vst.msk [vmem:[%s3451_s15 + $0x20] sm:$0xf] %vm2179_vm1, %v2477_v32  ;;  %v2478_v62 = vpack.c.bf16 %v1960_v20, %v1960_v20 }
 0x421   : > { %2191 = vst.msk [vmem:[%s3451_s15 + $0x2c] sm:$0xf] %vm2179_vm1, %v2480_v15 }
 0x422   : > { %2189 = vst.msk [vmem:[%s3451_s15 + $0x24] sm:$0xf] %vm2179_vm1, %v2478_v62  ;;  %v2731_v16 = vpop.f32.mrb[44].mxu1 }
 0x423   : > { %v1981_v50 = vadd.f32 %v2731_v16, %v3443_v52  ;;  %v1972_v57 = vpop.f32.mrb[45].mxu1 }
 0x424   : > { %v1973_v6 = vadd.f32 %v3443_v52, %v1972_v57  ;;  %v2732_v43 = vpop.f32.mrb[46].mxu1 }
 0x425   : > { %v2483_v63 = vpack.c.bf16 %v1981_v50, %v1981_v50  ;;  %v1984_v41 = vadd.f32 %v2732_v43, %v3443_v52  ;;  %v1975_v11 = vpop.f32.mrb[47].mxu1 }
 0x426   : > { %v2481_v37 = vpack.c.bf16 %v1973_v6, %v1973_v6  ;;  %v1976_v61 = vadd.f32 %v3443_v52, %v1975_v11 }
 0x427   : > { %2194 = vst.msk [vmem:[%s3451_s15 + $0x38] sm:$0xf] %vm2179_vm1, %v2483_v63  ;;  %v2484_v2 = vpack.c.bf16 %v1984_v41, %v1984_v41 }
 0x428   : > { %2192 = vst.msk [vmem:[%s3451_s15 + $0x30] sm:$0xf] %vm2179_vm1, %v2481_v37  ;;  %v2482_v21 = vpack.c.bf16 %v1976_v61, %v1976_v61 }
 0x429   : > { %2195 = vst.msk [vmem:[%s3451_s15 + $0x3c] sm:$0xf] %vm2179_vm1, %v2484_v2 }
 0x42a   : > { %2193 = vst.msk [vmem:[%s3451_s15 + $0x34] sm:$0xf] %vm2179_vm1, %v2482_v21  ;;  %v2735_v56 = vpop.f32.mrb[48].mxu1 }
 0x42b   : > { %v1997_v30 = vadd.f32 %v2735_v56, %v3443_v52  ;;  %v1988_v51 = vpop.f32.mrb[49].mxu1 }
 0x42c   : > { %v1989_v22 = vadd.f32 %v3443_v52, %v1988_v51  ;;  %v2736_v47 = vpop.f32.mrb[50].mxu1 }
 0x42d   : > { %v2487_v23 = vpack.c.bf16 %v1997_v30, %v1997_v30  ;;  %v2000_v17 = vadd.f32 %v2736_v47, %v3443_v52  ;;  %v1991_v46 = vpop.f32.mrb[51].mxu1 }
 0x42e   : > { %v2485_v18 = vpack.c.bf16 %v1989_v22, %v1989_v22  ;;  %v1992_v34 = vadd.f32 %v3443_v52, %v1991_v46 }
 0x42f   : > { %2198 = vst.msk [vmem:[%s3451_s15 + $0x48] sm:$0xf] %vm2179_vm1, %v2487_v23  ;;  %v2488_v5 = vpack.c.bf16 %v2000_v17, %v2000_v17 }
 0x430   : > { %2196 = vst.msk [vmem:[%s3451_s15 + $0x40] sm:$0xf] %vm2179_vm1, %v2485_v18  ;;  %v2486_v10 = vpack.c.bf16 %v1992_v34, %v1992_v34 }
 0x431   : > { %2199 = vst.msk [vmem:[%s3451_s15 + $0x4c] sm:$0xf] %vm2179_vm1, %v2488_v5 }
 0x432   : > { %2197 = vst.msk [vmem:[%s3451_s15 + $0x44] sm:$0xf] %vm2179_vm1, %v2486_v10  ;;  %v2739_v42 = vpop.f32.mrb[52].mxu1 }
 0x433   : > { %v2013_v1 = vadd.f32 %v2739_v42, %v3443_v52  ;;  %v2004_v36 = vpop.f32.mrb[53].mxu1 }
 0x434   : > { %v2005_v49 = vadd.f32 %v3443_v52, %v2004_v36  ;;  %v2740_v45 = vpop.f32.mrb[54].mxu1 }
 0x435   : > { %v2491_v38 = vpack.c.bf16 %v2013_v1, %v2013_v1  ;;  %v2016_v40 = vadd.f32 %v2740_v45, %v3443_v52  ;;  %v2007_v12 = vpop.f32.mrb[55].mxu1 }
 0x436   : > { %v2489_v24 = vpack.c.bf16 %v2005_v49, %v2005_v49  ;;  %v2008_v35 = vadd.f32 %v3443_v52, %v2007_v12 }
 0x437   : > { %2202 = vst.msk [vmem:[%s3451_s15 + $0x58] sm:$0xf] %vm2179_vm1, %v2491_v38  ;;  %v2492_v25 = vpack.c.bf16 %v2016_v40, %v2016_v40 }
 0x438   : > { %2200 = vst.msk [vmem:[%s3451_s15 + $0x50] sm:$0xf] %vm2179_vm1, %v2489_v24  ;;  %v2490_v48 = vpack.c.bf16 %v2008_v35, %v2008_v35 }
 0x439   : > { %2203 = vst.msk [vmem:[%s3451_s15 + $0x5c] sm:$0xf] %vm2179_vm1, %v2492_v25 }
 0x43a   : > { %2201 = vst.msk [vmem:[%s3451_s15 + $0x54] sm:$0xf] %vm2179_vm1, %v2490_v48  ;;  %v2743_v9 = vpop.f32.mrb[56].mxu1 }
 0x43b   : > { %v2029_v0 = vadd.f32 %v2743_v9, %v3443_v52  ;;  %v2020_v53 = vpop.f32.mrb[57].mxu1 }
 0x43c   : > { %v2021_v55 = vadd.f32 %v3443_v52, %v2020_v53  ;;  %v2744_v8 = vpop.f32.mrb[58].mxu1 }
 0x43d   : > { %v2495_v7 = vpack.c.bf16 %v2029_v0, %v2029_v0  ;;  %v2032_v26 = vadd.f32 %v2744_v8, %v3443_v52  ;;  %v2023_v58 = vpop.f32.mrb[59].mxu1 }
 0x43e   : > { %v2493_v39 = vpack.c.bf16 %v2021_v55, %v2021_v55  ;;  %v2024_v60 = vadd.f32 %v3443_v52, %v2023_v58 }
 0x43f   : > { %2206 = vst.msk [vmem:[%s3451_s15 + $0x68] sm:$0xf] %vm2179_vm1, %v2495_v7  ;;  %v2496_v13 = vpack.c.bf16 %v2032_v26, %v2032_v26 }
 0x440   : > { %2204 = vst.msk [vmem:[%s3451_s15 + $0x60] sm:$0xf] %vm2179_vm1, %v2493_v39  ;;  %v2494_v27 = vpack.c.bf16 %v2024_v60, %v2024_v60 }
 0x441   : > { %2207 = vst.msk [vmem:[%s3451_s15 + $0x6c] sm:$0xf] %vm2179_vm1, %v2496_v13 }
 0x442   : > { %2205 = vst.msk [vmem:[%s3451_s15 + $0x64] sm:$0xf] %vm2179_vm1, %v2494_v27  ;;  %v2747_v33 = vpop.f32.mrb[60].mxu1 }
 0x443   : > { %s2761_s17 = spop %2760  ;;  %v2045_v54 = vadd.f32 %v2747_v33, %v3443_v52  ;;  %v2036_v28 = vpop.f32.mrb[61].mxu1 }
 0x444   : > { %v1809_v29 = vstv %s2761_s17  ;;  %v2037_v44 = vadd.f32 %v3443_v52, %v2036_v28  ;;  %v2748_v59 = vpop.f32.mrb[62].mxu1 }
 0x445   : > { %1810 = vst [vmem:[%s317_s16] sm:$0x1] %v1809_v29  ;;  %v2499_v14 = vpack.c.bf16 %v2045_v54, %v2045_v54  ;;  %v2048_v19 = vadd.f32 %v2748_v59, %v3443_v52  ;;  %v2039_v31 = vpop.f32.mrb[63].mxu1 }
 0x446   : > { %v2497_v3 = vpack.c.bf16 %v2037_v44, %v2037_v44  ;;  %v2040_v4 = vadd.f32 %v3443_v52, %v2039_v31 }
 0x447   : > { %2210 = vst.msk [vmem:[%s3451_s15 + $0x78] sm:$0xf] %vm2179_vm1, %v2499_v14  ;;  %v2500_v32 = vpack.c.bf16 %v2048_v19, %v2048_v19 }
 0x448   : > { %2208 = vst.msk [vmem:[%s3451_s15 + $0x70] sm:$0xf] %vm2179_vm1, %v2497_v3  ;;  %v2498_v20 = vpack.c.bf16 %v2040_v4, %v2040_v4 }
 0x449   : > { %2211 = vst.msk [vmem:[%s3451_s15 + $0x7c] sm:$0xf] %vm2179_vm1, %v2500_v32 }
 0x44a   : > { %2209 = vst.msk [vmem:[%s3451_s15 + $0x74] sm:$0xf] %vm2179_vm1, %v2498_v20 }
 0x44b PF: > { %s19_s27 = sadd.s32 1, %s2794_s27  }
 0x44c   : > { %p16_p5 = scmp.ge.s32.totalorder %s19_s27, 4  }
 0x44e   :  { %18 = sbr.rel (!%p16_p5) target bundleno = 1 (0x1), region = 90 }

// kernel: vqbase_forward.3
= control target key start
LH: loop header
LB: loop body
LE: loop exit
PB: predicated region body
PF: predicated region fallthrough
CT: control target
= control target key end

     0   :  { %s2205_s12 = smov 0   ;;  %s3523_s0 = inlined_call_operand.vmem [shape: bf16[2,342,3], index: 0, kind: input, shape index: {}]   ;;  %s3524_s1 = inlined_call_operand.vmem [shape: bf16[27,8], index: 1, kind: input, shape index: {}]   ;;  %s3525_s2 = inlined_call_operand.vmem [shape: f32[1,8], index: 2, kind: input, shape index: {}]   ;;  %s3526_s3 = inlined_call_operand.vmem [shape: bf16[2,288,8], index: 3, kind: output, shape index: {}]  }
   0x1 LB: > { %s1908_s13 = sadd.s32 4294967295, %s2174_s12   ;;  %p1912_p0 = scmp.ge.s32.totalorder %s2174_s12, 1  ;;  %s2174_s12 = sphi %s2205_s12, %s13_s12  }
   0x2   : > { %p137_p1 = scmp.lt.s32.totalorder %s2174_s12, 3 }
   0x4   : > { %p138_p2 = pnand %p1912_p0, %p137_p1 }
   0x6   : > { %141 = sbr.rel (%p138_p2) target bundleno = 649 (0x289), region = 32 }
   0xd   : > { %p161_p3 = scmp.lt.s32.totalorder %s1908_s13, 1  ;;  %vm503_vm0 = vcmask 1046528   ;;  %vm763_vm1 = vcmask 1045504   ;;  %vm315_vm2 = vsmask.f32 7424  ;;  %s2176_s18 = smov 9  }
   0xe   : > { %s2177_s19 = smov 6   ;;  %s2178_s20 = smov 15   ;;  %vm633_vm3 = vsmask.f32 6400  ;;  %vm893_vm4 = vsmask.f32 5376 }
   0xf   : > { %s3595_s13 = smov (!%p161_p3, %s1908_s13), 1  ;;  %s2179_s21 = smov 3   ;;  %vm1023_vm5 = vcmask 1044480   ;;  %vm1097_vm6 = vcmask 23552   ;;  %vm1134_vm7 = vcmask 48128   ;;  %vm1171_vm8 = vcmask 72704  }
  0x10   : > { %s2104_s14 = smul.u32 172, %s3595_s13  ;;  %s2180_s24 = smov 12   ;;  %vm1208_vm9 = vcmask 97280   ;;  %vm1245_vm10 = vcmask 121856   ;;  %vm1282_vm11 = vcmask 146432   ;;  %vm1319_vm12 = vcmask 171008  }
  0x11   : > { %s2181_s25 = smov 18   ;;  %s2182_s26 = smov 21   ;;  %vm1356_vm13 = vcmask 195584   ;;  %vm1415_vm14 = vcmask 220160   ;;  %vm1816_vm15 = vcmask 60416  }
  0x12   : > { %s2219_s17 = scalar_lea.vmem %s3523_s0, %s2104_s14  ;;  %s2183_s27 = smov 24  }
  0x13   : > { %v175_v0 = vld [vmem:[%s2219_s17 + $0xc] sm:$0xf]  ;;  %v176_v1 = vld [vmem:[%s2219_s17 + $0x10] sm:$0xf]  ;;  %v2224_v2 = vld [vmem:[%s2219_s17 + $0x14] sm:$0xf] }
  0x14   : > { %v210_v3 = vld [vmem:[%s2219_s17 + $0x8] sm:$0xe]  ;;  %v2228_v4 = vcombine.low %v176_v1, %v2224_v2  ;;  %v173_v5 = vld [vmem:[%s2219_s17 + $0x4] sm:$0xf]  ;;  %v209_v8 = vld [vmem:[%s2219_s17] sm:$0xe] }
  0x15   : > { %v174_v6 = vld [vmem:[%s2219_s17 + $0x8] sm:$0xf]  ;;  %v1935_v7 = vcombine.low %v210_v3, %v175_v0  ;;  %v172_v10 = vld [vmem:[%s2219_s17] sm:$0xf]  ;;  %v1934_v13 = vcombine.low %v209_v8, %v173_v5  ;;  %v2241_v16 = vld [vmem:[%s2219_s17 + $0x18] sm:$0xff]   ;;  %s2105_s5 = smul.u32 144, %s3595_s13 }
  0x16   : > { %v2233_v9 = vcombine.low %v174_v6, %v175_v0  ;;  %v215_v11 = vld [vmem:[%s2219_s17 + $0x8] sm:$0xc]  ;;  %v507_v12 = vrot.slane %v2228_v4, 1  ;;  %v2238_v14 = vcombine.low %v172_v10, %v173_v5  ;;  %v765_v19 = vrot.slane %v2228_v4, 2  ;;  %v216_v34 = vld [vmem:[%s2219_s17 + $0x10] sm:$0xc] }
  0x17   : > { %v1939_v15 = vcombine.low %v215_v11, %v175_v0  ;;  %v588_v17 = vrot.slane %v1935_v7, 1  ;;  %v504_v21 = vrot.slane %v1934_v13, 1  ;;  %v509_v28 = vrot.slane %v2241_v16, 1  ;;  %v2272_v45 = vld [vmem:[%s2219_s17 + $0x20] sm:$0xff]   ;;  %v2299_v63 = vld [vmem:[%s2219_s17 + $0x50] sm:$0xff]   ;;  %s3371_s8 = scalar_lea.vmem %s3526_s3, %s2105_s5 }
  0x18   : > { %v505_v18 = vrot.slane %v2233_v9, 1  ;;  %v324_v20 = vshll.u32 %v2233_v9, 16  ;;  %v317_v24 = vshrl.u32 %v2238_v14, 16  ;;  %v319_v25 = vshll.u32 %v2238_v14, 16  ;;  %v221_v5 = vld [vmem:[%s2219_s17 + $0x10] sm:$0x8] }
  0x19   : > { %v764_v22 = vrot.slane %v1939_v15, 2  ;;  %v589_v23 = vsel %vm503_vm0, %v588_v17, %v507_v12  ;;  %v328_v31 = vshrl.u32 %v2233_v9, 16  ;;  %v332_v32 = vshll.u32 %v2228_v4, 16  ;;  %v2142_v6 = vld [vmem:[%s3524_s1] sm:$0xff]  }
  0x1a   : > { %594 = vrot.lane.b32.xlu0 %v589_v23, %s2176_s18  ;;  %v506_v26 = vsel %vm503_vm0, %v504_v21, %v505_v18  ;;  %v326_v29 = vrot.slane %v324_v20, 1  ;;  %v321_v30 = vrot.slane %v319_v25, 1  ;;  %v336_v33 = vshrl.u32 %v2228_v4, 16  ;;  %2060 = vmatprep.subr.bf16.mxu0 %v2142_v6  ;;  %v2320_v21 = vld [vmem:[%s2219_s17 + $0x58] sm:$0xff]  }
  0x1b   : > { %v766_v27 = vsel %vm763_vm1, %v764_v22, %v765_v19  ;;  %541 = vrot.lane.b32.xlu1 %v506_v26, %s2177_s19  ;;  %v508_v35 = vsel %vm503_vm0, %v505_v18, %v507_v12  ;;  %v2260_v36 = vshll.u32 %v2241_v16, 16  ;;  %v2263_v37 = vshrl.u32 %v2241_v16, 16  ;;  %2100 = vmatprep.subr.bf16.mxu1 %v2142_v6 }
  0x1c   : > { %v635_v38 = vshrl.u32 %v1935_v7, 16  ;;  %v322_v39 = vor.u32 %v321_v30, %v317_v24  ;;  %v767_v40 = vrot.slane %v2241_v16, 2  ;;  %v330_v41 = vor.u32 %v328_v31, %v326_v29  ;;  %2061 = vmatpush3.bf16.msra.mxu0 %v2142_v6  ;;  %2102 = vmatpush3.bf16.msra.mxu1 %v2142_v6 }
  0x1d   : > { %v2267_v42 = vrot.slane %v332_v32, 1  ;;  %v642_v43 = vrot.slane %v336_v33, 1  ;;  %v643_v44 = vrot.slane %v332_v32, 2  ;;  %v638_v48 = vshll.u32 %v1935_v7, 16 }
  0x1e   : > { %801 = vrot.lane.b32.xlu0 %v766_v27, %s2178_s20  ;;  %v327_v46 = vsel %vm315_vm2, %v322_v39, %v326_v29  ;;  %v637_v47 = vrot.slane %v635_v38, 1  ;;  %v2279_v49 = vsel %vm503_vm0, %v507_v12, %v509_v28  ;;  %v646_v50 = vrot.slane %v2263_v37, 1 }
  0x1f   : > { %543 = vrot.lane.b32.xlu1 %v508_v35, %s2177_s19  ;;  %v647_v51 = vrot.slane %v2260_v36, 2  ;;  %v1940_v52 = vcombine.low %v216_v34, %v2224_v2  ;;  %v640_v53 = vrot.slane %v638_v48, 2  ;;  %v335_v54 = vsel %vm315_vm2, %v330_v41, %v2267_v42  ;;  %v2351_v35 = vld [vmem:[%s2219_s17 + $0x60] sm:$0xff]  }
  0x20   : > { %v644_v55 = vor.u32 %v643_v44, %v642_v43  ;;  %v768_v59 = vsel %vm763_vm1, %v765_v19, %v767_v40  ;;  %v2293_v61 = vshll.u32 %v2272_v45, 16  ;;  %v2296_v62 = vshrl.u32 %v2272_v45, 16  ;;  %3556 = vst [vmem:[#allocation3_spill] sm:$0xff] %v2351_v35 }
  0x21   : > { %v641_v56 = vor.u32 %v640_v53, %v637_v47  ;;  %v895_v57 = vshrl.u32 %v1940_v52, 16  ;;  %v898_v58 = vshll.u32 %v1940_v52, 16  ;;  %v2290_v60 = vor.u32 %v647_v51, %v646_v50 }
  0x22   : > { %464 = vrot.lane.b32.xlu0 %v327_v46, %s2179_s21  ;;  %v848_v0 = vrot.slane %v1940_v52, 2  ;;  %v902_v1 = vrot.slane %v2263_v37, 2  ;;  %v903_v3 = vrot.slane %v2260_v36, 3  ;;  %v769_v12 = vrot.slane %v2272_v45, 2 }
  0x23   : > { %596 = vrot.lane.b32.xlu1 %v2279_v49, %s2176_s18  ;;  %v645_v7 = vsel %vm633_vm3, %v641_v56, %v644_v55  ;;  %v897_v8 = vrot.slane %v895_v57, 2  ;;  %v900_v10 = vrot.slane %v898_v58, 3  ;;  %v649_v11 = vsel %vm633_vm3, %v644_v55, %v2290_v60  ;;  %v2400_v57 = vld [vmem:[%s2219_s17 + $0x68] sm:$0xff]  }
  0x24   : > { %v906_v13 = vrot.slane %v2296_v62, 2  ;;  %v907_v15 = vrot.slane %v2293_v61, 3  ;;  %v849_v17 = vsel %vm763_vm1, %v848_v0, %v767_v40  ;;  %v904_v18 = vor.u32 %v903_v3, %v902_v1  ;;  %v2403_v58 = vld [vmem:[%s2219_s17 + $0x28] sm:$0xff]  }
  0x25   : > { %v901_v19 = vor.u32 %v900_v10, %v897_v8  ;;  %v1944_v20 = vcombine.low %v221_v5, %v2224_v2  ;;  %v2323_v22 = vshll.u32 %v2299_v63, 16  ;;  %v2328_v23 = vsel %vm763_vm1, %v767_v40, %v769_v12 }
  0x26   : > { %466 = vrot.lane.b32.xlu0 %v335_v54, %s2179_s21  ;;  %v2330_v24 = vor.u32 %v907_v15, %v906_v13  ;;  %v1025_v25 = vrot.slane %v2241_v16, 3  ;;  %v2335_v2 = vshrl.u32 %v2299_v63, 16  ;;  %v2342_v30 = vshll.u32 %v2320_v21, 16 }
  0x27   : > { %803 = vrot.lane.b32.xlu1 %v768_v59, %s2178_s20  ;;  %v905_v26 = vsel %vm893_vm4, %v901_v19, %v904_v18  ;;  %v1024_v27 = vrot.slane %v1944_v20, 3  ;;  %v3530_v29 = vrot.slane %v2323_v22, 1  ;;  %v338_v32 = vor.u32 %v336_v33, %v2267_v42 }
  0x28   : > { %3555 = vst [vmem:[#allocation2_spill] sm:$0xff] %v2342_v30  ;;  %v909_v31 = vsel %vm893_vm4, %v904_v18, %v2330_v24  ;;  %v342_v34 = vrot.slane %v2260_v36, 1  ;;  %v406_v40 = vrot.slane %v2342_v30, 1  ;;  %v1027_v36 = vrot.slane %v2272_v45, 3 }
  0x29   : > { %v1026_v38 = vsel %vm1023_vm5, %v1024_v27, %v1025_v25  ;;  %v402_v39 = vor.u32 %v2335_v2, %v3530_v29  ;;  %v2363_v41 = vshrl.u32 %v2320_v21, 16  ;;  %v2366_v42 = vshll.u32 %v2351_v35, 16  ;;  %v2145_v27 = vld [vmem:[%s3524_s1 + $0x8] sm:$0x3f]  }
  0x2a   : > { %724 = vrot.lane.b32.xlu0 %v645_v7, %s2180_s24  ;;  %v343_v33 = vsel %vm315_vm2, %v338_v32, %v342_v34  ;;  %v346_v44 = vor.u32 %v2263_v37, %v342_v34  ;;  %v350_v46 = vrot.slane %v2293_v61, 1  ;;  %v1028_v47 = vsel %vm1023_vm5, %v1025_v25, %v1027_v36 }
  0x2b   : > { %726 = vrot.lane.b32.xlu1 %v649_v11, %s2180_s24  ;;  %3557 = vst [vmem:[#allocation4_spill] sm:$0xff] %v2363_v41  ;;  %v407_v43 = vsel %vm315_vm2, %v402_v39, %v406_v40  ;;  %v410_v48 = vor.u32 %v2363_v41, %v406_v40  ;;  %v414_v50 = vrot.slane %v2366_v42, 1  ;;  %v3529_v52 = vrot.slane %v2299_v63, 1 }
  0x2c   : > { %v351_v37 = vsel %vm315_vm2, %v346_v44, %v350_v46  ;;  %v525_v53 = vrot.slane %v2320_v21, 1  ;;  %v511_v54 = vrot.slane %v2272_v45, 1  ;;  %v527_v56 = vrot.slane %v2351_v35, 1 }
  0x2d   : > { %v415_v51 = vsel %vm315_vm2, %v410_v48, %v414_v50  ;;  %v2412_v1 = vshrl.u32 %v2351_v35, 16  ;;  %v513_v3 = vrot.slane %v2403_v58, 1  ;;  %v678_v5 = vrot.slane %v2363_v41, 1 }
  0x2e   : > { %854 = vrot.lane.b32.xlu0 %v849_v17, %s2181_s25  ;;  %v2394_v55 = vsel %vm503_vm0, %v3529_v52, %v525_v53  ;;  %v512_v59 = vsel %vm503_vm0, %v509_v28, %v511_v54  ;;  %v528_v0 = vsel %vm503_vm0, %v525_v53, %v527_v56  ;;  %v679_v6 = vrot.slane %v2342_v30, 2 }
  0x2f   : > { %856 = vrot.lane.b32.xlu1 %v2328_v23, %s2181_s25  ;;  %3558 = vst [vmem:[#allocation5_spill] sm:$0xff] %v2394_v55  ;;  %v650_v16 = vrot.slane %v2296_v62, 1  ;;  %v651_v28 = vrot.slane %v2293_v61, 2  ;;  %v2423_v7 = vshll.u32 %v2403_v58, 16  ;;  %v2426_v8 = vshrl.u32 %v2403_v58, 16 }
  0x30   : > { %v682_v10 = vrot.slane %v2412_v1, 1  ;;  %v683_v11 = vrot.slane %v2366_v42, 2  ;;  %v2431_v13 = vshll.u32 %v2400_v57, 16  ;;  %v2434_v15 = vshrl.u32 %v2400_v57, 16 }
  0x31   : > { %v2445_v18 = vsel %vm503_vm0, %v511_v54, %v513_v3  ;;  %v2448_v19 = vor.u32 %v679_v6, %v678_v5  ;;  %v652_v20 = vor.u32 %v651_v28, %v650_v16  ;;  %v654_v25 = vrot.slane %v2426_v8, 1  ;;  %v2494_v5 = vld [vmem:[%s2219_s17 + $0x30] sm:$0xff]  }
  0x32   : > { %984 = vrot.lane.b32.xlu0 %v905_v26, %s2182_s26  ;;  %v655_v26 = vrot.slane %v2423_v7, 2  ;;  %v686_v32 = vrot.slane %v2434_v15, 1  ;;  %v687_v34 = vrot.slane %v2431_v13, 2  ;;  %v785_v53 = vrot.slane %v2351_v35, 2 }
  0x33   : > { %986 = vrot.lane.b32.xlu1 %v909_v31, %s2182_s26  ;;  %3559 = vst [vmem:[#allocation6_spill] sm:$0xff] %v2448_v19  ;;  %v684_v31 = vor.u32 %v683_v11, %v682_v10  ;;  %v771_v54 = vrot.slane %v2403_v58, 2  ;;  %v773_v10 = vrot.slane %v2494_v5, 2  ;;  %v939_v11 = vrot.slane %v2366_v42, 3 }
  0x34   : > { %v2469_v48 = vor.u32 %v687_v34, %v686_v32  ;;  %v3536_v61 = vrot.slane %v2494_v5, 3 }
  0x35   : > { %v772_v6 = vsel %vm763_vm1, %v769_v12, %v771_v54  ;;  %v2511_v12 = vshll.u32 %v2494_v5, 16 }
  0x36   : > { %1061 = vrot.lane.b32.xlu0 %v1026_v38, %s2183_s27  ;;  %v2184_v38 = vmov 65535  }
  0x37   : > { %468 = vrot.lane.b32.xlu1 %v343_v33, %s2179_s21  ;;  %v1454_v39 = vsel %vm1023_vm5, 4294967295, %v2184_v38  ;;  %v653_v33 = vsel %vm633_vm3, %v2290_v60, %v652_v20 }
  0x38   : > { %v1455_v40 = vsel %vm763_vm1, %v1454_v39, 0  ;;  %v2534_v39 = vsel %vm763_vm1, %v771_v54, %v773_v10 }
  0x39   : > { %v1457_v44 = vand.u32 %v2145_v27, %v1455_v40  ;;  %v942_v27 = vrot.slane %v2434_v15, 2 }
  0x3a   : > { %484 = vrot.lane.b32.xlu0 %v407_v43, %s2179_s21  ;;  %v2465_v43 = vor.u32 %v655_v26, %v654_v25  ;;  %v911_v25 = vrot.slane %v2423_v7, 3  ;;  %v2514_v26 = vshrl.u32 %v2494_v5, 16 }
  0x3b   : > { %1063 = vrot.lane.b32.xlu1 %v1028_v47, %s2183_s27  ;;  %v685_v47 = vsel %vm633_vm3, %v2448_v19, %v684_v31  ;;  %2062 = vmatprep.subr.bf16.mxu0 %v1457_v44 }
  0x3c   : > { %2101 = vmatprep.subr.bf16.mxu1 %v1457_v44  ;;  %2063 = vmatpush3.bf16.msra.mxu0 %v1457_v44  ;;  %v657_v60 = vsel %vm633_vm3, %v652_v20, %v2465_v43  ;;  %v910_v20 = vrot.slane %v2426_v8, 2 }
  0x3d   : > { %2103 = vmatpush3.bf16.msra.mxu1 %v1457_v44  ;;  %v915_v44 = vrot.slane %v2511_v12, 3 }
  0x3e   : > { %470 = vrot.lane.b32.xlu0 %v351_v37, %s2179_s21  ;;  %v689_v37 = vsel %vm633_vm3, %v684_v31, %v2469_v48  ;;  %v943_v31 = vrot.slane %v2431_v13, 3  ;;  %v912_v40 = vor.u32 %v911_v25, %v910_v20  ;;  %v1045_v25 = vrot.slane %v2400_v57, 3 }
  0x3f   : > { %486 = vrot.lane.b32.xlu1 %v415_v51, %s2179_s21  ;;  %v3528_v51 = vrot.slane %v2320_v21, 2 }
  0x40   : > { %v913_v54 = vsel %vm893_vm4, %v2330_v24, %v912_v40  ;;  %v3527_v24 = vrot.slane %v2351_v35, 3 }
  0x42   : > { %545 = vrot.lane.b32.xlu0 %v2279_v49, %s2177_s19  ;;  %v529_v49 = vrot.slane %v2400_v57, 1 }
  0x43   : > { %561 = vrot.lane.b32.xlu1 %v2394_v55, %s2177_s19 }
  0x44   : > { %v2440_v17 = vsel %vm503_vm0, %v527_v56, %v529_v49  ;;  %v2485_v56 = vsel %vm763_vm1, %v3528_v51, %v785_v53 }
  0x45   : > { %3560 = vst [vmem:[#allocation7_spill] sm:$0xff] %v2485_v56 }
  0x46   : > { %547 = vrot.lane.b32.xlu0 %v512_v59, %s2177_s19 }
  0x47   : > { %563 = vrot.lane.b32.xlu1 %v528_v0, %s2177_s19 }
  0x4a   : > { %598 = vrot.lane.b32.xlu0 %v512_v59, %s2176_s18  ;;  %v787_v59 = vrot.slane %v2400_v57, 2 }
  0x4b   : > { %614 = vrot.lane.b32.xlu1 %v528_v0, %s2176_s18  ;;  %v2491_v0 = vld [vmem:[%s2219_s17 + $0x70] sm:$0xff]  }
  0x4c   : > { %v788_v16 = vsel %vm763_vm1, %v785_v53, %v787_v59  ;;  %v789_v28 = vrot.slane %v2491_v0, 2  ;;  %v2519_v32 = vshll.u32 %v2491_v0, 16  ;;  %v2522_v34 = vshrl.u32 %v2491_v0, 16 }
  0x4e   : > { %600 = vrot.lane.b32.xlu0 %v2445_v18, %s2176_s18  ;;  %v2528_v38 = vsel %vm763_vm1, %v787_v59, %v789_v28  ;;  %v947_v53 = vrot.slane %v2519_v32, 3  ;;  %v690_v57 = vrot.slane %v2522_v34, 1 }
  0x4f   : > { %616 = vrot.lane.b32.xlu1 %v2440_v17, %s2176_s18 }
  0x52   : > { %728 = vrot.lane.b32.xlu0 %v653_v33, %s2180_s24  ;;  %v914_v33 = vrot.slane %v2514_v26, 2 }
  0x53   : > { %744 = vrot.lane.b32.xlu1 %v685_v47, %s2180_s24 }
  0x54   : > { %v2548_v59 = vor.u32 %v915_v44, %v914_v33  ;;  %v1046_v33 = vsel %vm1023_vm5, %v3527_v24, %v1045_v25  ;;  %v418_v44 = vor.u32 %v2412_v1, %v414_v50  ;;  %v3535_v50 = vrot.slane %v2511_v12, 1 }
  0x56   : > { %730 = vrot.lane.b32.xlu0 %v657_v60, %s2180_s24  ;;  %v944_v60 = vor.u32 %v943_v31, %v942_v27  ;;  %v354_v31 = vor.u32 %v2296_v62, %v350_v46 }
  0x57   : > { %746 = vrot.lane.b32.xlu1 %v689_v37, %s2180_s24  ;;  %v946_v37 = vrot.slane %v2522_v34, 2 }
  0x5a   : > { %805 = vrot.lane.b32.xlu0 %v2328_v23, %s2178_s20  ;;  %v938_v23 = vrot.slane %v2412_v1, 2 }
  0x5b   : > { %821 = vrot.lane.b32.xlu1 %v2485_v56, %s2178_s20 }
  0x5c   : > { %v2538_v47 = vor.u32 %v939_v11, %v938_v23  ;;  %v917_v23 = vsel %vm893_vm4, %v912_v40, %v2548_v59  ;;  %v1029_v11 = vrot.slane %v2403_v58, 3  ;;  %v358_v40 = vrot.slane %v2423_v7, 1 }
  0x5e   : > { %807 = vrot.lane.b32.xlu0 %v772_v6, %s2178_s20  ;;  %3561 = vst [vmem:[#allocation8_spill] sm:$0xff] %v2538_v47  ;;  %v1030_v27 = vsel %vm1023_vm5, %v1027_v36, %v1029_v11  ;;  %v359_v45 = vsel %vm315_vm2, %v354_v31, %v358_v40  ;;  %v3534_v36 = vrot.slane %v2491_v0, 3  ;;  %v1032_v42 = vsel %vm1023_vm5, %v1029_v11, %v3536_v61 }
  0x5f   : > { %823 = vrot.lane.b32.xlu1 %v788_v16, %s2178_s20  ;;  %v362_v46 = vor.u32 %v2426_v8, %v358_v40 }
  0x60   : > { %v1048_v1 = vsel %vm1023_vm5, %v1045_v25, %v3534_v36  ;;  %v658_v25 = vrot.slane %v2514_v26, 1 }
  0x62   : > { %858 = vrot.lane.b32.xlu0 %v772_v6, %s2181_s25  ;;  %v945_v6 = vsel %vm893_vm4, %v2538_v47, %v944_v60 }
  0x63   : > { %874 = vrot.lane.b32.xlu1 %v788_v16, %s2181_s25  ;;  %v2552_v16 = vor.u32 %v947_v53, %v946_v37  ;;  %v367_v37 = vsel %vm315_vm2, %v362_v46, %v3535_v50  ;;  %v531_v53 = vrot.slane %v2491_v0, 1 }
  0x65   : > { %v949_v20 = vsel %vm893_vm4, %v944_v60, %v2552_v16  ;;  %v422_v60 = vrot.slane %v2431_v13, 1  ;;  %v3533_v13 = vrot.slane %v2519_v32, 1  ;;  %v532_v11 = vsel %vm503_vm0, %v529_v49, %v531_v53 }
  0x66   : > { %860 = vrot.lane.b32.xlu0 %v2534_v39, %s2181_s25  ;;  %v691_v49 = vrot.slane %v2519_v32, 2 }
  0x67   : > { %876 = vrot.lane.b32.xlu1 %v2528_v38, %s2181_s25  ;;  %v423_v62 = vsel %vm315_vm2, %v418_v44, %v422_v60  ;;  %v426_v7 = vor.u32 %v2434_v15, %v422_v60  ;;  %v515_v15 = vrot.slane %v2494_v5, 1 }
  0x69   : > { %v431_v8 = vsel %vm315_vm2, %v426_v7, %v3533_v13 }
  0x6a   : > { %988 = vrot.lane.b32.xlu0 %v913_v54, %s2182_s26  ;;  %v2612_v54 = vld [vmem:[%s2219_s17 + $0x78] sm:$0xff]  }
  0x6b   : > { %1004 = vrot.lane.b32.xlu1 %v945_v6, %s2182_s26  ;;  %v2615_v6 = vld [vmem:[%s2219_s17 + $0x38] sm:$0xff]   ;;  %v2643_v31 = vshrl.u32 %v2612_v54, 16 }
  0x6c   : > { %v2632_v58 = vshll.u32 %v2615_v6, 16 }
  0x6d   : > { %v694_v46 = vrot.slane %v2643_v31, 1  ;;  %v950_v52 = vrot.slane %v2643_v31, 2 }
  0x6e   : > { %990 = vrot.lane.b32.xlu0 %v917_v23, %s2182_s26  ;;  %v516_v23 = vsel %vm503_vm0, %v513_v3, %v515_v15  ;;  %v2635_v3 = vshrl.u32 %v2615_v6, 16  ;;  %v663_v60 = vrot.slane %v2632_v58, 2 }
  0x6f   : > { %1006 = vrot.lane.b32.xlu1 %v949_v20, %s2182_s26  ;;  %v3531_v20 = vrot.slane %v2612_v54, 1 }
  0x70   : > { %v662_v44 = vrot.slane %v2635_v3, 1 }
  0x72   : > { %1065 = vrot.lane.b32.xlu0 %v1030_v27, %s2183_s27  ;;  %v2640_v27 = vshll.u32 %v2612_v54, 16 }
  0x73   : > { %1081 = vrot.lane.b32.xlu1 %v1046_v33, %s2183_s27 }
  0x74   : > { %v951_v29 = vrot.slane %v2640_v27, 3 }
  0x76   : > { %472 = vrot.lane.b32.xlu0 %v359_v45, %s2179_s21 }
  0x77   : > { %488 = vrot.lane.b32.xlu1 %v423_v62, %s2179_s21  ;;  %v2657_v62 = vsel %vm503_vm0, %v531_v53, %v3531_v20 }
  0x7a   : > { %1067 = vrot.lane.b32.xlu0 %v1032_v42, %s2183_s27  ;;  %v692_v42 = vor.u32 %v691_v49, %v690_v57 }
  0x7b   : > { %1083 = vrot.lane.b32.xlu1 %v1048_v1, %s2183_s27  ;;  %v695_v1 = vrot.slane %v2640_v27, 2 }
  0x7c   : > { %v693_v53 = vsel %vm633_vm3, %v2469_v48, %v692_v42  ;;  %v775_v48 = vrot.slane %v2615_v6, 2 }
  0x7e   : > { %474 = vrot.lane.b32.xlu0 %v367_v37, %s2179_s21 }
  0x7f   : > { %490 = vrot.lane.b32.xlu1 %v431_v8, %s2179_s21  ;;  %v2667_v8 = vor.u32 %v663_v60, %v662_v44  ;;  %v791_v44 = vrot.slane %v2612_v54, 2 }
  0x82   : > { %549 = vrot.lane.b32.xlu0 %v2445_v18, %s2177_s19  ;;  %v3532_v18 = vrot.slane %v2615_v6, 1 }
  0x83   : > { %565 = vrot.lane.b32.xlu1 %v2440_v17, %s2177_s19  ;;  %v659_v17 = vrot.slane %v2511_v12, 2 }
  0x84   : > { %v2650_v40 = vsel %vm503_vm0, %v515_v15, %v3532_v18 }
  0x85   : > { %v660_v33 = vor.u32 %v659_v17, %v658_v25 }
  0x86   : > { %551 = vrot.lane.b32.xlu0 %v516_v23, %s2177_s19 }
  0x87   : > { %567 = vrot.lane.b32.xlu1 %v532_v11, %s2177_s19  ;;  %v661_v37 = vsel %vm633_vm3, %v2465_v43, %v660_v33  ;;  %v665_v25 = vsel %vm633_vm3, %v660_v33, %v2667_v8  ;;  %v2690_v33 = vld [vmem:[%s2219_s17 + $0x80] sm:$0xff]  }
  0x88   : > { %v2723_v20 = vshll.u32 %v2690_v33, 16 }
  0x8a   : > { %602 = vrot.lane.b32.xlu0 %v516_v23, %s2176_s18  ;;  %v2673_v23 = vor.u32 %v695_v1, %v694_v46  ;;  %v2693_v46 = vld [vmem:[%s2219_s17 + $0x40] sm:$0xff]  }
  0x8b   : > { %618 = vrot.lane.b32.xlu1 %v532_v11, %s2176_s18  ;;  %v2718_v24 = vshrl.u32 %v2693_v46, 16 }
  0x8c   : > { %v595_v45 = vpop.permute.xlu0 %594  ;;  %v697_v17 = vsel %vm633_vm3, %v692_v42, %v2673_v23  ;;  %v776_v42 = vsel %vm763_vm1, %v773_v10, %v775_v48  ;;  %v918_v10 = vrot.slane %v2635_v3, 2 }
  0x8d   : > { %v542_v7 = vpop.permute.xlu1 %541  ;;  %v922_v50 = vrot.slane %v2718_v24, 2 }
  0x8e   : > { %604 = vrot.lane.b32.xlu0 %v2650_v40, %s2176_s18 }
  0x8f   : > { %620 = vrot.lane.b32.xlu1 %v2657_v62, %s2176_s18 }
  0x90   : > { %v2669_v15 = vpop.permute.xlu0 %801 }
  0x91   : > { %v544_v11 = vpop.permute.xlu1 %543 }
  0x92   : > { %732 = vrot.lane.b32.xlu0 %v661_v37, %s2180_s24 }
  0x93   : > { %748 = vrot.lane.b32.xlu1 %v693_v53, %s2180_s24 }
  0x94   : > { %v465_v43 = vpop.permute.xlu0 %464 }
  0x95   : > { %v597_v57 = vpop.permute.xlu1 %596  ;;  %v1099_v1 = vsel %vm1097_vm6, %v2238_v14, %v465_v43 }
  0x96   : > { %734 = vrot.lane.b32.xlu0 %v665_v25, %s2180_s24  ;;  %v3542_v25 = vrot.slane %v2693_v46, 2  ;;  %v1136_v14 = vsel %vm1134_vm7, %v1099_v1, %v542_v7  ;;  %v2726_v7 = vshrl.u32 %v2690_v33, 16 }
  0x97   : > { %750 = vrot.lane.b32.xlu1 %v697_v17, %s2180_s24  ;;  %v919_v17 = vrot.slane %v2632_v58, 3  ;;  %v1173_v1 = vsel %vm1171_vm8, %v1136_v14, %v595_v45 }
  0x98   : > { %v467_v49 = vpop.permute.xlu0 %466  ;;  %v2734_v18 = vsel %vm763_vm1, %v775_v48, %v3542_v25  ;;  %v954_v14 = vrot.slane %v2726_v7, 2  ;;  %v955_v48 = vrot.slane %v2723_v20, 3 }
  0x99   : > { %v2685_v60 = vpop.permute.xlu1 %803  ;;  %v1101_v43 = vsel %vm1097_vm6, %v2233_v9, %v467_v49  ;;  %v920_v36 = vor.u32 %v919_v17, %v918_v10 }
  0x9a   : > { %809 = vrot.lane.b32.xlu0 %v2534_v39, %s2178_s20  ;;  %v792_v39 = vsel %vm763_vm1, %v789_v28, %v791_v44  ;;  %v2715_v28 = vshll.u32 %v2693_v46, 16  ;;  %v1138_v49 = vsel %vm1134_vm7, %v1101_v43, %v544_v11  ;;  %v2763_v43 = vor.u32 %v955_v48, %v954_v14 }
  0x9b   : > { %825 = vrot.lane.b32.xlu1 %v2528_v38, %s2178_s20  ;;  %v3541_v38 = vrot.slane %v2690_v33, 2 }
  0x9c   : > { %v725_v37 = vpop.permute.xlu0 %724  ;;  %v923_v61 = vrot.slane %v2715_v28, 3 }
  0x9d   : > { %v727_v53 = vpop.permute.xlu1 %726  ;;  %v1210_v13 = vsel %vm1208_vm9, %v1173_v1, %v725_v37  ;;  %v2743_v45 = vsel %vm763_vm1, %v791_v44, %v3541_v38  ;;  %v1175_v37 = vsel %vm1171_vm8, %v1138_v49, %v597_v57 }
  0x9e   : > { %811 = vrot.lane.b32.xlu0 %v776_v42, %s2178_s20  ;;  %v1247_v10 = vsel %vm1245_vm10, %v1210_v13, %v2669_v15  ;;  %v1212_v57 = vsel %vm1208_vm9, %v1175_v37, %v727_v53  ;;  %v3563_v37 = vrot.slane %v2511_v12, 1 }
  0x9f   : > { %827 = vrot.lane.b32.xlu1 %v792_v39, %s2178_s20 }
  0xa0   : > { %v855_v51 = vpop.permute.xlu0 %854 }
  0xa1   : > { %v857_v9 = vpop.permute.xlu1 %856  ;;  %v1284_v17 = vsel %vm1282_vm11, %v1247_v10, %v855_v51  ;;  %v374_v10 = vrot.slane %v2632_v58, 1 }
  0xa2   : > { %862 = vrot.lane.b32.xlu0 %v776_v42, %s2181_s25  ;;  %v952_v42 = vor.u32 %v951_v29, %v950_v52  ;;  %v921_v29 = vsel %vm893_vm4, %v2548_v59, %v920_v36  ;;  %v2757_v52 = vor.u32 %v923_v61, %v922_v50  ;;  %v1249_v59 = vsel %vm1245_vm10, %v1212_v57, %v2685_v60 }
  0xa3   : > { %878 = vrot.lane.b32.xlu1 %v792_v39, %s2181_s25  ;;  %v1286_v50 = vsel %vm1282_vm11, %v1249_v59, %v857_v9  ;;  %v3565_v57 = vrot.slane %v2519_v32, 1  ;;  %v3538_v32 = vrot.slane %v2690_v33, 3 }
  0xa4   : > { %v985_v11 = vpop.permute.xlu0 %984  ;;  %v953_v15 = vsel %vm893_vm4, %v2552_v16, %v952_v42  ;;  %v925_v61 = vsel %vm893_vm4, %v920_v36, %v2757_v52  ;;  %v1033_v16 = vrot.slane %v2615_v6, 3  ;;  %v957_v1 = vsel %vm893_vm4, %v952_v42, %v2763_v43 }
  0xa5   : > { %v987_v39 = vpop.permute.xlu1 %986  ;;  %v1321_v44 = vsel %vm1319_vm12, %v1284_v17, %v985_v11  ;;  %v1049_v11 = vrot.slane %v2612_v54, 3  ;;  %v3562_v36 = vrot.slane %v2494_v5, 3  ;;  %v370_v42 = vor.u32 %v2514_v26, %v3563_v37  ;;  %v2854_v37 = vld [vmem:[%s2219_s17 + $0x88] sm:$0xff]  }
  0xa6   : > { %864 = vrot.lane.b32.xlu0 %v2734_v18, %s2181_s25  ;;  %v1323_v14 = vsel %vm1319_vm12, %v1286_v50, %v987_v39  ;;  %v3564_v17 = vrot.slane %v2491_v0, 3  ;;  %v438_v5 = vrot.slane %v2640_v27, 1  ;;  %v3540_v26 = vrot.slane %v2693_v46, 3 }
  0xa7   : > { %880 = vrot.lane.b32.xlu1 %v2743_v45, %s2181_s25  ;;  %v1034_v9 = vsel %vm1023_vm5, %v3562_v36, %v1033_v16  ;;  %v375_v12 = vsel %vm315_vm2, %v370_v42, %v374_v10  ;;  %v378_v27 = vor.u32 %v2635_v3, %v374_v10  ;;  %v535_v36 = vrot.slane %v2690_v33, 1  ;;  %v2857_v42 = vld [vmem:[%s2219_s17 + $0x48] sm:$0xff]  }
  0xa8   : > { %v1062_v13 = vpop.permute.xlu0 %1061  ;;  %v442_v50 = vor.u32 %v2643_v31, %v438_v5  ;;  %v3566_v10 = vrot.slane %v2615_v6, 1  ;;  %v666_v6 = vrot.slane %v2718_v24, 1 }
  0xa9   : > { %v2765_v51 = vpop.permute.xlu1 %468  ;;  %v1358_v49 = vsel %vm1356_vm13, %v1321_v44, %v1062_v13  ;;  %v434_v44 = vor.u32 %v2522_v34, %v3565_v57  ;;  %v1036_v34 = vsel %vm1023_vm5, %v1033_v16, %v3540_v26  ;;  %v3567_v57 = vrot.slane %v2612_v54, 1 }
  0xaa   : > { %992 = vrot.lane.b32.xlu0 %v921_v29, %s2182_s26  ;;  %2064 = vmatprep.mubr.msk.bf16.mxu0 %vm1415_vm14, %v1358_v49  ;;  %v1050_v29 = vsel %vm1023_vm5, %v3564_v17, %v1049_v11  ;;  %v3539_v49 = vrot.slane %v2715_v28, 1  ;;  %v2883_v54 = vshrl.u32 %v2857_v42, 16 }
  0xab   : > { %1008 = vrot.lane.b32.xlu1 %v953_v15, %s2182_s26  ;;  %v439_v0 = vsel %vm315_vm2, %v434_v44, %v438_v5  ;;  %v536_v44 = vsel %vm503_vm0, %v3567_v57, %v535_v36 }
  0xac   : > { %v2777_v53 = vpop.permute.xlu0 %484  ;;  %v383_v3 = vsel %vm315_vm2, %v378_v27, %v3539_v49  ;;  %v698_v27 = vrot.slane %v2726_v7, 1  ;;  %v926_v41 = vrot.slane %v2883_v54, 2 }
  0xad   : > { %v1064_v48 = vpop.permute.xlu1 %1063  ;;  %v1119_v19 = vsel %vm1097_vm6, %v2299_v63, %v2777_v53 }
  0xae   : > { %v1360_v60 = vsel %vm1356_vm13, %v1323_v14, %v1064_v48  ;;  %994 = vrot.lane.b32.xlu0 %v925_v61, %s2182_s26  ;;  %v1052_v61 = vsel %vm1023_vm5, %v1049_v11, %v3538_v32  ;;  %v519_v48 = vrot.slane %v2693_v46, 1 }
  0xaf   : > { %1010 = vrot.lane.b32.xlu1 %v957_v1, %s2182_s26  ;;  %2065 = vmatmul.mubr.msk.bf16.vlgmr.msra.gmra.mrb[0].mxu0 %vm1415_vm14, %v1360_v60  ;;  %v3537_v1 = vrot.slane %v2723_v20, 1 }
  0xb0   : > { %v2794_v39 = vpop.permute.xlu0 %470  ;;  %v520_v17 = vsel %vm503_vm0, %v3566_v10, %v519_v48 }
  0xb1   : > { %v2803_v13 = vpop.permute.xlu1 %486  ;;  %v447_v31 = vsel %vm315_vm2, %v442_v50, %v3537_v1  ;;  %v2890_v50 = vshll.u32 %v2854_v37, 16  ;;  %v670_v1 = vrot.slane %v2883_v54, 1 }
  0xb2   : > { %1069 = vrot.lane.b32.xlu0 %v1034_v9, %s2183_s27 }
  0xb3   : > { %1085 = vrot.lane.b32.xlu1 %v1050_v29, %s2183_s27 }
  0xb4   : > { %v2809_v58 = vpop.permute.xlu0 %545 }
  0xb5   : > { %v2813_v15 = vpop.permute.xlu1 %561 }
  0xb6   : > { %476 = vrot.lane.b32.xlu0 %v375_v12, %s2179_s21  ;;  %v3543_v12 = vrot.slane %v2857_v42, 1 }
  0xb7   : > { %492 = vrot.lane.b32.xlu1 %v439_v0, %s2179_s21  ;;  %v2880_v0 = vshll.u32 %v2857_v42, 16 }
  0xb8   : > { %v2822_v59 = vpop.permute.xlu0 %547  ;;  %v2902_v10 = vsel %vm503_vm0, %v519_v48, %v3543_v12 }
  0xb9   : > { %v2829_v14 = vpop.permute.xlu1 %563  ;;  %v671_v32 = vrot.slane %v2880_v0, 2 }
  0xba   : > { %1071 = vrot.lane.b32.xlu0 %v1036_v34, %s2183_s27 }
  0xbb   : > { %1087 = vrot.lane.b32.xlu1 %v1052_v61, %s2183_s27  ;;  %v699_v61 = vrot.slane %v2723_v20, 2 }
  0xbc   : > { %v2836_v16 = vpop.permute.xlu0 %598 }
  0xbd   : > { %v2841_v11 = vpop.permute.xlu1 %614  ;;  %v700_v38 = vor.u32 %v699_v61, %v698_v27 }
  0xbe   : > { %478 = vrot.lane.b32.xlu0 %v383_v3, %s2179_s21  ;;  %v2893_v3 = vshrl.u32 %v2854_v37, 16 }
  0xbf   : > { %494 = vrot.lane.b32.xlu1 %v447_v31, %s2179_s21 }
  0xc0   : > { %v2846_v60 = vpop.permute.xlu0 %600 }
  0xc1   : > { %v2849_v9 = vpop.permute.xlu1 %616 }
  0xc2   : > { %553 = vrot.lane.b32.xlu0 %v2650_v40, %s2177_s19  ;;  %v2873_v40 = vrot.slane %v2854_v37, 1 }
  0xc3   : > { %569 = vrot.lane.b32.xlu1 %v2657_v62, %s2177_s19  ;;  %v667_v62 = vrot.slane %v2715_v28, 2 }
  0xc4   : > { %v2864_v29 = vpop.permute.xlu0 %728  ;;  %3568 = vst [vmem:[#allocation9_spill] sm:$0xff] %v2873_v40  ;;  %v2908_v26 = vsel %vm503_vm0, %v535_v36, %v2873_v40  ;;  %v701_v36 = vsel %vm633_vm3, %v2673_v23, %v700_v38  ;;  %v779_v23 = vrot.slane %v2857_v42, 2 }
  0xc5   : > { %v2869_v5 = vpop.permute.xlu1 %744  ;;  %v668_v57 = vor.u32 %v667_v62, %v666_v6  ;;  %v2918_v6 = vor.u32 %v671_v32, %v670_v1 }
  0xc6   : > { %555 = vrot.lane.b32.xlu0 %v520_v17, %s2177_s19 }
  0xc7   : > { %571 = vrot.lane.b32.xlu1 %v536_v44, %s2177_s19  ;;  %v669_v48 = vsel %vm633_vm3, %v2667_v8, %v668_v57  ;;  %3569 = vst [vmem:[#allocation10_spill] sm:$0xff] %v2918_v6  ;;  %v673_v12 = vsel %vm633_vm3, %v668_v57, %v2918_v6 }
  0xc8   : > { %v2885_v34 = vpop.permute.xlu0 %730 }
  0xc9   : > { %v2895_v31 = vpop.permute.xlu1 %746 }
  0xca   : > { %606 = vrot.lane.b32.xlu0 %v520_v17, %s2176_s18  ;;  %v702_v17 = vrot.slane %v2893_v3, 1 }
  0xcb   : > { %622 = vrot.lane.b32.xlu1 %v536_v44, %s2176_s18  ;;  %v703_v44 = vrot.slane %v2890_v50, 2 }
  0xcc   : > { %v806_v49 = vpop.permute.xlu0 %805 }
  0xcd   : > { %v822_v25 = vpop.permute.xlu1 %821  ;;  %v2924_v27 = vor.u32 %v703_v44, %v702_v17  ;;  %v795_v44 = vrot.slane %v2854_v37, 2 }
  0xce   : > { %608 = vrot.lane.b32.xlu0 %v2902_v10, %s2176_s18 }
  0xcf   : > { %624 = vrot.lane.b32.xlu1 %v2908_v26, %s2176_s18  ;;  %3570 = vst [vmem:[#allocation11_spill] sm:$0xff] %v2924_v27  ;;  %v705_v32 = vsel %vm633_vm3, %v700_v38, %v2924_v27  ;;  %v3571_v38 = vrot.slane %v2693_v46, 2 }
  0xd0   : > { %v2920_v62 = vpop.permute.xlu0 %807 }
  0xd1   : > { %v2926_v61 = vpop.permute.xlu1 %823 }
  0xd2   : > { %736 = vrot.lane.b32.xlu0 %v669_v48, %s2180_s24 }
  0xd3   : > { %752 = vrot.lane.b32.xlu1 %v701_v36, %s2180_s24  ;;  %v2943_v36 = vld [vmem:[%s2219_s17 + $0x90] sm:$0xff]  }
  0xd4   : > { %v859_v8 = vpop.permute.xlu0 %858  ;;  %v2956_v56 = vrot.slane %v2943_v36, 2  ;;  %v707_v6 = vshrl.u32 %v2943_v36, 16  ;;  %v710_v55 = vshll.u32 %v2943_v36, 16 }
  0xd5   : > { %v875_v1 = vpop.permute.xlu1 %874 }
  0xd6   : > { %738 = vrot.lane.b32.xlu0 %v673_v12, %s2180_s24  ;;  %v780_v12 = vsel %vm763_vm1, %v3571_v38, %v779_v23  ;;  %v959_v38 = vrot.slane %v2890_v50, 3 }
  0xd7   : > { %754 = vrot.lane.b32.xlu1 %v705_v32, %s2180_s24  ;;  %v3572_v32 = vrot.slane %v2690_v33, 2 }
  0xd8   : > { %v2937_v17 = vpop.permute.xlu0 %860 }
  0xd9   : > { %v2940_v48 = vpop.permute.xlu1 %876  ;;  %v796_v35 = vsel %vm763_vm1, %v3572_v32, %v795_v44  ;;  %v927_v32 = vrot.slane %v2880_v0, 3 }
  0xda   : > { %813 = vrot.lane.b32.xlu0 %v2734_v18, %s2178_s20  ;;  %v958_v18 = vrot.slane %v2893_v3, 2 }
  0xdb   : > { %829 = vrot.lane.b32.xlu1 %v2743_v45, %s2178_s20  ;;  %v1103_v45 = vsel %vm1097_vm6, %v2228_v4, %v2765_v51  ;;  %v1156_v4 = vsel %vm1134_vm7, %v1119_v19, %v2813_v15  ;;  %v3573_v19 = vrot.slane %v2299_v63, 2 }
  0xdc   : > { %v989_v57 = vpop.permute.xlu0 %988  ;;  %v1140_v30 = vsel %vm1134_vm7, %v1103_v45, %v2809_v58  ;;  %v1193_v40 = vsel %vm1171_vm8, %v1156_v4, %v2841_v11  ;;  %v2985_v45 = vsel %vm763_vm1, %v795_v44, %v2956_v56  ;;  %v960_v11 = vor.u32 %v959_v38, %v958_v18 }
  0xdd   : > { %v1005_v47 = vpop.permute.xlu1 %1004  ;;  %v1177_v51 = vsel %vm1171_vm8, %v1140_v30, %v2836_v16  ;;  %v2990_v30 = vsel %vm763_vm1, %v779_v23, %v3573_v19  ;;  %v1230_v15 = vsel %vm1208_vm9, %v1193_v40, %v2869_v5  ;;  %v931_v23 = vrot.slane %v2323_v22, 3 }
  0xde   : > { %815 = vrot.lane.b32.xlu0 %v780_v12, %s2178_s20  ;;  %v1214_v53 = vsel %vm1208_vm9, %v1177_v51, %v2864_v29  ;;  %v928_v29 = vor.u32 %v927_v32, %v926_v41  ;;  %v1267_v4 = vsel %vm1245_vm10, %v1230_v15, %v822_v25  ;;  %v930_v51 = vrot.slane %v2335_v2, 2 }
  0xdf   : > { %831 = vrot.lane.b32.xlu1 %v796_v35, %s2178_s20  ;;  %v1251_v16 = vsel %vm1245_vm10, %v1214_v53, %v806_v49  ;;  %v1304_v19 = vsel %vm1282_vm11, %v1267_v4, %v875_v1  ;;  %v962_v40 = vrot.slane %v707_v6, 2  ;;  %v963_v41 = vrot.slane %v710_v55, 3 }
  0xe0   : > { %v991_v27 = vpop.permute.xlu0 %990  ;;  %v1288_v44 = vsel %vm1282_vm11, %v1251_v16, %v859_v8  ;;  %v1341_v25 = vsel %vm1319_vm12, %v1304_v19, %v1005_v47  ;;  %v1121_v47 = vsel %vm1097_vm6, %v2320_v21, %v2803_v13  ;;  %v961_v13 = vsel %vm893_vm4, %v2763_v43, %v960_v11 }
  0xe1   : > { %v1007_v58 = vpop.permute.xlu1 %1006  ;;  %v1325_v5 = vsel %vm1319_vm12, %v1288_v44, %v989_v57  ;;  %v929_v57 = vsel %vm893_vm4, %v2757_v52, %v928_v29  ;;  %v1158_v32 = vsel %vm1134_vm7, %v1121_v47, %v2829_v14  ;;  %v3036_v15 = vor.u32 %v963_v41, %v962_v40 }
  0xe2   : > { %866 = vrot.lane.b32.xlu0 %v780_v12, %s2181_s25  ;;  %v2155_v12 = vld [vmem:[%s2219_s17 + $0x18] sm:$0xff]   ;;  %v3576_v41 = vrot.slane %v2690_v33, 3 }
  0xe3   : > { %882 = vrot.lane.b32.xlu1 %v796_v35, %s2181_s25  ;;  %v1105_v18 = vsel %vm1097_vm6, %v2155_v12, %v2794_v39  ;;  %v3026_v39 = vor.u32 %v931_v23, %v930_v51  ;;  %v965_v23 = vsel %vm893_vm4, %v960_v11, %v3036_v15  ;;  %v2149_v12 = vld [vmem:[%s2219_s17 + $0x90] ss:$0 sps:$4 sm:$0x11]  }
  0xe4   : > { %v1066_v49 = vpop.permute.xlu0 %1065  ;;  %v1142_v38 = vsel %vm1134_vm7, %v1105_v18, %v2822_v59  ;;  %v1195_v59 = vsel %vm1171_vm8, %v1158_v32, %v2849_v9 }
  0xe5   : > { %v1082_v8 = vpop.permute.xlu1 %1081  ;;  %v1362_v35 = vsel %vm1356_vm13, %v1325_v5, %v1066_v49  ;;  %v1179_v52 = vsel %vm1171_vm8, %v1142_v38, %v2846_v60  ;;  %v1232_v14 = vsel %vm1208_vm9, %v1195_v59, %v2895_v31  ;;  %v933_v9 = vsel %vm893_vm4, %v928_v29, %v3026_v39 }
  0xe6   : > { %868 = vrot.lane.b32.xlu0 %v2990_v30, %s2181_s25  ;;  %2068 = vmatprep.mubr.msk.bf16.mxu0 %vm1415_vm14, %v1362_v35  ;;  %v1378_v1 = vsel %vm1356_vm13, %v1341_v25, %v1082_v8  ;;  %v1216_v16 = vsel %vm1208_vm9, %v1179_v52, %v2885_v34  ;;  %v1269_v43 = vsel %vm1245_vm10, %v1232_v14, %v2926_v61  ;;  %v1037_v34 = vrot.slane %v2857_v42, 3 }
  0xe7   : > { %884 = vrot.lane.b32.xlu1 %v2985_v45, %s2181_s25  ;;  %2084 = vmatprep.mubr.msk.bf16.mxu1 %vm1415_vm14, %v1378_v1  ;;  %v1253_v60 = vsel %vm1245_vm10, %v1216_v16, %v2920_v62  ;;  %v1306_v31 = vsel %vm1282_vm11, %v1269_v43, %v2940_v48  ;;  %v1053_v61 = vrot.slane %v2854_v37, 3  ;;  %v390_v49 = vrot.slane %v2880_v0, 1 }
  0xe8   : > { %v3032_v53 = vpop.permute.xlu0 %472  ;;  %v1290_v44 = vsel %vm1282_vm11, %v1253_v60, %v2937_v17  ;;  %v1343_v17 = vsel %vm1319_vm12, %v1306_v31, %v1007_v58  ;;  %v3575_v58 = vrot.slane %v2715_v28, 1  ;;  %v3577_v8 = vrot.slane %v2723_v20, 1  ;;  %v3093_v28 = vld [vmem:[%s2219_s17 + $0x50] sm:$0xff]  }
  0xe9   : > { %v3042_v4 = vpop.permute.xlu1 %488  ;;  %v1327_v62 = vsel %vm1319_vm12, %v1290_v44, %v991_v27  ;;  %v3574_v27 = vrot.slane %v2693_v46, 3  ;;  %v1054_v25 = vsel %vm1023_vm5, %v3576_v41, %v1053_v61  ;;  %v454_v46 = vrot.slane %v2890_v50, 1 }
  0xea   : > { %996 = vrot.lane.b32.xlu0 %v929_v57, %s2182_s26  ;;  %v386_v11 = vor.u32 %v2718_v24, %v3575_v58  ;;  %v450_v35 = vor.u32 %v2726_v7, %v3577_v8  ;;  %v1039_v33 = vrot.slane %v3093_v28, 3  ;;  %v1055_v7 = vrot.slane %v2943_v36, 3 }
  0xeb   : > { %1012 = vrot.lane.b32.xlu1 %v961_v13, %s2182_s26  ;;  %v1038_v48 = vsel %vm1023_vm5, %v3574_v27, %v1037_v34  ;;  %v460_v50 = vshll.u32 %v2149_v12, 16  ;;  %v394_v47 = vor.u32 %v2883_v54, %v390_v49  ;;  %v458_v52 = vor.u32 %v2893_v3, %v454_v46 }
  0xec   : > { %v1068_v51 = vpop.permute.xlu0 %1067  ;;  %v391_v24 = vsel %vm315_vm2, %v386_v11, %v390_v49  ;;  %v455_v20 = vsel %vm315_vm2, %v450_v35, %v454_v46  ;;  %v1040_v57 = vsel %vm1023_vm5, %v1037_v34, %v1039_v33  ;;  %v1056_v32 = vsel %vm1023_vm5, %v1053_v61, %v1055_v7 }
  0xed   : > { %v1084_v19 = vpop.permute.xlu1 %1083  ;;  %v1364_v5 = vsel %vm1356_vm13, %v1327_v62, %v1068_v51  ;;  %v462_v13 = vrot.slane %v460_v50, 1  ;;  %v3578_v16 = vrot.slane %v2323_v22, 1  ;;  %v539_v44 = vrot.slane %v2149_v12, 1 }
  0xee   : > { %v1380_v29 = vsel %vm1356_vm13, %v1343_v17, %v1084_v19  ;;  %998 = vrot.lane.b32.xlu0 %v933_v9, %s2182_s26  ;;  %2069 = vmatmul.mubr.msk.bf16.gmra.mrb[4].mxu0 %vm1415_vm14, %v1364_v5  ;;  %v3579_v34 = vrot.slane %v2299_v63, 1  ;;  %v3580_v31 = vrot.slane %v2857_v42, 1  ;;  %v590_v51 = vrot.slane %v2943_v36, 1  ;;  %v3581_v17 = vld [vmem:[#allocation9_spill] sm:$0xff] }
  0xef   : > { %1014 = vrot.lane.b32.xlu1 %v965_v23, %s2182_s26  ;;  %2085 = vmatmul.mubr.msk.bf16.vlgmr.msra.gmra.mrb[0].mxu1 %vm1415_vm14, %v1380_v29  ;;  %v399_v54 = vsel %vm315_vm2, %v394_v47, %v3578_v16  ;;  %v463_v60 = vsel %vm315_vm2, %v458_v52, %v462_v13  ;;  %v2150_v23 = vld [vmem:[%s2219_s17 + $0x98] ss:$0 sps:$4 sm:$0x11]   ;;  %v540_v19 = vsel %vm503_vm0, %v3581_v17, %v539_v44  ;;  %v674_v27 = vrot.slane %v2335_v2, 1  ;;  %v3584_v47 = vld [vmem:[#allocation11_spill] sm:$0xff]  ;;  %v3585_v16 = vld [vmem:[#allocation6_spill] sm:$0xff] }
  0xf0   : > { %v3077_v40 = vpop.permute.xlu0 %474  ;;  %v524_v62 = vsel %vm503_vm0, %v3580_v31, %v3579_v34  ;;  %v2151_v5 = vld [vmem:[%s2219_s17 + $0x98] ss:$0 sps:$4 sm:$0x33]   ;;  %v709_v11 = vrot.slane %v707_v6, 1  ;;  %v712_v49 = vrot.slane %v710_v55, 2  ;;  %v3583_v55 = vld [vmem:[#allocation10_spill] sm:$0xff] }
  0xf1   : > { %v3087_v18 = vpop.permute.xlu1 %490  ;;  %v716_v41 = vshrl.u32 %v2151_v5, 16  ;;  %v3184_v31 = vld [vmem:[%s2219_s17 + $0x98] sm:$0xff]  }
  0xf2   : > { %1073 = vrot.lane.b32.xlu0 %v1038_v48, %s2183_s27  ;;  %v675_v48 = vrot.slane %v2323_v22, 2  ;;  %v713_v46 = vor.u32 %v712_v49, %v709_v11 }
  0xf3   : > { %1089 = vrot.lane.b32.xlu1 %v1054_v25, %s2183_s27  ;;  %v719_v25 = vshll.u32 %v2151_v5, 16  ;;  %v718_v12 = vrot.slane %v716_v41, 1 }
  0xf4   : > { %v3096_v0 = vpop.permute.xlu0 %549  ;;  %v676_v35 = vor.u32 %v675_v48, %v674_v27  ;;  %v3586_v27 = vrot.slane %v2320_v21, 2 }
  0xf5   : > { %v3100_v1 = vpop.permute.xlu1 %565 }
  0xf6   : > { %480 = vrot.lane.b32.xlu0 %v391_v24, %s2179_s21  ;;  %v721_v24 = vrot.slane %v719_v25, 2  ;;  %v677_v50 = vsel %vm633_vm3, %v3583_v55, %v676_v35  ;;  %v3589_v55 = vld [vmem:[#allocation2_spill] sm:$0xff] }
  0xf7   : > { %496 = vrot.lane.b32.xlu1 %v455_v20, %s2179_s21  ;;  %v3582_v20 = vld [vmem:[#allocation5_spill] sm:$0xff] }
  0xf8   : > { %v3108_v38 = vpop.permute.xlu0 %551  ;;  %v722_v52 = vor.u32 %v721_v24, %v718_v12 }
  0xf9   : > { %v3114_v59 = vpop.permute.xlu1 %567 }
  0xfa   : > { %1075 = vrot.lane.b32.xlu0 %v1040_v57, %s2183_s27  ;;  %v723_v44 = vsel %vm633_vm3, %v713_v46, %v722_v52 }
  0xfb   : > { %1091 = vrot.lane.b32.xlu1 %v1056_v32, %s2183_s27  ;;  %v714_v32 = vsel %vm633_vm3, %v3584_v47, %v713_v46  ;;  %v2158_v46 = vld [vmem:[%s2219_s17 + $0x60] sm:$0xff]  }
  0xfc   : > { %v3121_v14 = vpop.permute.xlu0 %602  ;;  %v1123_v12 = vsel %vm1097_vm6, %v2158_v46, %v3042_v4 }
  0xfd   : > { %v3124_v43 = vpop.permute.xlu1 %618 }
  0xfe   : > { %482 = vrot.lane.b32.xlu0 %v399_v54, %s2179_s21  ;;  %v681_v54 = vsel %vm633_vm3, %v676_v35, %v3585_v16  ;;  %v2157_v35 = vld [vmem:[%s2219_s17 + $0x20] sm:$0xff]  }
  0xff   : > { %498 = vrot.lane.b32.xlu1 %v463_v60, %s2179_s21 }
 0x100   : > { %v3128_v3 = vpop.permute.xlu0 %604 }
 0x101   : > { %v3130_v9 = vpop.permute.xlu1 %620 }
 0x102   : > { %557 = vrot.lane.b32.xlu0 %v2902_v10, %s2177_s19  ;;  %v592_v10 = vrot.slane %v2150_v23, 1 }
 0x103   : > { %573 = vrot.lane.b32.xlu1 %v2908_v26, %s2177_s19  ;;  %v591_v26 = vsel %vm503_vm0, %v3581_v17, %v590_v51  ;;  %v850_v17 = vrot.slane %v3184_v31, 2 }
 0x104   : > { %v3143_v61 = vpop.permute.xlu0 %732  ;;  %v593_v22 = vsel %vm503_vm0, %v590_v51, %v592_v10  ;;  %v799_v51 = vrot.slane %v2151_v5, 2  ;;  %v970_v10 = vshll.u32 %v3184_v31, 16  ;;  %v3587_v5 = vrot.slane %v2299_v63, 2 }
 0x105   : > { %v3148_v29 = vpop.permute.xlu1 %748  ;;  %v851_v25 = vsel %vm763_vm1, %v2956_v56, %v850_v17 }
 0x106   : > { %559 = vrot.lane.b32.xlu0 %v524_v62, %s2177_s19  ;;  %v784_v48 = vsel %vm763_vm1, %v3587_v5, %v3586_v27  ;;  %v800_v49 = vsel %vm763_vm1, %v2956_v56, %v799_v51 }
 0x107   : > { %575 = vrot.lane.b32.xlu1 %v540_v19, %s2177_s19  ;;  %v2153_v19 = vld [vmem:[%s2219_s17 + $0xa0] ss:$0 sps:$4 sm:$0x33]  }
 0x108   : > { %v3156_v58 = vpop.permute.xlu0 %734  ;;  %v852_v21 = vrot.slane %v2153_v19, 2 }
 0x109   : > { %v3162_v8 = vpop.permute.xlu1 %750 }
 0x10a   : > { %610 = vrot.lane.b32.xlu0 %v524_v62, %s2176_s18 }
 0x10b   : > { %626 = vrot.lane.b32.xlu1 %v591_v26, %s2176_s18  ;;  %v967_v26 = vshrl.u32 %v3184_v31, 16 }
 0x10c   : > { %v810_v2 = vpop.permute.xlu0 %809 }
 0x10d   : > { %v826_v6 = vpop.permute.xlu1 %825  ;;  %v969_v63 = vrot.slane %v967_v26, 2 }
 0x10e   : > { %612 = vrot.lane.b32.xlu0 %v3582_v20, %s2176_s18  ;;  %v3588_v20 = vld [vmem:[#allocation4_spill] sm:$0xff] }
 0x10f   : > { %628 = vrot.lane.b32.xlu1 %v593_v22, %s2176_s18  ;;  %v972_v22 = vrot.slane %v970_v10, 3  ;;  %v934_v56 = vrot.slane %v3588_v20, 2 }
 0x110   : > { %v3172_v57 = vpop.permute.xlu0 %811 }
 0x111   : > { %v3176_v13 = vpop.permute.xlu1 %827 }
 0x112   : > { %740 = vrot.lane.b32.xlu0 %v677_v50, %s2180_s24  ;;  %v935_v50 = vrot.slane %v3589_v55, 3 }
 0x113   : > { %756 = vrot.lane.b32.xlu1 %v714_v32, %s2180_s24 }
 0x114   : > { %v863_v60 = vpop.permute.xlu0 %862 }
 0x115   : > { %v879_v34 = vpop.permute.xlu1 %878 }
 0x116   : > { %742 = vrot.lane.b32.xlu0 %v681_v54, %s2180_s24 }
 0x117   : > { %758 = vrot.lane.b32.xlu1 %v723_v44, %s2180_s24 }
 0x118   : > { %v3188_v62 = vpop.permute.xlu0 %864 }
 0x119   : > { %v3190_v23 = vpop.permute.xlu1 %880 }
 0x11a   : > { %817 = vrot.lane.b32.xlu0 %v2990_v30, %s2178_s20  ;;  %v3208_v30 = vld [vmem:[%s2219_s17 + $0xa0] ss:$0 sps:$4 sm:$0x77]  }
 0x11b   : > { %833 = vrot.lane.b32.xlu1 %v2985_v45, %s2178_s20  ;;  %v1107_v45 = vsel %vm1097_vm6, %v2157_v35, %v3032_v53  ;;  %v1160_v53 = vsel %vm1134_vm7, %v1123_v12, %v3100_v1  ;;  %v976_v52 = vshrl.u32 %v3208_v30, 16  ;;  %v979_v4 = vshll.u32 %v3208_v30, 16  ;;  %v2161_v12 = vld [vmem:[%s2219_s17 + $0x58] sm:$0xff]  }
 0x11c   : > { %v993_v11 = vpop.permute.xlu0 %992  ;;  %v1144_v24 = vsel %vm1134_vm7, %v1107_v45, %v3096_v0  ;;  %v1197_v0 = vsel %vm1171_vm8, %v1160_v53, %v3124_v43  ;;  %v973_v43 = vor.u32 %v972_v22, %v969_v63 }
 0x11d   : > { %v1009_v41 = vpop.permute.xlu1 %1008  ;;  %v1181_v47 = vsel %vm1171_vm8, %v1144_v24, %v3121_v14  ;;  %v1234_v44 = vsel %vm1208_vm9, %v1197_v0, %v3148_v29  ;;  %v853_v14 = vsel %vm763_vm1, %v850_v17, %v852_v21  ;;  %v981_v27 = vrot.slane %v979_v4, 3  ;;  %v3592_v4 = vld [vmem:[#allocation3_spill] sm:$0xff] }
 0x11e   : > { %819 = vrot.lane.b32.xlu0 %v784_v48, %s2178_s20  ;;  %v1218_v16 = vsel %vm1208_vm9, %v1181_v47, %v3143_v61  ;;  %v1271_v51 = vsel %vm1245_vm10, %v1234_v44, %v826_v6  ;;  %v936_v61 = vor.u32 %v935_v50, %v934_v56  ;;  %v2159_v6 = vld [vmem:[%s2219_s17 + $0x28] sm:$0xff]   ;;  %v1041_v24 = vrot.slane %v2161_v12, 3 }
 0x11f   : > { %835 = vrot.lane.b32.xlu1 %v800_v49, %s2178_s20  ;;  %v1255_v1 = vsel %vm1245_vm10, %v1218_v16, %v810_v2  ;;  %v1308_v26 = vsel %vm1282_vm11, %v1271_v51, %v879_v34  ;;  %v978_v2 = vrot.slane %v976_v52, 2  ;;  %v2160_v34 = vld [vmem:[%s2219_s17 + $0x68] sm:$0xff]   ;;  %v3593_v0 = vrot.slane %v3592_v4, 3 }
 0x120   : > { %v995_v32 = vpop.permute.xlu0 %994  ;;  %v1292_v19 = vsel %vm1282_vm11, %v1255_v1, %v863_v60  ;;  %v1345_v5 = vsel %vm1319_vm12, %v1308_v26, %v1009_v41  ;;  %v1109_v60 = vsel %vm1097_vm6, %v2159_v6, %v3077_v40  ;;  %v937_v40 = vsel %vm893_vm4, %v3026_v39, %v936_v61 }
 0x121   : > { %v1011_v54 = vpop.permute.xlu1 %1010  ;;  %v1329_v29 = vsel %vm1319_vm12, %v1292_v19, %v993_v11  ;;  %v1125_v11 = vsel %vm1097_vm6, %v2160_v34, %v3087_v18  ;;  %v1146_v41 = vsel %vm1134_vm7, %v1109_v60, %v3108_v38  ;;  %v974_v18 = vsel %vm893_vm4, %v3036_v15, %v973_v43  ;;  %v2163_v34 = vld [vmem:[%s2219_s17 + $0x70] sm:$0xff]  }
 0x122   : > { %870 = vrot.lane.b32.xlu0 %v784_v48, %s2181_s25  ;;  %v1162_v35 = vsel %vm1134_vm7, %v1125_v11, %v3114_v59  ;;  %v1183_v45 = vsel %vm1171_vm8, %v1146_v41, %v3128_v3  ;;  %v982_v38 = vor.u32 %v981_v27, %v978_v2  ;;  %v1044_v16 = vsel %vm1023_vm5, %v1041_v24, %v3593_v0 }
 0x123   : > { %886 = vrot.lane.b32.xlu1 %v851_v25, %s2181_s25  ;;  %v3590_v25 = vld [vmem:[#allocation7_spill] sm:$0xff]  ;;  %v1199_v63 = vsel %vm1171_vm8, %v1162_v35, %v3130_v9  ;;  %v1220_v22 = vsel %vm1208_vm9, %v1183_v45, %v3156_v58  ;;  %v3591_v9 = vld [vmem:[#allocation8_spill] sm:$0xff] }
 0x124   : > { %v1070_v10 = vpop.permute.xlu0 %1069  ;;  %v1236_v46 = vsel %vm1208_vm9, %v1199_v63, %v3162_v8  ;;  %v1257_v59 = vsel %vm1245_vm10, %v1220_v22, %v3172_v57  ;;  %v941_v58 = vsel %vm893_vm4, %v936_v61, %v3591_v9  ;;  %v983_v56 = vsel %vm893_vm4, %v973_v43, %v982_v38 }
 0x125   : > { %v1086_v48 = vpop.permute.xlu1 %1085  ;;  %v1366_v17 = vsel %vm1356_vm13, %v1329_v29, %v1070_v10  ;;  %v1273_v3 = vsel %vm1245_vm10, %v1236_v46, %v3176_v13  ;;  %v1294_v15 = vsel %vm1282_vm11, %v1257_v59, %v3188_v62  ;;  %v1057_v13 = vrot.slane %v3184_v31, 3 }
 0x126   : > { %v1382_v49 = vsel %vm1356_vm13, %v1345_v5, %v1086_v48  ;;  %872 = vrot.lane.b32.xlu0 %v3590_v25, %s2181_s25  ;;  %2072 = vmatprep.mubr.msk.bf16.mxu0 %vm1415_vm14, %v1366_v17  ;;  %v1310_v8 = vsel %vm1282_vm11, %v1273_v3, %v3190_v23  ;;  %v1331_v57 = vsel %vm1319_vm12, %v1294_v15, %v995_v32  ;;  %v1059_v32 = vrot.slane %v3208_v30, 3 }
 0x127   : > { %888 = vrot.lane.b32.xlu1 %v853_v14, %s2181_s25  ;;  %2088 = vmatprep.mubr.msk.bf16.mxu1 %vm1415_vm14, %v1382_v49  ;;  %v1347_v55 = vsel %vm1319_vm12, %v1310_v8, %v1011_v54  ;;  %v1042_v23 = vsel %vm1023_vm5, %v1039_v33, %v1041_v24  ;;  %v1058_v47 = vsel %vm1023_vm5, %v1055_v7, %v1057_v13  ;;  %v2162_v49 = vld [vmem:[%s2219_s17 + $0x30] sm:$0xff]   ;;  %v2164_v24 = vld [vmem:[%s2219_s17 + $0x38] sm:$0xff]  }
 0x128   : > { %v3266_v21 = vpop.permute.xlu0 %476  ;;  %v1060_v28 = vsel %vm1023_vm5, %v1057_v13, %v1059_v32 }
 0x129   : > { %v493_v39 = vpop.permute.xlu1 %492  ;;  %v1111_v25 = vsel %vm1097_vm6, %v2162_v49, %v3266_v21 }
 0x12a   : > { %1000 = vrot.lane.b32.xlu0 %v937_v40, %s2182_s26  ;;  %v1127_v11 = vsel %vm1097_vm6, %v2163_v34, %v493_v39 }
 0x12b   : > { %1016 = vrot.lane.b32.xlu1 %v974_v18, %s2182_s26 }
 0x12c   : > { %v1072_v20 = vpop.permute.xlu0 %1071 }
 0x12d   : > { %v1088_v62 = vpop.permute.xlu1 %1087  ;;  %v1368_v50 = vsel %vm1356_vm13, %v1331_v57, %v1072_v20  ;;  %v2165_v20 = vld [vmem:[%s2219_s17 + $0x78] sm:$0xff]  }
 0x12e   : > { %v1384_v53 = vsel %vm1356_vm13, %v1347_v55, %v1088_v62  ;;  %1002 = vrot.lane.b32.xlu0 %v941_v58, %s2182_s26  ;;  %2073 = vmatmul.mubr.msk.bf16.gmra.mrb[8].mxu0 %vm1415_vm14, %v1368_v50 }
 0x12f   : > { %1018 = vrot.lane.b32.xlu1 %v983_v56, %s2182_s26  ;;  %2089 = vmatmul.mubr.msk.bf16.gmra.mrb[4].mxu1 %vm1415_vm14, %v1384_v53 }
 0x130   : > { %v479_v31 = vpop.permute.xlu0 %478 }
 0x131   : > { %v495_v52 = vpop.permute.xlu1 %494  ;;  %v1113_v8 = vsel %vm1097_vm6, %v2164_v24, %v479_v31 }
 0x132   : > { %1077 = vrot.lane.b32.xlu0 %v1042_v23, %s2183_s27  ;;  %v1129_v56 = vsel %vm1097_vm6, %v2165_v20, %v495_v52 }
 0x133   : > { %1093 = vrot.lane.b32.xlu1 %v1058_v47, %s2183_s27 }
 0x134   : > { %v554_v54 = vpop.permute.xlu0 %553 }
 0x135   : > { %v570_v33 = vpop.permute.xlu1 %569  ;;  %v1148_v41 = vsel %vm1134_vm7, %v1111_v25, %v554_v54 }
 0x136   : > { %1079 = vrot.lane.b32.xlu0 %v1044_v16, %s2183_s27  ;;  %v1164_v40 = vsel %vm1134_vm7, %v1127_v11, %v570_v33 }
 0x137   : > { %1095 = vrot.lane.b32.xlu1 %v1060_v28, %s2183_s27 }
 0x138   : > { %v556_v36 = vpop.permute.xlu0 %555 }
 0x139   : > { %v572_v7 = vpop.permute.xlu1 %571  ;;  %v1150_v13 = vsel %vm1134_vm7, %v1113_v8, %v556_v36 }
 0x13a   : > { %v1166_v55 = vsel %vm1134_vm7, %v1129_v56, %v572_v7  ;;  %v2167_v56 = vld [vmem:[%s2219_s17 + $0x80] sm:$0xff]  }
 0x13c   : > { %v607_v30 = vpop.permute.xlu0 %606 }
 0x13d   : > { %v623_v44 = vpop.permute.xlu1 %622  ;;  %v1185_v35 = vsel %vm1171_vm8, %v1148_v41, %v607_v30 }
 0x13e   : > { %v1201_v18 = vsel %vm1171_vm8, %v1164_v40, %v623_v44 }
 0x140   : > { %v609_v1 = vpop.permute.xlu0 %608 }
 0x141   : > { %v625_v14 = vpop.permute.xlu1 %624  ;;  %v1187_v62 = vsel %vm1171_vm8, %v1150_v13, %v609_v1 }
 0x142   : > { %v1203_v53 = vsel %vm1171_vm8, %v1166_v55, %v625_v14 }
 0x144   : > { %v737_v51 = vpop.permute.xlu0 %736 }
 0x145   : > { %v753_v19 = vpop.permute.xlu1 %752  ;;  %v1222_v38 = vsel %vm1208_vm9, %v1185_v35, %v737_v51 }
 0x146   : > { %v1238_v22 = vsel %vm1208_vm9, %v1201_v18, %v753_v19 }
 0x148   : > { %v739_v43 = vpop.permute.xlu0 %738 }
 0x149   : > { %v755_v61 = vpop.permute.xlu1 %754  ;;  %v1224_v23 = vsel %vm1208_vm9, %v1187_v62, %v739_v43 }
 0x14a   : > { %v1240_v47 = vsel %vm1208_vm9, %v1203_v53, %v755_v61 }
 0x14c   : > { %v814_v26 = vpop.permute.xlu0 %813 }
 0x14d   : > { %v830_v29 = vpop.permute.xlu1 %829  ;;  %v1259_v21 = vsel %vm1245_vm10, %v1222_v38, %v814_v26 }
 0x14e   : > { %v1275_v39 = vsel %vm1245_vm10, %v1238_v22, %v830_v29  ;;  %v3362_v29 = vld [vmem:[%s3525_s2] ss:$0 sm:$0xff] }
 0x150   : > { %v816_v10 = vpop.permute.xlu0 %815 }
 0x151   : > { %v832_v2 = vpop.permute.xlu1 %831  ;;  %v1261_v32 = vsel %vm1245_vm10, %v1224_v23, %v816_v10 }
 0x152   : > { %v1277_v52 = vsel %vm1245_vm10, %v1240_v47, %v832_v2 }
 0x154   : > { %v867_v27 = vpop.permute.xlu0 %866 }
 0x155   : > { %v883_v5 = vpop.permute.xlu1 %882  ;;  %v1296_v46 = vsel %vm1282_vm11, %v1259_v21, %v867_v27 }
 0x156   : > { %v1312_v59 = vsel %vm1282_vm11, %v1275_v39, %v883_v5 }
 0x158   : > { %v869_v48 = vpop.permute.xlu0 %868 }
 0x159   : > { %v885_v17 = vpop.permute.xlu1 %884  ;;  %v1298_v4 = vsel %vm1282_vm11, %v1261_v32, %v869_v48 }
 0x15a   : > { %v1314_v0 = vsel %vm1282_vm11, %v1277_v52, %v885_v17 }
 0x15c   : > { %v997_v6 = vpop.permute.xlu0 %996 }
 0x15d   : > { %v1013_v60 = vpop.permute.xlu1 %1012  ;;  %v1333_v3 = vsel %vm1319_vm12, %v1296_v46, %v997_v6 }
 0x15e   : > { %v1349_v9 = vsel %vm1319_vm12, %v1312_v59, %v1013_v60 }
 0x160   : > { %v999_v45 = vpop.permute.xlu0 %998 }
 0x161   : > { %v1015_v63 = vpop.permute.xlu1 %1014  ;;  %v1335_v16 = vsel %vm1319_vm12, %v1298_v4, %v999_v45 }
 0x162   : > { %v1351_v28 = vsel %vm1319_vm12, %v1314_v0, %v1015_v63 }
 0x164   : > { %v1074_v15 = vpop.permute.xlu0 %1073 }
 0x165   : > { %v1090_v58 = vpop.permute.xlu1 %1089  ;;  %v1370_v12 = vsel %vm1356_vm13, %v1333_v3, %v1074_v15 }
 0x166   : > { %v1386_v57 = vsel %vm1356_vm13, %v1349_v9, %v1090_v58  ;;  %2076 = vmatprep.mubr.msk.bf16.mxu0 %vm1415_vm14, %v1370_v12 }
 0x167   : > { %2092 = vmatprep.mubr.msk.bf16.mxu1 %vm1415_vm14, %v1386_v57  ;;  %v2166_v57 = vld [vmem:[%s2219_s17 + $0x40] sm:$0xff]  }
 0x168   : > { %v3342_v50 = vpop.permute.xlu0 %480 }
 0x169   : > { %v3346_v31 = vpop.permute.xlu1 %496  ;;  %v1115_v20 = vsel %vm1097_vm6, %v2166_v57, %v3342_v50 }
 0x16a   : > { %v1131_v13 = vsel %vm1097_vm6, %v2167_v56, %v3346_v31 }
 0x16c   : > { %v1076_v54 = vpop.permute.xlu0 %1075 }
 0x16d   : > { %v1092_v33 = vpop.permute.xlu1 %1091  ;;  %v1372_v36 = vsel %vm1356_vm13, %v1335_v16, %v1076_v54 }
 0x16e   : > { %v1388_v7 = vsel %vm1356_vm13, %v1351_v28, %v1092_v33  ;;  %2077 = vmatmul.mubr.msk.bf16.gmra.mrb[12].mxu0 %vm1415_vm14, %v1372_v36 }
 0x16f   : > { %2093 = vmatmul.mubr.msk.bf16.gmra.mrb[8].mxu1 %vm1415_vm14, %v1388_v7 }
 0x170   : > { %v483_v30 = vpop.permute.xlu0 %482 }
 0x171   : > { %v499_v44 = vpop.permute.xlu1 %498  ;;  %v1117_v4 = vsel %vm1097_vm6, %v2857_v42, %v483_v30 }
 0x172   : > { %v1133_v31 = vsel %vm1097_vm6, %v2854_v37, %v499_v44 }
 0x174   : > { %v558_v1 = vpop.permute.xlu0 %557 }
 0x175   : > { %v574_v14 = vpop.permute.xlu1 %573  ;;  %v1152_v55 = vsel %vm1134_vm7, %v1115_v20, %v558_v1 }
 0x176   : > { %v1168_v62 = vsel %vm1134_vm7, %v1131_v13, %v574_v14 }
 0x178   : > { %v560_v51 = vpop.permute.xlu0 %559 }
 0x179   : > { %v576_v19 = vpop.permute.xlu1 %575  ;;  %v1154_v16 = vsel %vm1134_vm7, %v1117_v4, %v560_v51 }
 0x17a   : > { %v1170_v33 = vsel %vm1134_vm7, %v1133_v31, %v576_v19 }
 0x17c   : > { %v611_v43 = vpop.permute.xlu0 %610 }
 0x17d   : > { %v627_v61 = vpop.permute.xlu1 %626  ;;  %v1189_v53 = vsel %vm1171_vm8, %v1152_v55, %v611_v43 }
 0x17e   : > { %v1205_v47 = vsel %vm1171_vm8, %v1168_v62, %v627_v61 }
 0x180   : > { %v613_v26 = vpop.permute.xlu0 %612 }
 0x181   : > { %v629_v10 = vpop.permute.xlu1 %628  ;;  %v1191_v36 = vsel %vm1171_vm8, %v1154_v16, %v613_v26 }
 0x182   : > { %v2066_v2 = vpop.f32.mrb[0].mxu0  ;;  %v1207_v1 = vsel %vm1171_vm8, %v1170_v33, %v629_v10 }
 0x183   : > { %v1502_v27 = vadd.f32 %v2066_v2, %v3362_v29  ;;  %v1493_v5 = vpop.f32.mrb[1].mxu0 }
 0x184   : > { %v1494_v48 = vadd.f32 %v3362_v29, %v1493_v5  ;;  %v2067_v17 = vpop.f32.mrb[2].mxu0  ;;  %v741_v6 = vpop.permute.xlu0 %740 }
 0x185   : > { %v1638_v60 = vmax.f32 %v1502_v27, 0.0  ;;  %v1505_v49 = vadd.f32 %v2067_v17, %v3362_v29  ;;  %v757_v25 = vpop.permute.xlu1 %756  ;;  %v1496_v34 = vpop.f32.mrb[3].mxu0  ;;  %v1226_v32 = vsel %vm1208_vm9, %v1189_v53, %v741_v6 }
 0x186   : > { %v1636_v11 = vmax.f32 %v1494_v48, 0.0  ;;  %v1497_v41 = vadd.f32 %v3362_v29, %v1496_v34  ;;  %v1242_v50 = vsel %vm1208_vm9, %v1205_v47, %v757_v25 }
 0x187   : > { %v2006_v40 = vpack.c.bf16 %v1638_v60, %v1638_v60  ;;  %v1639_v35 = vmax.f32 %v1505_v49, 0.0 }
 0x188   : > { %v2004_v45 = vpack.c.bf16 %v1636_v11, %v1636_v11  ;;  %v1637_v18 = vmax.f32 %v1497_v41, 0.0  ;;  %v743_v38 = vpop.permute.xlu0 %742 }
 0x189   : > { %1819 = vst.msk [vmem:[%s3371_s8 + $0x8] sm:$0xf] %vm1816_vm15, %v2006_v40  ;;  %v2007_v63 = vpack.c.bf16 %v1639_v35, %v1639_v35  ;;  %v759_v22 = vpop.permute.xlu1 %758  ;;  %v1228_v14 = vsel %vm1208_vm9, %v1191_v36, %v743_v38 }
 0x18a   : > { %1817 = vst.msk [vmem:[%s3371_s8] sm:$0xf] %vm1816_vm15, %v2004_v45  ;;  %v2005_v21 = vpack.c.bf16 %v1637_v18, %v1637_v18  ;;  %v1244_v43 = vsel %vm1208_vm9, %v1207_v1, %v759_v22 }
 0x18b   : > { %1820 = vst.msk [vmem:[%s3371_s8 + $0xc] sm:$0xf] %vm1816_vm15, %v2007_v63 }
 0x18c   : > { %1818 = vst.msk [vmem:[%s3371_s8 + $0x4] sm:$0xf] %vm1816_vm15, %v2005_v21  ;;  %v818_v39 = vpop.permute.xlu0 %817 }
 0x18d   : > { %v834_v46 = vpop.permute.xlu1 %833  ;;  %v1263_v0 = vsel %vm1245_vm10, %v1226_v32, %v818_v39 }
 0x18e   : > { %v1279_v54 = vsel %vm1245_vm10, %v1242_v50, %v834_v46 }
 0x190   : > { %v820_v59 = vpop.permute.xlu0 %819 }
 0x191   : > { %v836_v3 = vpop.permute.xlu1 %835  ;;  %v1265_v19 = vsel %vm1245_vm10, %v1228_v14, %v820_v59 }
 0x192   : > { %v1281_v26 = vsel %vm1245_vm10, %v1244_v43, %v836_v3 }
 0x194   : > { %v871_v15 = vpop.permute.xlu0 %870 }
 0x195   : > { %v887_v9 = vpop.permute.xlu1 %886  ;;  %v1300_v28 = vsel %vm1282_vm11, %v1263_v0, %v871_v15 }
 0x196   : > { %v1316_v7 = vsel %vm1282_vm11, %v1279_v54, %v887_v9 }
 0x198   : > { %v873_v58 = vpop.permute.xlu0 %872 }
 0x199   : > { %v889_v12 = vpop.permute.xlu1 %888  ;;  %v1302_v2 = vsel %vm1282_vm11, %v1265_v19, %v873_v58 }
 0x19a   : > { %v1318_v10 = vsel %vm1282_vm11, %v1281_v26, %v889_v12 }
 0x19c   : > { %v1001_v24 = vpop.permute.xlu0 %1000 }
 0x19d   : > { %v1017_v8 = vpop.permute.xlu1 %1016  ;;  %v1337_v42 = vsel %vm1319_vm12, %v1300_v28, %v1001_v24 }
 0x19e   : > { %v1353_v37 = vsel %vm1319_vm12, %v1316_v7, %v1017_v8 }
 0x1a0   : > { %v1003_v23 = vpop.permute.xlu0 %1002 }
 0x1a1   : > { %v1019_v52 = vpop.permute.xlu1 %1018  ;;  %v1339_v27 = vsel %vm1319_vm12, %v1302_v2, %v1003_v23 }
 0x1a2   : > { %v1355_v48 = vsel %vm1319_vm12, %v1318_v10, %v1019_v52 }
 0x1a4   : > { %v1078_v30 = vpop.permute.xlu0 %1077 }
 0x1a5   : > { %v1094_v44 = vpop.permute.xlu1 %1093  ;;  %v1374_v51 = vsel %vm1356_vm13, %v1337_v42, %v1078_v30 }
 0x1a6   : > { %v1390_v61 = vsel %vm1356_vm13, %v1353_v37, %v1094_v44  ;;  %2080 = vmatprep.mubr.msk.bf16.mxu0 %vm1415_vm14, %v1374_v51 }
 0x1a7   : > { %2096 = vmatprep.mubr.msk.bf16.mxu1 %vm1415_vm14, %v1390_v61 }
 0x1a8   : > { %v1080_v5 = vpop.permute.xlu0 %1079 }
 0x1a9   : > { %v1096_v17 = vpop.permute.xlu1 %1095  ;;  %v1376_v6 = vsel %vm1356_vm13, %v1339_v27, %v1080_v5 }
 0x1aa   : > { %v1392_v60 = vsel %vm1356_vm13, %v1355_v48, %v1096_v17  ;;  %2081 = vmatmul.mubr.msk.bf16.gmra.mrb[16].mxu0 %vm1415_vm14, %v1376_v6 }
 0x1ab   : > { %2097 = vmatmul.mubr.msk.bf16.gmra.mrb[12].mxu1 %vm1415_vm14, %v1392_v60 }
 0x1c1   : > { %v2070_v49 = vpop.f32.mrb[4].mxu0 }
 0x1c2   : > { %v1518_v25 = vadd.f32 %v2070_v49, %v3362_v29  ;;  %v2086_v34 = vpop.f32.mrb[0].mxu1  ;;  %v1509_v11 = vpop.f32.mrb[5].mxu0 }
 0x1c3   : > { %v1582_v41 = vadd.f32 %v2086_v34, %v3362_v29  ;;  %v1510_v40 = vadd.f32 %v3362_v29, %v1509_v11  ;;  %v1573_v35 = vpop.f32.mrb[1].mxu1  ;;  %v2071_v45 = vpop.f32.mrb[6].mxu0 }
 0x1c4   : > { %v1642_v18 = vmax.f32 %v1518_v25, 0.0  ;;  %v1574_v38 = vadd.f32 %v3362_v29, %v1573_v35  ;;  %v1521_v63 = vadd.f32 %v2071_v45, %v3362_v29  ;;  %v2087_v22 = vpop.f32.mrb[2].mxu1  ;;  %v1512_v21 = vpop.f32.mrb[7].mxu0 }
 0x1c5   : > { %v1658_v39 = vmax.f32 %v1582_v41, 0.0  ;;  %v1640_v46 = vmax.f32 %v1510_v40, 0.0  ;;  %v1585_v59 = vadd.f32 %v2087_v22, %v3362_v29  ;;  %v1513_v3 = vadd.f32 %v3362_v29, %v1512_v21  ;;  %v1576_v15 = vpop.f32.mrb[3].mxu1 }
 0x1c6   : > { %v2010_v9 = vpack.c.bf16 %v1642_v18, %v1642_v18  ;;  %v1656_v58 = vmax.f32 %v1574_v38, 0.0  ;;  %v1643_v12 = vmax.f32 %v1521_v63, 0.0  ;;  %v1577_v24 = vadd.f32 %v3362_v29, %v1576_v15 }
 0x1c7   : > { %v2026_v8 = vpack.c.bf16 %v1658_v39, %v1658_v39  ;;  %v2008_v57 = vpack.c.bf16 %v1640_v46, %v1640_v46  ;;  %v1659_v20 = vmax.f32 %v1585_v59, 0.0  ;;  %v1641_v56 = vmax.f32 %v1513_v3, 0.0 }
 0x1c8   : > { %1823 = vst.msk [vmem:[%s3371_s8 + $0x18] sm:$0xf] %vm1816_vm15, %v2010_v9  ;;  %v2024_v13 = vpack.c.bf16 %v1656_v58, %v1656_v58  ;;  %v2011_v55 = vpack.c.bf16 %v1643_v12, %v1643_v12  ;;  %v1657_v62 = vmax.f32 %v1577_v24, 0.0 }
 0x1c9   : > { %1839 = vst.msk [vmem:[%s3371_s8 + $0x58] sm:$0xf] %vm1816_vm15, %v2026_v8  ;;  %1821 = vst.msk [vmem:[%s3371_s8 + $0x10] sm:$0xf] %vm1816_vm15, %v2008_v57  ;;  %v2027_v53 = vpack.c.bf16 %v1659_v20, %v1659_v20  ;;  %v2009_v23 = vpack.c.bf16 %v1641_v56, %v1641_v56 }
 0x1ca   : > { %1837 = vst.msk [vmem:[%s3371_s8 + $0x50] sm:$0xf] %vm1816_vm15, %v2024_v13  ;;  %1824 = vst.msk [vmem:[%s3371_s8 + $0x1c] sm:$0xf] %vm1816_vm15, %v2011_v55  ;;  %v2025_v47 = vpack.c.bf16 %v1657_v62, %v1657_v62 }
 0x1cb   : > { %1840 = vst.msk [vmem:[%s3371_s8 + $0x5c] sm:$0xf] %vm1816_vm15, %v2027_v53  ;;  %1822 = vst.msk [vmem:[%s3371_s8 + $0x14] sm:$0xf] %vm1816_vm15, %v2009_v23 }
 0x1cc   : > { %1838 = vst.msk [vmem:[%s3371_s8 + $0x54] sm:$0xf] %vm1816_vm15, %v2025_v47 }
 0x201   : > { %v2074_v32 = vpop.f32.mrb[8].mxu0 }
 0x202   : > { %v1534_v52 = vadd.f32 %v2074_v32, %v3362_v29  ;;  %v2090_v4 = vpop.f32.mrb[4].mxu1  ;;  %v1525_v50 = vpop.f32.mrb[9].mxu0 }
 0x203   : > { %v1598_v0 = vadd.f32 %v2090_v4, %v3362_v29  ;;  %v1526_v31 = vadd.f32 %v3362_v29, %v1525_v50  ;;  %v1589_v16 = vpop.f32.mrb[5].mxu1  ;;  %v2075_v54 = vpop.f32.mrb[10].mxu0 }
 0x204   : > { %v1646_v28 = vmax.f32 %v1534_v52, 0.0  ;;  %v1590_v33 = vadd.f32 %v3362_v29, %v1589_v16  ;;  %v1537_v36 = vadd.f32 %v2075_v54, %v3362_v29  ;;  %v2091_v7 = vpop.f32.mrb[6].mxu1  ;;  %v1528_v42 = vpop.f32.mrb[11].mxu0 }
 0x205   : > { %v1662_v30 = vmax.f32 %v1598_v0, 0.0  ;;  %v1644_v1 = vmax.f32 %v1526_v31, 0.0  ;;  %v1601_v14 = vadd.f32 %v2091_v7, %v3362_v29  ;;  %v1529_v37 = vadd.f32 %v3362_v29, %v1528_v42  ;;  %v1592_v44 = vpop.f32.mrb[7].mxu1 }
 0x206   : > { %v2014_v51 = vpack.c.bf16 %v1646_v28, %v1646_v28  ;;  %v1660_v43 = vmax.f32 %v1590_v33, 0.0  ;;  %v1647_v19 = vmax.f32 %v1537_v36, 0.0  ;;  %v1593_v61 = vadd.f32 %v3362_v29, %v1592_v44 }
 0x207   : > { %v2030_v26 = vpack.c.bf16 %v1662_v30, %v1662_v30  ;;  %v2012_v2 = vpack.c.bf16 %v1644_v1, %v1644_v1  ;;  %v1663_v10 = vmax.f32 %v1601_v14, 0.0  ;;  %v1645_v27 = vmax.f32 %v1529_v37, 0.0 }
 0x208   : > { %1827 = vst.msk [vmem:[%s3371_s8 + $0x28] sm:$0xf] %vm1816_vm15, %v2014_v51  ;;  %v2028_v5 = vpack.c.bf16 %v1660_v43, %v1660_v43  ;;  %v2015_v48 = vpack.c.bf16 %v1647_v19, %v1647_v19  ;;  %v1661_v17 = vmax.f32 %v1593_v61, 0.0 }
 0x209   : > { %1843 = vst.msk [vmem:[%s3371_s8 + $0x68] sm:$0xf] %vm1816_vm15, %v2030_v26  ;;  %1825 = vst.msk [vmem:[%s3371_s8 + $0x20] sm:$0xf] %vm1816_vm15, %v2012_v2  ;;  %v2031_v6 = vpack.c.bf16 %v1663_v10, %v1663_v10  ;;  %v2013_v60 = vpack.c.bf16 %v1645_v27, %v1645_v27 }
 0x20a   : > { %1841 = vst.msk [vmem:[%s3371_s8 + $0x60] sm:$0xf] %vm1816_vm15, %v2028_v5  ;;  %1828 = vst.msk [vmem:[%s3371_s8 + $0x2c] sm:$0xf] %vm1816_vm15, %v2015_v48  ;;  %v2029_v49 = vpack.c.bf16 %v1661_v17, %v1661_v17 }
 0x20b   : > { %1844 = vst.msk [vmem:[%s3371_s8 + $0x6c] sm:$0xf] %vm1816_vm15, %v2031_v6  ;;  %1826 = vst.msk [vmem:[%s3371_s8 + $0x24] sm:$0xf] %vm1816_vm15, %v2013_v60 }
 0x20c   : > { %1842 = vst.msk [vmem:[%s3371_s8 + $0x64] sm:$0xf] %vm1816_vm15, %v2029_v49 }
 0x241   : > { %v2078_v25 = vpop.f32.mrb[12].mxu0 }
 0x242   : > { %v1550_v34 = vadd.f32 %v2078_v25, %v3362_v29  ;;  %v2094_v11 = vpop.f32.mrb[8].mxu1  ;;  %v1541_v41 = vpop.f32.mrb[13].mxu0 }
 0x243   : > { %v1614_v40 = vadd.f32 %v2094_v11, %v3362_v29  ;;  %v1542_v35 = vadd.f32 %v3362_v29, %v1541_v41  ;;  %v1605_v45 = vpop.f32.mrb[9].mxu1  ;;  %v2079_v18 = vpop.f32.mrb[14].mxu0 }
 0x244   : > { %v1650_v38 = vmax.f32 %v1550_v34, 0.0  ;;  %v1606_v63 = vadd.f32 %v3362_v29, %v1605_v45  ;;  %v1553_v22 = vadd.f32 %v2079_v18, %v3362_v29  ;;  %v2095_v21 = vpop.f32.mrb[10].mxu1  ;;  %v1544_v39 = vpop.f32.mrb[15].mxu0 }
 0x245   : > { %v1666_v46 = vmax.f32 %v1614_v40, 0.0  ;;  %v1648_v59 = vmax.f32 %v1542_v35, 0.0  ;;  %v1617_v3 = vadd.f32 %v2095_v21, %v3362_v29  ;;  %v1545_v15 = vadd.f32 %v3362_v29, %v1544_v39  ;;  %v1608_v9 = vpop.f32.mrb[11].mxu1 }
 0x246   : > { %v2018_v58 = vpack.c.bf16 %v1650_v38, %v1650_v38  ;;  %v1664_v12 = vmax.f32 %v1606_v63, 0.0  ;;  %v1651_v24 = vmax.f32 %v1553_v22, 0.0  ;;  %v1609_v8 = vadd.f32 %v3362_v29, %v1608_v9 }
 0x247   : > { %v2034_v57 = vpack.c.bf16 %v1666_v46, %v1666_v46  ;;  %v2016_v20 = vpack.c.bf16 %v1648_v59, %v1648_v59  ;;  %v1667_v56 = vmax.f32 %v1617_v3, 0.0  ;;  %v1649_v13 = vmax.f32 %v1545_v15, 0.0 }
 0x248   : > { %1831 = vst.msk [vmem:[%s3371_s8 + $0x38] sm:$0xf] %vm1816_vm15, %v2018_v58  ;;  %v2032_v55 = vpack.c.bf16 %v1664_v12, %v1664_v12  ;;  %v2019_v62 = vpack.c.bf16 %v1651_v24, %v1651_v24  ;;  %v1665_v53 = vmax.f32 %v1609_v8, 0.0 }
 0x249   : > { %1847 = vst.msk [vmem:[%s3371_s8 + $0x78] sm:$0xf] %vm1816_vm15, %v2034_v57  ;;  %1829 = vst.msk [vmem:[%s3371_s8 + $0x30] sm:$0xf] %vm1816_vm15, %v2016_v20  ;;  %v2035_v23 = vpack.c.bf16 %v1667_v56, %v1667_v56  ;;  %v2017_v47 = vpack.c.bf16 %v1649_v13, %v1649_v13 }
 0x24a   : > { %1845 = vst.msk [vmem:[%s3371_s8 + $0x70] sm:$0xf] %vm1816_vm15, %v2032_v55  ;;  %1832 = vst.msk [vmem:[%s3371_s8 + $0x3c] sm:$0xf] %vm1816_vm15, %v2019_v62  ;;  %v2033_v32 = vpack.c.bf16 %v1665_v53, %v1665_v53 }
 0x24b   : > { %1848 = vst.msk [vmem:[%s3371_s8 + $0x7c] sm:$0xf] %vm1816_vm15, %v2035_v23  ;;  %1830 = vst.msk [vmem:[%s3371_s8 + $0x34] sm:$0xf] %vm1816_vm15, %v2017_v47 }
 0x24c   : > { %1846 = vst.msk [vmem:[%s3371_s8 + $0x74] sm:$0xf] %vm1816_vm15, %v2033_v32 }
 0x27d   : > { %v2082_v52 = vpop.f32.mrb[16].mxu0 }
 0x27e   : > { %v1566_v4 = vadd.f32 %v2082_v52, %v3362_v29  ;;  %v2098_v50 = vpop.f32.mrb[12].mxu1  ;;  %v1557_v0 = vpop.f32.mrb[17].mxu0 }
 0x27f   : > { %v1630_v31 = vadd.f32 %v2098_v50, %v3362_v29  ;;  %v1558_v16 = vadd.f32 %v3362_v29, %v1557_v0  ;;  %v1621_v54 = vpop.f32.mrb[13].mxu1  ;;  %v2083_v28 = vpop.f32.mrb[18].mxu0 }
 0x280   : > { %v1654_v33 = vmax.f32 %v1566_v4, 0.0  ;;  %v1622_v36 = vadd.f32 %v3362_v29, %v1621_v54  ;;  %v1569_v7 = vadd.f32 %v2083_v28, %v3362_v29  ;;  %v2099_v42 = vpop.f32.mrb[14].mxu1  ;;  %v1560_v30 = vpop.f32.mrb[19].mxu0 }
 0x281   : > { %v1670_v1 = vmax.f32 %v1630_v31, 0.0  ;;  %v1652_v14 = vmax.f32 %v1558_v16, 0.0  ;;  %v1633_v37 = vadd.f32 %v2099_v42, %v3362_v29  ;;  %v1561_v44 = vadd.f32 %v3362_v29, %v1560_v30  ;;  %v1624_v51 = vpop.f32.mrb[15].mxu1 }
 0x282   : > { %v2022_v43 = vpack.c.bf16 %v1654_v33, %v1654_v33  ;;  %v1668_v19 = vmax.f32 %v1622_v36, 0.0  ;;  %v1655_v61 = vmax.f32 %v1569_v7, 0.0  ;;  %v1625_v26 = vadd.f32 %v3362_v29, %v1624_v51 }
 0x283   : > { %v2038_v2 = vpack.c.bf16 %v1670_v1, %v1670_v1  ;;  %v2020_v10 = vpack.c.bf16 %v1652_v14, %v1652_v14  ;;  %v1671_v27 = vmax.f32 %v1633_v37, 0.0  ;;  %v1653_v5 = vmax.f32 %v1561_v44, 0.0 }
 0x284   : > { %1835 = vst.msk [vmem:[%s3371_s8 + $0x48] sm:$0xf] %vm1816_vm15, %v2022_v43  ;;  %v2036_v48 = vpack.c.bf16 %v1668_v19, %v1668_v19  ;;  %v2023_v17 = vpack.c.bf16 %v1655_v61, %v1655_v61  ;;  %v1669_v6 = vmax.f32 %v1625_v26, 0.0 }
 0x285   : > { %1851 = vst.msk [vmem:[%s3371_s8 + $0x88] sm:$0xf] %vm1816_vm15, %v2038_v2  ;;  %1833 = vst.msk [vmem:[%s3371_s8 + $0x40] sm:$0xf] %vm1816_vm15, %v2020_v10  ;;  %v2039_v60 = vpack.c.bf16 %v1671_v27, %v1671_v27  ;;  %v2021_v49 = vpack.c.bf16 %v1653_v5, %v1653_v5 }
 0x286   : > { %1849 = vst.msk [vmem:[%s3371_s8 + $0x80] sm:$0xf] %vm1816_vm15, %v2036_v48  ;;  %1836 = vst.msk [vmem:[%s3371_s8 + $0x4c] sm:$0xf] %vm1816_vm15, %v2023_v17  ;;  %v2037_v29 = vpack.c.bf16 %v1669_v6, %v1669_v6 }
 0x287   : > { %1852 = vst.msk [vmem:[%s3371_s8 + $0x8c] sm:$0xf] %vm1816_vm15, %v2039_v60  ;;  %1834 = vst.msk [vmem:[%s3371_s8 + $0x44] sm:$0xf] %vm1816_vm15, %v2021_v49 }
 0x288   : > { %1850 = vst.msk [vmem:[%s3371_s8 + $0x84] sm:$0xf] %vm1816_vm15, %v2037_v29 }
 0x289 PF: > { %s13_s12 = sadd.s32 1, %s2174_s12  }
 0x28a   : > { %p10_p4 = scmp.ge.s32.totalorder %s13_s12, 4  }
 0x28c   :  { %12 = sbr.rel (!%p10_p4) target bundleno = 1 (0x1), region = 62 }

// kernel: vqbase_forward.5
= control target key start
LH: loop header
LB: loop body
LE: loop exit
PB: predicated region body
PF: predicated region fallthrough
CT: control target
= control target key end

     0   :  { %s1992_s12 = smov 0   ;;  %s3316_s0 = inlined_call_operand.vmem [shape: bf16[2,342,8], index: 0, kind: input, shape index: {}]   ;;  %s3317_s1 = inlined_call_operand.vmem [shape: bf16[72,3], index: 1, kind: input, shape index: {}]   ;;  %s3318_s2 = inlined_call_operand.vmem [shape: f32[1,3], index: 2, kind: input, shape index: {}]   ;;  %s3319_s3 = inlined_call_operand.vmem [shape: f32[2,288,3], index: 3, kind: output, shape index: {}]  }
   0x1 LB: > { %s1746_s13 = sadd.s32 4294967295, %s1962_s12   ;;  %p1750_p0 = scmp.ge.s32.totalorder %s1962_s12, 1  ;;  %s1962_s12 = sphi %s1992_s12, %s13_s12  }
   0x2   : > { %p137_p1 = scmp.lt.s32.totalorder %s1962_s12, 3 }
   0x4   : > { %p138_p2 = pnand %p1750_p0, %p137_p1 }
   0x6   : > { %141 = sbr.rel (%p138_p2) target bundleno = 645 (0x285), region = 32 }
   0xd   : > { %p161_p3 = scmp.lt.s32.totalorder %s1746_s13, 1  ;;  %vm503_vm0 = vcmask 1046528   ;;  %vm763_vm1 = vcmask 1045504   ;;  %vm315_vm2 = vsmask.f32 7424  ;;  %s1964_s18 = smov 24  }
   0xe   : > { %s1965_s19 = smov 16   ;;  %s1966_s20 = smov 40   ;;  %vm633_vm3 = vsmask.f32 6400  ;;  %vm893_vm4 = vsmask.f32 5376 }
   0xf   : > { %s3388_s13 = smov (!%p161_p3, %s1746_s13), 1  ;;  %s1967_s21 = smov 8   ;;  %vm1023_vm5 = vcmask 1044480   ;;  %vm1473_vm6 = vcmask 1043456   ;;  %vm1097_vm7 = vcmask 64512   ;;  %vm1134_vm8 = vcmask 130048  }
  0x10   : > { %s1890_s14 = smul.u32 172, %s3388_s13  ;;  %s1968_s26 = smov 32   ;;  %vm1171_vm9 = vcmask 195584   ;;  %vm1208_vm10 = vcmask 261120   ;;  %vm1245_vm11 = vcmask 326656   ;;  %vm1282_vm12 = vcmask 392192  }
  0x11   : > { %s1969_s29 = smov 48   ;;  %s1970_s5 = smov 56   ;;  %vm1319_vm13 = vcmask 457728   ;;  %vm1356_vm14 = vcmask 523264   ;;  %vm1436_vm15 = vcmask 588800  }
  0x12   : > { %s2006_s17 = scalar_lea.vmem %s3316_s0, %s1890_s14  ;;  %s1971_s6 = smov 64  }
  0x13   : > { %v175_v0 = vld [vmem:[%s2006_s17 + $0xc] sm:$0xf]  ;;  %v176_v1 = vld [vmem:[%s2006_s17 + $0x10] sm:$0xf]  ;;  %v2011_v2 = vld [vmem:[%s2006_s17 + $0x14] sm:$0xf] }
  0x14   : > { %v210_v3 = vld [vmem:[%s2006_s17 + $0x8] sm:$0xe]  ;;  %v2015_v4 = vcombine.low %v176_v1, %v2011_v2  ;;  %v173_v5 = vld [vmem:[%s2006_s17 + $0x4] sm:$0xf]  ;;  %v209_v8 = vld [vmem:[%s2006_s17] sm:$0xe] }
  0x15   : > { %v174_v6 = vld [vmem:[%s2006_s17 + $0x8] sm:$0xf]  ;;  %v1773_v7 = vcombine.low %v210_v3, %v175_v0  ;;  %v172_v10 = vld [vmem:[%s2006_s17] sm:$0xf]  ;;  %v1772_v13 = vcombine.low %v209_v8, %v173_v5  ;;  %v2028_v16 = vld [vmem:[%s2006_s17 + $0x18] sm:$0xff]   ;;  %s1891_s9 = smul.u32 288, %s3388_s13 }
  0x16   : > { %v2020_v9 = vcombine.low %v174_v6, %v175_v0  ;;  %v215_v11 = vld [vmem:[%s2006_s17 + $0x8] sm:$0xc]  ;;  %v507_v12 = vrot.slane %v2015_v4, 1  ;;  %v2025_v14 = vcombine.low %v172_v10, %v173_v5  ;;  %v765_v19 = vrot.slane %v2015_v4, 2  ;;  %v216_v34 = vld [vmem:[%s2006_s17 + $0x10] sm:$0xc] }
  0x17   : > { %v1777_v15 = vcombine.low %v215_v11, %v175_v0  ;;  %v588_v17 = vrot.slane %v1773_v7, 1  ;;  %v504_v21 = vrot.slane %v1772_v13, 1  ;;  %v509_v28 = vrot.slane %v2028_v16, 1  ;;  %v2061_v45 = vld [vmem:[%s2006_s17 + $0x20] sm:$0xff]   ;;  %v2091_v1 = vld [vmem:[%s2006_s17 + $0x50] sm:$0xff]   ;;  %v1928_v11 = vld [vmem:[%s3317_s1 + $0x8] sm:$0xff]   ;;  %s3163_s16 = scalar_lea.vmem %s3319_s3, %s1891_s9 }
  0x18   : > { %v505_v18 = vrot.slane %v2020_v9, 1  ;;  %v324_v20 = vshll.u32 %v2020_v9, 16  ;;  %v317_v24 = vshrl.u32 %v2025_v14, 16  ;;  %v319_v25 = vshll.u32 %v2025_v14, 16  ;;  %v1927_v3 = vld [vmem:[%s3317_s1] sm:$0xff]  }
  0x19   : > { %v764_v22 = vrot.slane %v1777_v15, 2  ;;  %v589_v23 = vsel %vm503_vm0, %v588_v17, %v507_v12  ;;  %v328_v31 = vshrl.u32 %v2020_v9, 16  ;;  %v332_v32 = vshll.u32 %v2015_v4, 16  ;;  %v221_v10 = vld [vmem:[%s2006_s17 + $0x10] sm:$0x8]  ;;  %1832 = vmatprep.subr.bf16.mxu0 %v1927_v3  ;;  %1878 = vmatprep.subr.bf16.mxu1 %v1927_v3 }
  0x1a   : > { %594 = vrot.lane.b32.xlu0 %v589_v23, %s1964_s18  ;;  %v506_v26 = vsel %vm503_vm0, %v504_v21, %v505_v18  ;;  %v326_v29 = vrot.slane %v324_v20, 1  ;;  %v321_v30 = vrot.slane %v319_v25, 1  ;;  %v336_v33 = vshrl.u32 %v2015_v4, 16  ;;  %1833 = vmatpush3.bf16.msra.mxu0 %v1927_v3  ;;  %v2117_v23 = vld [vmem:[%s2006_s17 + $0x58] sm:$0xff]  }
  0x1b   : > { %v766_v27 = vsel %vm763_vm1, %v764_v22, %v765_v19  ;;  %541 = vrot.lane.b32.xlu1 %v506_v26, %s1965_s19  ;;  %v508_v35 = vsel %vm503_vm0, %v505_v18, %v507_v12  ;;  %v2047_v36 = vshll.u32 %v2028_v16, 16  ;;  %v2050_v37 = vshrl.u32 %v2028_v16, 16  ;;  %1883 = vmatpush3.bf16.msra.mxu1 %v1927_v3 }
  0x1c   : > { %v635_v38 = vshrl.u32 %v1773_v7, 16  ;;  %v322_v39 = vor.u32 %v321_v30, %v317_v24  ;;  %v2053_v40 = vrot.slane %v2028_v16, 2  ;;  %v330_v41 = vor.u32 %v328_v31, %v326_v29  ;;  %1834 = vmatprep.subr.bf16.mxu0 %v1928_v11  ;;  %1879 = vmatprep.subr.bf16.mxu1 %v1928_v11 }
  0x1d   : > { %v2056_v42 = vrot.slane %v332_v32, 1  ;;  %v642_v43 = vrot.slane %v336_v33, 1  ;;  %v643_v44 = vrot.slane %v332_v32, 2  ;;  %v638_v48 = vshll.u32 %v1773_v7, 16 }
  0x1e   : > { %801 = vrot.lane.b32.xlu0 %v766_v27, %s1966_s20  ;;  %v327_v46 = vsel %vm315_vm2, %v322_v39, %v326_v29  ;;  %v637_v47 = vrot.slane %v635_v38, 1  ;;  %v2068_v49 = vsel %vm503_vm0, %v507_v12, %v509_v28  ;;  %v646_v50 = vrot.slane %v2050_v37, 1  ;;  %1835 = vmatpush3.bf16.msra.mxu0 %v1928_v11  ;;  %v1930_v29 = vld [vmem:[%s3317_s1 + $0x18] sm:$0xff]  }
  0x1f   : > { %543 = vrot.lane.b32.xlu1 %v508_v35, %s1965_s19  ;;  %v647_v51 = vrot.slane %v2047_v36, 2  ;;  %v1778_v52 = vcombine.low %v216_v34, %v2011_v2  ;;  %v640_v53 = vrot.slane %v638_v48, 2  ;;  %v335_v54 = vsel %vm315_vm2, %v330_v41, %v2056_v42  ;;  %1884 = vmatpush3.bf16.msra.mxu1 %v1928_v11 }
  0x20   : > { %v644_v55 = vor.u32 %v643_v44, %v642_v43  ;;  %v768_v59 = vsel %vm763_vm1, %v765_v19, %v2053_v40  ;;  %v2083_v61 = vshll.u32 %v2061_v45, 16  ;;  %v2086_v62 = vshrl.u32 %v2061_v45, 16  ;;  %v1929_v19 = vld [vmem:[%s3317_s1 + $0x10] sm:$0xff]  }
  0x21   : > { %v641_v56 = vor.u32 %v640_v53, %v637_v47  ;;  %v895_v57 = vshrl.u32 %v1778_v52, 16  ;;  %v898_v58 = vshll.u32 %v1778_v52, 16  ;;  %v2080_v60 = vor.u32 %v647_v51, %v646_v50  ;;  %1836 = vmatprep.subr.bf16.mxu0 %v1929_v19  ;;  %1880 = vmatprep.subr.bf16.mxu1 %v1929_v19 }
  0x22   : > { %464 = vrot.lane.b32.xlu0 %v327_v46, %s1967_s21  ;;  %v848_v63 = vrot.slane %v1778_v52, 2  ;;  %v902_v0 = vrot.slane %v2050_v37, 2  ;;  %v903_v6 = vrot.slane %v2047_v36, 3  ;;  %v769_v13 = vrot.slane %v2061_v45, 2  ;;  %1837 = vmatpush3.bf16.msra.mxu0 %v1929_v19 }
  0x23   : > { %596 = vrot.lane.b32.xlu1 %v2068_v49, %s1964_s18  ;;  %v645_v5 = vsel %vm633_vm3, %v641_v56, %v644_v55  ;;  %v897_v7 = vrot.slane %v895_v57, 2  ;;  %v900_v8 = vrot.slane %v898_v58, 3  ;;  %v649_v12 = vsel %vm633_vm3, %v644_v55, %v2080_v60  ;;  %1885 = vmatpush3.bf16.msra.mxu1 %v1929_v19 }
  0x24   : > { %v906_v15 = vrot.slane %v2086_v62, 2  ;;  %v907_v17 = vrot.slane %v2083_v61, 3  ;;  %v849_v18 = vsel %vm763_vm1, %v848_v63, %v2053_v40  ;;  %v904_v20 = vor.u32 %v903_v6, %v902_v0  ;;  %1838 = vmatprep.subr.bf16.mxu0 %v1930_v29  ;;  %1881 = vmatprep.subr.bf16.mxu1 %v1930_v29  ;;  %v2201_v63 = vld [vmem:[%s2006_s17 + $0x68] sm:$0xff]  }
  0x25   : > { %v901_v21 = vor.u32 %v900_v8, %v897_v7  ;;  %v1782_v22 = vcombine.low %v221_v10, %v2011_v2  ;;  %v2120_v24 = vshll.u32 %v2091_v1, 16  ;;  %v2126_v25 = vsel %vm763_vm1, %v2053_v40, %v769_v13  ;;  %v2152_v40 = vld [vmem:[%s2006_s17 + $0x60] sm:$0xff]   ;;  %v2204_v0 = vld [vmem:[%s2006_s17 + $0x28] sm:$0xff]  }
  0x26   : > { %466 = vrot.lane.b32.xlu0 %v335_v54, %s1967_s21  ;;  %v2128_v26 = vor.u32 %v907_v17, %v906_v15  ;;  %v1025_v27 = vrot.slane %v2028_v16, 3  ;;  %v2133_v2 = vshrl.u32 %v2091_v1, 16  ;;  %v2143_v34 = vshll.u32 %v2117_v23, 16  ;;  %3349 = vst [vmem:[#allocation3_spill] sm:$0xff] %v2152_v40  ;;  %1839 = vmatpush3.bf16.msra.mxu0 %v1930_v29 }
  0x27   : > { %803 = vrot.lane.b32.xlu1 %v768_v59, %s1966_s20  ;;  %v905_v30 = vsel %vm893_vm4, %v901_v21, %v904_v20  ;;  %v1024_v31 = vrot.slane %v1782_v22, 3  ;;  %v3323_v32 = vrot.slane %v2120_v24, 1  ;;  %v338_v38 = vor.u32 %v336_v33, %v2056_v42  ;;  %1886 = vmatpush3.bf16.msra.mxu1 %v1930_v29 }
  0x28   : > { %3348 = vst [vmem:[#allocation2_spill] sm:$0xff] %v2143_v34  ;;  %v909_v35 = vsel %vm893_vm4, %v904_v20, %v2128_v26  ;;  %v342_v39 = vrot.slane %v2047_v36, 1  ;;  %v406_v33 = vrot.slane %v2143_v34, 1  ;;  %v1027_v42 = vrot.slane %v2061_v45, 3  ;;  %v1933_v20 = vld [vmem:[%s3317_s1 + $0x20] ss:$0 sps:$4 sm:$0xff]  }
  0x29   : > { %v1026_v41 = vsel %vm1023_vm5, %v1024_v31, %v1025_v27  ;;  %v402_v43 = vor.u32 %v2133_v2, %v3323_v32  ;;  %v2164_v44 = vshrl.u32 %v2117_v23, 16  ;;  %v2167_v46 = vshll.u32 %v2152_v40, 16  ;;  %1888 = vmatprep.subr.msk.bf16.mxu0 %vm1473_vm6, %v1933_v20  ;;  %1889 = vmatprep.subr.msk.bf16.mxu1 %vm1473_vm6, %v1933_v20 }
  0x2a   : > { %724 = vrot.lane.b32.xlu0 %v645_v5, %s1968_s26  ;;  %v343_v36 = vsel %vm315_vm2, %v338_v38, %v342_v39  ;;  %v346_v48 = vor.u32 %v2050_v37, %v342_v39  ;;  %v350_v50 = vrot.slane %v2083_v61, 1  ;;  %v1028_v51 = vsel %vm1023_vm5, %v1025_v27, %v1027_v42 }
  0x2b   : > { %726 = vrot.lane.b32.xlu1 %v649_v12, %s1968_s26  ;;  %3350 = vst [vmem:[#allocation4_spill] sm:$0xff] %v2164_v44  ;;  %v407_v47 = vsel %vm315_vm2, %v402_v43, %v406_v33  ;;  %v410_v52 = vor.u32 %v2164_v44, %v406_v33  ;;  %v414_v53 = vrot.slane %v2167_v46, 1  ;;  %v3322_v55 = vrot.slane %v2091_v1, 1 }
  0x2c   : > { %v351_v37 = vsel %vm315_vm2, %v346_v48, %v350_v50  ;;  %v525_v56 = vrot.slane %v2117_v23, 1  ;;  %v511_v57 = vrot.slane %v2061_v45, 1  ;;  %v527_v59 = vrot.slane %v2152_v40, 1 }
  0x2d   : > { %v415_v54 = vsel %vm315_vm2, %v410_v52, %v414_v53  ;;  %v2213_v6 = vshrl.u32 %v2152_v40, 16  ;;  %v513_v7 = vrot.slane %v2204_v0, 1  ;;  %v678_v8 = vrot.slane %v2164_v44, 1 }
  0x2e   : > { %854 = vrot.lane.b32.xlu0 %v849_v18, %s1969_s29  ;;  %v2195_v58 = vsel %vm503_vm0, %v3322_v55, %v525_v56  ;;  %v512_v3 = vsel %vm503_vm0, %v509_v28, %v511_v57  ;;  %v528_v5 = vsel %vm503_vm0, %v525_v56, %v527_v59  ;;  %v679_v10 = vrot.slane %v2143_v34, 2 }
  0x2f   : > { %856 = vrot.lane.b32.xlu1 %v2126_v25, %s1969_s29  ;;  %3351 = vst [vmem:[#allocation5_spill] sm:$0xff] %v2195_v58  ;;  %v650_v16 = vrot.slane %v2086_v62, 1  ;;  %v651_v28 = vrot.slane %v2083_v61, 2  ;;  %v2224_v11 = vshll.u32 %v2204_v0, 16  ;;  %v2227_v12 = vshrl.u32 %v2204_v0, 16 }
  0x30   : > { %v682_v15 = vrot.slane %v2213_v6, 1  ;;  %v683_v17 = vrot.slane %v2167_v46, 2  ;;  %v2232_v18 = vshll.u32 %v2201_v63, 16  ;;  %v2235_v19 = vshrl.u32 %v2201_v63, 16 }
  0x31   : > { %v2249_v22 = vsel %vm503_vm0, %v511_v57, %v513_v7  ;;  %v2252_v27 = vor.u32 %v679_v10, %v678_v8  ;;  %v652_v29 = vor.u32 %v651_v28, %v650_v16  ;;  %v655_v31 = vrot.slane %v2224_v11, 2  ;;  %v2290_v57 = vld [vmem:[%s2006_s17 + $0x70] sm:$0xff]  }
  0x32   : > { %984 = vrot.lane.b32.xlu0 %v905_v30, %s1970_s5  ;;  %v654_v30 = vrot.slane %v2227_v12, 1  ;;  %v686_v38 = vrot.slane %v2235_v19, 1  ;;  %v687_v39 = vrot.slane %v2232_v18, 2  ;;  %v1475_v33 = vsel %vm1473_vm6, %v1933_v20, 0 }
  0x33   : > { %986 = vrot.lane.b32.xlu1 %v909_v35, %s1970_s5  ;;  %3352 = vst [vmem:[#allocation6_spill] sm:$0xff] %v2252_v27  ;;  %v684_v35 = vor.u32 %v683_v17, %v682_v15  ;;  %1841 = vmatpush3.bf16.msra.mxu0 %v1475_v33  ;;  %v785_v52 = vrot.slane %v2152_v40, 2  ;;  %v787_v56 = vrot.slane %v2201_v63, 2  ;;  %v789_v8 = vrot.slane %v2290_v57, 2 }
  0x34   : > { %v2264_v43 = vor.u32 %v655_v31, %v654_v30  ;;  %1887 = vmatpush3.bf16.msra.mxu1 %v1475_v33  ;;  %v939_v16 = vrot.slane %v2167_v46, 3  ;;  %v910_v28 = vrot.slane %v2227_v12, 2  ;;  %v911_v15 = vrot.slane %v2224_v11, 3 }
  0x35   : > { %v942_v20 = vrot.slane %v2235_v19, 2  ;;  %v2318_v30 = vshll.u32 %v2290_v57, 16  ;;  %v2321_v31 = vshrl.u32 %v2290_v57, 16 }
  0x36   : > { %1061 = vrot.lane.b32.xlu0 %v1026_v41, %s1971_s6  ;;  %v653_v41 = vsel %vm633_vm3, %v2080_v60, %v652_v29  ;;  %v657_v48 = vsel %vm633_vm3, %v652_v29, %v2264_v43  ;;  %v943_v29 = vrot.slane %v2232_v18, 3 }
  0x37   : > { %468 = vrot.lane.b32.xlu1 %v343_v36, %s1967_s21  ;;  %v685_v36 = vsel %vm633_vm3, %v2252_v27, %v684_v35 }
  0x3a   : > { %484 = vrot.lane.b32.xlu0 %v407_v47, %s1967_s21  ;;  %v2268_v47 = vor.u32 %v687_v39, %v686_v38  ;;  %v912_v39 = vor.u32 %v911_v15, %v910_v28  ;;  %v1045_v15 = vrot.slane %v2201_v63, 3 }
  0x3b   : > { %1063 = vrot.lane.b32.xlu1 %v1028_v51, %s1971_s6  ;;  %v3321_v51 = vrot.slane %v2117_v23, 2 }
  0x3c   : > { %v689_v60 = vsel %vm633_vm3, %v684_v35, %v2268_v47  ;;  %v2327_v35 = vsel %vm763_vm1, %v787_v56, %v789_v8 }
  0x3e   : > { %470 = vrot.lane.b32.xlu0 %v351_v37, %s1967_s21  ;;  %v771_v37 = vrot.slane %v2204_v0, 2 }
  0x3f   : > { %486 = vrot.lane.b32.xlu1 %v415_v54, %s1967_s21  ;;  %v2284_v54 = vsel %vm763_vm1, %v3321_v51, %v785_v52 }
  0x40   : > { %3353 = vst [vmem:[#allocation7_spill] sm:$0xff] %v2284_v54 }
  0x42   : > { %545 = vrot.lane.b32.xlu0 %v2068_v49, %s1965_s19  ;;  %v529_v49 = vrot.slane %v2201_v63, 1  ;;  %v690_v63 = vrot.slane %v2321_v31, 1 }
  0x43   : > { %561 = vrot.lane.b32.xlu1 %v2195_v58, %s1965_s19 }
  0x44   : > { %v2244_v21 = vsel %vm503_vm0, %v527_v59, %v529_v49  ;;  %v2293_v59 = vld [vmem:[%s2006_s17 + $0x30] sm:$0xff]  }
  0x45   : > { %v773_v10 = vrot.slane %v2293_v59, 2  ;;  %v2313_v17 = vshrl.u32 %v2293_v59, 16  ;;  %v3329_v61 = vrot.slane %v2293_v59, 3 }
  0x46   : > { %547 = vrot.lane.b32.xlu0 %v512_v3, %s1965_s19 }
  0x47   : > { %563 = vrot.lane.b32.xlu1 %v528_v5, %s1965_s19  ;;  %v2333_v38 = vsel %vm763_vm1, %v771_v37, %v773_v10 }
  0x4a   : > { %598 = vrot.lane.b32.xlu0 %v512_v3, %s1964_s18  ;;  %v772_v3 = vsel %vm763_vm1, %v769_v13, %v771_v37  ;;  %v2310_v13 = vshll.u32 %v2293_v59, 16  ;;  %v913_v37 = vsel %vm893_vm4, %v2128_v26, %v912_v39  ;;  %v3320_v26 = vrot.slane %v2152_v40, 3 }
  0x4b   : > { %614 = vrot.lane.b32.xlu1 %v528_v5, %s1964_s18  ;;  %v788_v5 = vsel %vm763_vm1, %v785_v52, %v787_v56  ;;  %v947_v52 = vrot.slane %v2318_v30, 3 }
  0x4c   : > { %v915_v33 = vrot.slane %v2310_v13, 3 }
  0x4e   : > { %600 = vrot.lane.b32.xlu0 %v2249_v22, %s1964_s18 }
  0x4f   : > { %616 = vrot.lane.b32.xlu1 %v2244_v21, %s1964_s18 }
  0x52   : > { %728 = vrot.lane.b32.xlu0 %v653_v41, %s1968_s26  ;;  %v914_v41 = vrot.slane %v2313_v17, 2 }
  0x53   : > { %744 = vrot.lane.b32.xlu1 %v685_v36, %s1968_s26 }
  0x54   : > { %v2347_v56 = vor.u32 %v915_v33, %v914_v41  ;;  %v1046_v41 = vsel %vm1023_vm5, %v3320_v26, %v1045_v15  ;;  %v418_v33 = vor.u32 %v2213_v6, %v414_v53  ;;  %v3328_v53 = vrot.slane %v2310_v13, 1 }
  0x56   : > { %730 = vrot.lane.b32.xlu0 %v657_v48, %s1968_s26  ;;  %v944_v48 = vor.u32 %v943_v29, %v942_v20  ;;  %v354_v29 = vor.u32 %v2086_v62, %v350_v50 }
  0x57   : > { %746 = vrot.lane.b32.xlu1 %v689_v60, %s1968_s26  ;;  %v946_v60 = vrot.slane %v2321_v31, 2 }
  0x5a   : > { %805 = vrot.lane.b32.xlu0 %v2126_v25, %s1966_s20  ;;  %v938_v25 = vrot.slane %v2213_v6, 2 }
  0x5b   : > { %821 = vrot.lane.b32.xlu1 %v2284_v54, %s1966_s20 }
  0x5c   : > { %v2337_v36 = vor.u32 %v939_v16, %v938_v25  ;;  %v917_v25 = vsel %vm893_vm4, %v912_v39, %v2347_v56  ;;  %v1029_v16 = vrot.slane %v2204_v0, 3  ;;  %v358_v39 = vrot.slane %v2224_v11, 1 }
  0x5e   : > { %807 = vrot.lane.b32.xlu0 %v772_v3, %s1966_s20  ;;  %3354 = vst [vmem:[#allocation8_spill] sm:$0xff] %v2337_v36  ;;  %v1030_v20 = vsel %vm1023_vm5, %v1027_v42, %v1029_v16  ;;  %v359_v45 = vsel %vm315_vm2, %v354_v29, %v358_v39  ;;  %v3327_v42 = vrot.slane %v2290_v57, 3  ;;  %v1032_v46 = vsel %vm1023_vm5, %v1029_v16, %v3329_v61 }
  0x5f   : > { %823 = vrot.lane.b32.xlu1 %v788_v5, %s1966_s20  ;;  %v362_v50 = vor.u32 %v2227_v12, %v358_v39 }
  0x60   : > { %v1048_v6 = vsel %vm1023_vm5, %v1045_v15, %v3327_v42  ;;  %v658_v15 = vrot.slane %v2313_v17, 1 }
  0x62   : > { %858 = vrot.lane.b32.xlu0 %v772_v3, %s1969_s29  ;;  %v945_v3 = vsel %vm893_vm4, %v2337_v36, %v944_v48 }
  0x63   : > { %874 = vrot.lane.b32.xlu1 %v788_v5, %s1969_s29  ;;  %v2351_v5 = vor.u32 %v947_v52, %v946_v60  ;;  %v367_v60 = vsel %vm315_vm2, %v362_v50, %v3328_v53  ;;  %v531_v52 = vrot.slane %v2290_v57, 1 }
  0x65   : > { %v949_v28 = vsel %vm893_vm4, %v944_v48, %v2351_v5  ;;  %v422_v48 = vrot.slane %v2232_v18, 1  ;;  %v3326_v18 = vrot.slane %v2318_v30, 1  ;;  %v532_v16 = vsel %vm503_vm0, %v529_v49, %v531_v52 }
  0x66   : > { %860 = vrot.lane.b32.xlu0 %v2333_v38, %s1969_s29  ;;  %v691_v49 = vrot.slane %v2318_v30, 2 }
  0x67   : > { %876 = vrot.lane.b32.xlu1 %v2327_v35, %s1969_s29  ;;  %v423_v62 = vsel %vm315_vm2, %v418_v33, %v422_v48  ;;  %v426_v11 = vor.u32 %v2235_v19, %v422_v48  ;;  %v515_v19 = vrot.slane %v2293_v59, 1 }
  0x69   : > { %v431_v12 = vsel %vm315_vm2, %v426_v11, %v3326_v18 }
  0x6a   : > { %988 = vrot.lane.b32.xlu0 %v913_v37, %s1970_s5  ;;  %v2411_v37 = vld [vmem:[%s2006_s17 + $0x78] sm:$0xff]  }
  0x6b   : > { %1004 = vrot.lane.b32.xlu1 %v945_v3, %s1970_s5  ;;  %v2414_v3 = vld [vmem:[%s2006_s17 + $0x38] sm:$0xff]   ;;  %v2442_v29 = vshrl.u32 %v2411_v37, 16 }
  0x6c   : > { %v2431_v0 = vshll.u32 %v2414_v3, 16 }
  0x6d   : > { %v694_v50 = vrot.slane %v2442_v29, 1  ;;  %v950_v55 = vrot.slane %v2442_v29, 2 }
  0x6e   : > { %990 = vrot.lane.b32.xlu0 %v917_v25, %s1970_s5  ;;  %v516_v25 = vsel %vm503_vm0, %v513_v7, %v515_v19  ;;  %v2434_v7 = vshrl.u32 %v2414_v3, 16  ;;  %v663_v48 = vrot.slane %v2431_v0, 2 }
  0x6f   : > { %1006 = vrot.lane.b32.xlu1 %v949_v28, %s1970_s5  ;;  %v3324_v28 = vrot.slane %v2411_v37, 1 }
  0x70   : > { %v662_v33 = vrot.slane %v2434_v7, 1 }
  0x72   : > { %1065 = vrot.lane.b32.xlu0 %v1030_v20, %s1971_s6  ;;  %v2439_v20 = vshll.u32 %v2411_v37, 16 }
  0x73   : > { %1081 = vrot.lane.b32.xlu1 %v1046_v41, %s1971_s6 }
  0x74   : > { %v951_v32 = vrot.slane %v2439_v20, 3 }
  0x76   : > { %472 = vrot.lane.b32.xlu0 %v359_v45, %s1967_s21 }
  0x77   : > { %488 = vrot.lane.b32.xlu1 %v423_v62, %s1967_s21  ;;  %v2456_v62 = vsel %vm503_vm0, %v531_v52, %v3324_v28 }
  0x7a   : > { %1067 = vrot.lane.b32.xlu0 %v1032_v46, %s1971_s6  ;;  %v692_v46 = vor.u32 %v691_v49, %v690_v63 }
  0x7b   : > { %1083 = vrot.lane.b32.xlu1 %v1048_v6, %s1971_s6  ;;  %v695_v6 = vrot.slane %v2439_v20, 2 }
  0x7c   : > { %v693_v52 = vsel %vm633_vm3, %v2268_v47, %v692_v46  ;;  %v775_v47 = vrot.slane %v2414_v3, 2 }
  0x7e   : > { %474 = vrot.lane.b32.xlu0 %v367_v60, %s1967_s21 }
  0x7f   : > { %490 = vrot.lane.b32.xlu1 %v431_v12, %s1967_s21  ;;  %v2466_v12 = vor.u32 %v663_v48, %v662_v33  ;;  %v791_v33 = vrot.slane %v2411_v37, 2 }
  0x82   : > { %549 = vrot.lane.b32.xlu0 %v2249_v22, %s1965_s19  ;;  %v3325_v22 = vrot.slane %v2414_v3, 1 }
  0x83   : > { %565 = vrot.lane.b32.xlu1 %v2244_v21, %s1965_s19  ;;  %v659_v21 = vrot.slane %v2310_v13, 2 }
  0x84   : > { %v2449_v39 = vsel %vm503_vm0, %v515_v19, %v3325_v22 }
  0x85   : > { %v660_v41 = vor.u32 %v659_v21, %v658_v15 }
  0x86   : > { %551 = vrot.lane.b32.xlu0 %v516_v25, %s1965_s19 }
  0x87   : > { %567 = vrot.lane.b32.xlu1 %v532_v16, %s1965_s19  ;;  %v661_v60 = vsel %vm633_vm3, %v2264_v43, %v660_v41  ;;  %v665_v15 = vsel %vm633_vm3, %v660_v41, %v2466_v12  ;;  %v2489_v41 = vld [vmem:[%s2006_s17 + $0x80] sm:$0xff]  }
  0x88   : > { %v2522_v28 = vshll.u32 %v2489_v41, 16 }
  0x8a   : > { %602 = vrot.lane.b32.xlu0 %v516_v25, %s1964_s18  ;;  %v2472_v25 = vor.u32 %v695_v6, %v694_v50  ;;  %v2492_v50 = vld [vmem:[%s2006_s17 + $0x40] sm:$0xff]  }
  0x8b   : > { %618 = vrot.lane.b32.xlu1 %v532_v16, %s1964_s18  ;;  %v2517_v26 = vshrl.u32 %v2492_v50, 16 }
  0x8c   : > { %v595_v45 = vpop.permute.xlu0 %594  ;;  %v697_v21 = vsel %vm633_vm3, %v692_v46, %v2472_v25  ;;  %v776_v46 = vsel %vm763_vm1, %v773_v10, %v775_v47  ;;  %v918_v10 = vrot.slane %v2434_v7, 2 }
  0x8d   : > { %v542_v11 = vpop.permute.xlu1 %541  ;;  %v922_v53 = vrot.slane %v2517_v26, 2 }
  0x8e   : > { %604 = vrot.lane.b32.xlu0 %v2449_v39, %s1964_s18 }
  0x8f   : > { %620 = vrot.lane.b32.xlu1 %v2456_v62, %s1964_s18 }
  0x90   : > { %v2468_v19 = vpop.permute.xlu0 %801 }
  0x91   : > { %v544_v16 = vpop.permute.xlu1 %543 }
  0x92   : > { %732 = vrot.lane.b32.xlu0 %v661_v60, %s1968_s26 }
  0x93   : > { %748 = vrot.lane.b32.xlu1 %v693_v52, %s1968_s26 }
  0x94   : > { %v465_v43 = vpop.permute.xlu0 %464 }
  0x95   : > { %v597_v63 = vpop.permute.xlu1 %596  ;;  %v1099_v6 = vsel %vm1097_vm7, %v2025_v14, %v465_v43 }
  0x96   : > { %734 = vrot.lane.b32.xlu0 %v665_v15, %s1968_s26  ;;  %v3335_v15 = vrot.slane %v2492_v50, 2  ;;  %v1136_v14 = vsel %vm1134_vm8, %v1099_v6, %v542_v11  ;;  %v2525_v11 = vshrl.u32 %v2489_v41, 16 }
  0x97   : > { %750 = vrot.lane.b32.xlu1 %v697_v21, %s1968_s26  ;;  %v919_v21 = vrot.slane %v2431_v0, 3  ;;  %v1173_v6 = vsel %vm1171_vm9, %v1136_v14, %v595_v45 }
  0x98   : > { %v467_v49 = vpop.permute.xlu0 %466  ;;  %v2533_v22 = vsel %vm763_vm1, %v775_v47, %v3335_v15  ;;  %v954_v14 = vrot.slane %v2525_v11, 2  ;;  %v955_v47 = vrot.slane %v2522_v28, 3 }
  0x99   : > { %v2484_v48 = vpop.permute.xlu1 %803  ;;  %v1101_v43 = vsel %vm1097_vm7, %v2020_v9, %v467_v49  ;;  %v920_v42 = vor.u32 %v919_v21, %v918_v10 }
  0x9a   : > { %809 = vrot.lane.b32.xlu0 %v2333_v38, %s1966_s20  ;;  %v792_v38 = vsel %vm763_vm1, %v789_v8, %v791_v33  ;;  %v2514_v8 = vshll.u32 %v2492_v50, 16  ;;  %v1138_v49 = vsel %vm1134_vm8, %v1101_v43, %v544_v16  ;;  %v2562_v43 = vor.u32 %v955_v47, %v954_v14 }
  0x9b   : > { %825 = vrot.lane.b32.xlu1 %v2327_v35, %s1966_s20  ;;  %v3334_v35 = vrot.slane %v2489_v41, 2 }
  0x9c   : > { %v725_v60 = vpop.permute.xlu0 %724  ;;  %v923_v61 = vrot.slane %v2514_v8, 3 }
  0x9d   : > { %v727_v52 = vpop.permute.xlu1 %726  ;;  %v1210_v18 = vsel %vm1208_vm10, %v1173_v6, %v725_v60  ;;  %v2542_v45 = vsel %vm763_vm1, %v791_v33, %v3334_v35  ;;  %v1175_v60 = vsel %vm1171_vm9, %v1138_v49, %v597_v63 }
  0x9e   : > { %811 = vrot.lane.b32.xlu0 %v776_v46, %s1966_s20  ;;  %v1247_v10 = vsel %vm1245_vm11, %v1210_v18, %v2468_v19  ;;  %v1212_v63 = vsel %vm1208_vm10, %v1175_v60, %v727_v52  ;;  %v3356_v60 = vrot.slane %v2310_v13, 1 }
  0x9f   : > { %827 = vrot.lane.b32.xlu1 %v792_v38, %s1966_s20 }
  0xa0   : > { %v855_v51 = vpop.permute.xlu0 %854 }
  0xa1   : > { %v857_v9 = vpop.permute.xlu1 %856  ;;  %v1284_v21 = vsel %vm1282_vm12, %v1247_v10, %v855_v51  ;;  %v374_v10 = vrot.slane %v2431_v0, 1 }
  0xa2   : > { %862 = vrot.lane.b32.xlu0 %v776_v46, %s1969_s29  ;;  %v952_v46 = vor.u32 %v951_v32, %v950_v55  ;;  %v921_v32 = vsel %vm893_vm4, %v2347_v56, %v920_v42  ;;  %v2556_v55 = vor.u32 %v923_v61, %v922_v53  ;;  %v1249_v56 = vsel %vm1245_vm11, %v1212_v63, %v2484_v48 }
  0xa3   : > { %878 = vrot.lane.b32.xlu1 %v792_v38, %s1969_s29  ;;  %v1286_v53 = vsel %vm1282_vm12, %v1249_v56, %v857_v9  ;;  %v3358_v63 = vrot.slane %v2318_v30, 1  ;;  %v3331_v30 = vrot.slane %v2489_v41, 3 }
  0xa4   : > { %v985_v16 = vpop.permute.xlu0 %984  ;;  %v953_v19 = vsel %vm893_vm4, %v2351_v5, %v952_v46  ;;  %v925_v61 = vsel %vm893_vm4, %v920_v42, %v2556_v55  ;;  %v1033_v5 = vrot.slane %v2414_v3, 3  ;;  %v957_v6 = vsel %vm893_vm4, %v952_v46, %v2562_v43 }
  0xa5   : > { %v987_v38 = vpop.permute.xlu1 %986  ;;  %v1321_v33 = vsel %vm1319_vm13, %v1284_v21, %v985_v16  ;;  %v1049_v16 = vrot.slane %v2411_v37, 3  ;;  %v3355_v42 = vrot.slane %v2293_v59, 3  ;;  %v370_v46 = vor.u32 %v2313_v17, %v3356_v60  ;;  %v2653_v60 = vld [vmem:[%s2006_s17 + $0x88] sm:$0xff]  }
  0xa6   : > { %864 = vrot.lane.b32.xlu0 %v2533_v22, %s1969_s29  ;;  %v1323_v14 = vsel %vm1319_vm13, %v1286_v53, %v987_v38  ;;  %v3357_v21 = vrot.slane %v2290_v57, 3  ;;  %v438_v59 = vrot.slane %v2439_v20, 1  ;;  %v3333_v17 = vrot.slane %v2492_v50, 3 }
  0xa7   : > { %880 = vrot.lane.b32.xlu1 %v2542_v45, %s1969_s29  ;;  %v1034_v9 = vsel %vm1023_vm5, %v3355_v42, %v1033_v5  ;;  %v375_v13 = vsel %vm315_vm2, %v370_v46, %v374_v10  ;;  %v378_v20 = vor.u32 %v2434_v7, %v374_v10  ;;  %v535_v42 = vrot.slane %v2489_v41, 1  ;;  %v2656_v46 = vld [vmem:[%s2006_s17 + $0x48] sm:$0xff]  }
  0xa8   : > { %v1062_v18 = vpop.permute.xlu0 %1061  ;;  %v442_v53 = vor.u32 %v2442_v29, %v438_v59  ;;  %v3359_v10 = vrot.slane %v2414_v3, 1  ;;  %v666_v3 = vrot.slane %v2517_v26, 1 }
  0xa9   : > { %v2564_v51 = vpop.permute.xlu1 %468  ;;  %v1358_v49 = vsel %vm1356_vm14, %v1321_v33, %v1062_v18  ;;  %v434_v33 = vor.u32 %v2321_v31, %v3358_v63  ;;  %v1036_v31 = vsel %vm1023_vm5, %v1033_v5, %v3333_v17  ;;  %v3360_v63 = vrot.slane %v2411_v37, 1 }
  0xaa   : > { %992 = vrot.lane.b32.xlu0 %v921_v32, %s1970_s5  ;;  %1842 = vmatprep.mubr.msk.bf16.mxu0 %vm1436_vm15, %v1358_v49  ;;  %v1050_v32 = vsel %vm1023_vm5, %v3357_v21, %v1049_v16  ;;  %v3332_v49 = vrot.slane %v2514_v8, 1  ;;  %v2682_v37 = vshrl.u32 %v2656_v46, 16 }
  0xab   : > { %1008 = vrot.lane.b32.xlu1 %v953_v19, %s1970_s5  ;;  %v439_v57 = vsel %vm315_vm2, %v434_v33, %v438_v59  ;;  %v536_v33 = vsel %vm503_vm0, %v3360_v63, %v535_v42 }
  0xac   : > { %v2576_v52 = vpop.permute.xlu0 %484  ;;  %v383_v7 = vsel %vm315_vm2, %v378_v20, %v3332_v49  ;;  %v698_v20 = vrot.slane %v2525_v11, 1  ;;  %v926_v44 = vrot.slane %v2682_v37, 2 }
  0xad   : > { %v1064_v47 = vpop.permute.xlu1 %1063  ;;  %v1119_v27 = vsel %vm1097_vm7, %v2091_v1, %v2576_v52 }
  0xae   : > { %v1360_v48 = vsel %vm1356_vm14, %v1323_v14, %v1064_v47  ;;  %994 = vrot.lane.b32.xlu0 %v925_v61, %s1970_s5  ;;  %v1052_v61 = vsel %vm1023_vm5, %v1049_v16, %v3331_v30  ;;  %v519_v47 = vrot.slane %v2492_v50, 1 }
  0xaf   : > { %1010 = vrot.lane.b32.xlu1 %v957_v6, %s1970_s5  ;;  %1843 = vmatmul.mubr.msk.bf16.vlgmr.msra.gmra.mrb[0].mxu0 %vm1436_vm15, %v1360_v48  ;;  %v3330_v6 = vrot.slane %v2522_v28, 1 }
  0xb0   : > { %v2593_v38 = vpop.permute.xlu0 %470  ;;  %v520_v21 = vsel %vm503_vm0, %v3359_v10, %v519_v47 }
  0xb1   : > { %v2602_v18 = vpop.permute.xlu1 %486  ;;  %v447_v29 = vsel %vm315_vm2, %v442_v53, %v3330_v6  ;;  %v2689_v53 = vshll.u32 %v2653_v60, 16  ;;  %v670_v6 = vrot.slane %v2682_v37, 1 }
  0xb2   : > { %1069 = vrot.lane.b32.xlu0 %v1034_v9, %s1971_s6 }
  0xb3   : > { %1085 = vrot.lane.b32.xlu1 %v1050_v32, %s1971_s6 }
  0xb4   : > { %v2608_v0 = vpop.permute.xlu0 %545 }
  0xb5   : > { %v2612_v19 = vpop.permute.xlu1 %561 }
  0xb6   : > { %476 = vrot.lane.b32.xlu0 %v375_v13, %s1967_s21  ;;  %v3336_v13 = vrot.slane %v2656_v46, 1 }
  0xb7   : > { %492 = vrot.lane.b32.xlu1 %v439_v57, %s1967_s21  ;;  %v2679_v57 = vshll.u32 %v2656_v46, 16 }
  0xb8   : > { %v2621_v56 = vpop.permute.xlu0 %547  ;;  %v2701_v10 = vsel %vm503_vm0, %v519_v47, %v3336_v13 }
  0xb9   : > { %v2628_v14 = vpop.permute.xlu1 %563  ;;  %v671_v30 = vrot.slane %v2679_v57, 2 }
  0xba   : > { %1071 = vrot.lane.b32.xlu0 %v1036_v31, %s1971_s6 }
  0xbb   : > { %1087 = vrot.lane.b32.xlu1 %v1052_v61, %s1971_s6  ;;  %v699_v61 = vrot.slane %v2522_v28, 2 }
  0xbc   : > { %v2635_v5 = vpop.permute.xlu0 %598 }
  0xbd   : > { %v2640_v16 = vpop.permute.xlu1 %614  ;;  %v700_v35 = vor.u32 %v699_v61, %v698_v20 }
  0xbe   : > { %478 = vrot.lane.b32.xlu0 %v383_v7, %s1967_s21  ;;  %v2692_v7 = vshrl.u32 %v2653_v60, 16 }
  0xbf   : > { %494 = vrot.lane.b32.xlu1 %v447_v29, %s1967_s21 }
  0xc0   : > { %v2645_v48 = vpop.permute.xlu0 %600 }
  0xc1   : > { %v2648_v9 = vpop.permute.xlu1 %616 }
  0xc2   : > { %553 = vrot.lane.b32.xlu0 %v2449_v39, %s1965_s19  ;;  %v2672_v39 = vrot.slane %v2653_v60, 1 }
  0xc3   : > { %569 = vrot.lane.b32.xlu1 %v2456_v62, %s1965_s19  ;;  %v667_v62 = vrot.slane %v2514_v8, 2 }
  0xc4   : > { %v2663_v32 = vpop.permute.xlu0 %728  ;;  %3361 = vst [vmem:[#allocation9_spill] sm:$0xff] %v2672_v39  ;;  %v2707_v17 = vsel %vm503_vm0, %v535_v42, %v2672_v39  ;;  %v701_v42 = vsel %vm633_vm3, %v2472_v25, %v700_v35  ;;  %v779_v25 = vrot.slane %v2656_v46, 2 }
  0xc5   : > { %v2668_v59 = vpop.permute.xlu1 %744  ;;  %v668_v63 = vor.u32 %v667_v62, %v666_v3  ;;  %v2717_v3 = vor.u32 %v671_v30, %v670_v6 }
  0xc6   : > { %555 = vrot.lane.b32.xlu0 %v520_v21, %s1965_s19 }
  0xc7   : > { %571 = vrot.lane.b32.xlu1 %v536_v33, %s1965_s19  ;;  %v669_v47 = vsel %vm633_vm3, %v2466_v12, %v668_v63  ;;  %3362 = vst [vmem:[#allocation10_spill] sm:$0xff] %v2717_v3  ;;  %v673_v13 = vsel %vm633_vm3, %v668_v63, %v2717_v3 }
  0xc8   : > { %v2684_v31 = vpop.permute.xlu0 %730 }
  0xc9   : > { %v2694_v29 = vpop.permute.xlu1 %746 }
  0xca   : > { %606 = vrot.lane.b32.xlu0 %v520_v21, %s1964_s18  ;;  %v702_v21 = vrot.slane %v2692_v7, 1 }
  0xcb   : > { %622 = vrot.lane.b32.xlu1 %v536_v33, %s1964_s18  ;;  %v703_v33 = vrot.slane %v2689_v53, 2 }
  0xcc   : > { %v806_v49 = vpop.permute.xlu0 %805 }
  0xcd   : > { %v822_v15 = vpop.permute.xlu1 %821  ;;  %v2723_v20 = vor.u32 %v703_v33, %v702_v21  ;;  %v795_v33 = vrot.slane %v2653_v60, 2 }
  0xce   : > { %608 = vrot.lane.b32.xlu0 %v2701_v10, %s1964_s18 }
  0xcf   : > { %624 = vrot.lane.b32.xlu1 %v2707_v17, %s1964_s18  ;;  %3363 = vst [vmem:[#allocation11_spill] sm:$0xff] %v2723_v20  ;;  %v705_v30 = vsel %vm633_vm3, %v700_v35, %v2723_v20  ;;  %v3364_v35 = vrot.slane %v2492_v50, 2 }
  0xd0   : > { %v2719_v62 = vpop.permute.xlu0 %807 }
  0xd1   : > { %v2725_v61 = vpop.permute.xlu1 %823 }
  0xd2   : > { %736 = vrot.lane.b32.xlu0 %v669_v47, %s1968_s26 }
  0xd3   : > { %752 = vrot.lane.b32.xlu1 %v701_v42, %s1968_s26  ;;  %v2742_v42 = vld [vmem:[%s2006_s17 + $0x90] sm:$0xff]  }
  0xd4   : > { %v859_v12 = vpop.permute.xlu0 %858  ;;  %v2755_v54 = vrot.slane %v2742_v42, 2  ;;  %v707_v3 = vshrl.u32 %v2742_v42, 16  ;;  %v710_v58 = vshll.u32 %v2742_v42, 16 }
  0xd5   : > { %v875_v6 = vpop.permute.xlu1 %874 }
  0xd6   : > { %738 = vrot.lane.b32.xlu0 %v673_v13, %s1968_s26  ;;  %v780_v13 = vsel %vm763_vm1, %v3364_v35, %v779_v25  ;;  %v959_v35 = vrot.slane %v2689_v53, 3 }
  0xd7   : > { %754 = vrot.lane.b32.xlu1 %v705_v30, %s1968_s26  ;;  %v3365_v30 = vrot.slane %v2489_v41, 2 }
  0xd8   : > { %v2736_v21 = vpop.permute.xlu0 %860 }
  0xd9   : > { %v2739_v47 = vpop.permute.xlu1 %876  ;;  %v796_v40 = vsel %vm763_vm1, %v3365_v30, %v795_v33  ;;  %v927_v30 = vrot.slane %v2679_v57, 3 }
  0xda   : > { %813 = vrot.lane.b32.xlu0 %v2533_v22, %s1966_s20  ;;  %v958_v22 = vrot.slane %v2692_v7, 2 }
  0xdb   : > { %829 = vrot.lane.b32.xlu1 %v2542_v45, %s1966_s20  ;;  %v1103_v45 = vsel %vm1097_vm7, %v2015_v4, %v2564_v51  ;;  %v1156_v4 = vsel %vm1134_vm8, %v1119_v27, %v2612_v19  ;;  %v3366_v27 = vrot.slane %v2091_v1, 2 }
  0xdc   : > { %v989_v63 = vpop.permute.xlu0 %988  ;;  %v1140_v34 = vsel %vm1134_vm8, %v1103_v45, %v2608_v0  ;;  %v1193_v39 = vsel %vm1171_vm9, %v1156_v4, %v2640_v16  ;;  %v2784_v45 = vsel %vm763_vm1, %v795_v33, %v2755_v54  ;;  %v960_v16 = vor.u32 %v959_v35, %v958_v22 }
  0xdd   : > { %v1005_v36 = vpop.permute.xlu1 %1004  ;;  %v1177_v51 = vsel %vm1171_vm9, %v1140_v34, %v2635_v5  ;;  %v2789_v34 = vsel %vm763_vm1, %v779_v25, %v3366_v27  ;;  %v1230_v19 = vsel %vm1208_vm10, %v1193_v39, %v2668_v59  ;;  %v931_v25 = vrot.slane %v2120_v24, 3 }
  0xde   : > { %815 = vrot.lane.b32.xlu0 %v780_v13, %s1966_s20  ;;  %v1214_v52 = vsel %vm1208_vm10, %v1177_v51, %v2663_v32  ;;  %v928_v32 = vor.u32 %v927_v30, %v926_v44  ;;  %v1267_v4 = vsel %vm1245_vm11, %v1230_v19, %v822_v15  ;;  %v930_v51 = vrot.slane %v2133_v2, 2 }
  0xdf   : > { %831 = vrot.lane.b32.xlu1 %v796_v40, %s1966_s20  ;;  %v1251_v5 = vsel %vm1245_vm11, %v1214_v52, %v806_v49  ;;  %v1304_v27 = vsel %vm1282_vm12, %v1267_v4, %v875_v6  ;;  %v962_v39 = vrot.slane %v707_v3, 2  ;;  %v963_v44 = vrot.slane %v710_v58, 3 }
  0xe0   : > { %v991_v20 = vpop.permute.xlu0 %990  ;;  %v1288_v33 = vsel %vm1282_vm12, %v1251_v5, %v859_v12  ;;  %v1341_v15 = vsel %vm1319_vm13, %v1304_v27, %v1005_v36  ;;  %v1121_v36 = vsel %vm1097_vm7, %v2117_v23, %v2602_v18  ;;  %v961_v18 = vsel %vm893_vm4, %v2562_v43, %v960_v16 }
  0xe1   : > { %v1007_v0 = vpop.permute.xlu1 %1006  ;;  %v1325_v59 = vsel %vm1319_vm13, %v1288_v33, %v989_v63  ;;  %v929_v63 = vsel %vm893_vm4, %v2556_v55, %v928_v32  ;;  %v1158_v30 = vsel %vm1134_vm8, %v1121_v36, %v2628_v14  ;;  %v2835_v19 = vor.u32 %v963_v44, %v962_v39 }
  0xe2   : > { %866 = vrot.lane.b32.xlu0 %v780_v13, %s1969_s29  ;;  %v1943_v13 = vld [vmem:[%s2006_s17 + $0x18] sm:$0xff]   ;;  %v3369_v44 = vrot.slane %v2489_v41, 3 }
  0xe3   : > { %882 = vrot.lane.b32.xlu1 %v796_v40, %s1969_s29  ;;  %v1105_v22 = vsel %vm1097_vm7, %v1943_v13, %v2593_v38  ;;  %v2825_v38 = vor.u32 %v931_v25, %v930_v51  ;;  %v965_v25 = vsel %vm893_vm4, %v960_v16, %v2835_v19  ;;  %v1937_v13 = vld [vmem:[%s2006_s17 + $0x90] ss:$0 sps:$4 sm:$0x11]  }
  0xe4   : > { %v1066_v49 = vpop.permute.xlu0 %1065  ;;  %v1142_v35 = vsel %vm1134_vm8, %v1105_v22, %v2621_v56  ;;  %v1195_v56 = vsel %vm1171_vm9, %v1158_v30, %v2648_v9 }
  0xe5   : > { %v1082_v12 = vpop.permute.xlu1 %1081  ;;  %v1362_v40 = vsel %vm1356_vm14, %v1325_v59, %v1066_v49  ;;  %v1179_v55 = vsel %vm1171_vm9, %v1142_v35, %v2645_v48  ;;  %v1232_v14 = vsel %vm1208_vm10, %v1195_v56, %v2694_v29  ;;  %v933_v9 = vsel %vm893_vm4, %v928_v32, %v2825_v38 }
  0xe6   : > { %868 = vrot.lane.b32.xlu0 %v2789_v34, %s1969_s29  ;;  %1846 = vmatprep.mubr.msk.bf16.mxu0 %vm1436_vm15, %v1362_v40  ;;  %v1378_v6 = vsel %vm1356_vm14, %v1341_v15, %v1082_v12  ;;  %v1216_v5 = vsel %vm1208_vm10, %v1179_v55, %v2684_v31  ;;  %v1269_v43 = vsel %vm1245_vm11, %v1232_v14, %v2725_v61  ;;  %v1037_v31 = vrot.slane %v2656_v46, 3 }
  0xe7   : > { %884 = vrot.lane.b32.xlu1 %v2784_v45, %s1969_s29  ;;  %1862 = vmatprep.mubr.msk.bf16.mxu1 %vm1436_vm15, %v1378_v6  ;;  %v1253_v48 = vsel %vm1245_vm11, %v1216_v5, %v2719_v62  ;;  %v1306_v29 = vsel %vm1282_vm12, %v1269_v43, %v2739_v47  ;;  %v1053_v61 = vrot.slane %v2653_v60, 3  ;;  %v390_v49 = vrot.slane %v2679_v57, 1 }
  0xe8   : > { %v2831_v52 = vpop.permute.xlu0 %472  ;;  %v1290_v33 = vsel %vm1282_vm12, %v1253_v48, %v2736_v21  ;;  %v1343_v21 = vsel %vm1319_vm13, %v1306_v29, %v1007_v0  ;;  %v3368_v0 = vrot.slane %v2514_v8, 1  ;;  %v3370_v12 = vrot.slane %v2522_v28, 1  ;;  %v2892_v8 = vld [vmem:[%s2006_s17 + $0x50] sm:$0xff]  }
  0xe9   : > { %v2841_v4 = vpop.permute.xlu1 %488  ;;  %v1327_v62 = vsel %vm1319_vm13, %v1290_v33, %v991_v20  ;;  %v3367_v20 = vrot.slane %v2492_v50, 3  ;;  %v1054_v15 = vsel %vm1023_vm5, %v3369_v44, %v1053_v61  ;;  %v454_v50 = vrot.slane %v2689_v53, 1 }
  0xea   : > { %996 = vrot.lane.b32.xlu0 %v929_v63, %s1970_s5  ;;  %v386_v16 = vor.u32 %v2517_v26, %v3368_v0  ;;  %v450_v40 = vor.u32 %v2525_v11, %v3370_v12  ;;  %v1039_v41 = vrot.slane %v2892_v8, 3  ;;  %v1055_v11 = vrot.slane %v2742_v42, 3 }
  0xeb   : > { %1012 = vrot.lane.b32.xlu1 %v961_v18, %s1970_s5  ;;  %v1038_v47 = vsel %vm1023_vm5, %v3367_v20, %v1037_v31  ;;  %v460_v53 = vshll.u32 %v1937_v13, 16  ;;  %v394_v36 = vor.u32 %v2682_v37, %v390_v49  ;;  %v458_v55 = vor.u32 %v2692_v7, %v454_v50 }
  0xec   : > { %v1068_v51 = vpop.permute.xlu0 %1067  ;;  %v391_v26 = vsel %vm315_vm2, %v386_v16, %v390_v49  ;;  %v455_v28 = vsel %vm315_vm2, %v450_v40, %v454_v50  ;;  %v1040_v63 = vsel %vm1023_vm5, %v1037_v31, %v1039_v41  ;;  %v1056_v30 = vsel %vm1023_vm5, %v1053_v61, %v1055_v11 }
  0xed   : > { %v1084_v27 = vpop.permute.xlu1 %1083  ;;  %v1364_v59 = vsel %vm1356_vm14, %v1327_v62, %v1068_v51  ;;  %v462_v18 = vrot.slane %v460_v53, 1  ;;  %v3371_v5 = vrot.slane %v2120_v24, 1  ;;  %v539_v33 = vrot.slane %v1937_v13, 1 }
  0xee   : > { %v1380_v32 = vsel %vm1356_vm14, %v1343_v21, %v1084_v27  ;;  %998 = vrot.lane.b32.xlu0 %v933_v9, %s1970_s5  ;;  %1847 = vmatmul.mubr.msk.bf16.gmra.mrb[4].mxu0 %vm1436_vm15, %v1364_v59  ;;  %v3372_v31 = vrot.slane %v2091_v1, 1  ;;  %v3373_v29 = vrot.slane %v2656_v46, 1  ;;  %v590_v51 = vrot.slane %v2742_v42, 1  ;;  %v3374_v21 = vld [vmem:[#allocation9_spill] sm:$0xff] }
  0xef   : > { %1014 = vrot.lane.b32.xlu1 %v965_v25, %s1970_s5  ;;  %1863 = vmatmul.mubr.msk.bf16.vlgmr.msra.gmra.mrb[0].mxu1 %vm1436_vm15, %v1380_v32  ;;  %v399_v37 = vsel %vm315_vm2, %v394_v36, %v3371_v5  ;;  %v463_v48 = vsel %vm315_vm2, %v458_v55, %v462_v18  ;;  %v1938_v25 = vld [vmem:[%s2006_s17 + $0x98] ss:$0 sps:$4 sm:$0x11]   ;;  %v540_v27 = vsel %vm503_vm0, %v3374_v21, %v539_v33  ;;  %v674_v20 = vrot.slane %v2133_v2, 1  ;;  %v3377_v36 = vld [vmem:[#allocation11_spill] sm:$0xff]  ;;  %v3378_v5 = vld [vmem:[#allocation6_spill] sm:$0xff] }
  0xf0   : > { %v2876_v39 = vpop.permute.xlu0 %474  ;;  %v524_v62 = vsel %vm503_vm0, %v3373_v29, %v3372_v31  ;;  %v1939_v59 = vld [vmem:[%s2006_s17 + $0x98] ss:$0 sps:$4 sm:$0x33]   ;;  %v709_v16 = vrot.slane %v707_v3, 1  ;;  %v712_v49 = vrot.slane %v710_v58, 2  ;;  %v3376_v58 = vld [vmem:[#allocation10_spill] sm:$0xff] }
  0xf1   : > { %v2886_v22 = vpop.permute.xlu1 %490  ;;  %v716_v44 = vshrl.u32 %v1939_v59, 16  ;;  %v2983_v29 = vld [vmem:[%s2006_s17 + $0x98] sm:$0xff]  }
  0xf2   : > { %1073 = vrot.lane.b32.xlu0 %v1038_v47, %s1971_s6  ;;  %v675_v47 = vrot.slane %v2120_v24, 2  ;;  %v713_v50 = vor.u32 %v712_v49, %v709_v16 }
  0xf3   : > { %1089 = vrot.lane.b32.xlu1 %v1054_v15, %s1971_s6  ;;  %v719_v15 = vshll.u32 %v1939_v59, 16  ;;  %v718_v13 = vrot.slane %v716_v44, 1 }
  0xf4   : > { %v2895_v57 = vpop.permute.xlu0 %549  ;;  %v676_v40 = vor.u32 %v675_v47, %v674_v20  ;;  %v3379_v20 = vrot.slane %v2117_v23, 2 }
  0xf5   : > { %v2899_v6 = vpop.permute.xlu1 %565 }
  0xf6   : > { %480 = vrot.lane.b32.xlu0 %v391_v26, %s1967_s21  ;;  %v721_v26 = vrot.slane %v719_v15, 2  ;;  %v677_v53 = vsel %vm633_vm3, %v3376_v58, %v676_v40  ;;  %v3382_v58 = vld [vmem:[#allocation2_spill] sm:$0xff] }
  0xf7   : > { %496 = vrot.lane.b32.xlu1 %v455_v28, %s1967_s21  ;;  %v3375_v28 = vld [vmem:[#allocation5_spill] sm:$0xff] }
  0xf8   : > { %v2907_v35 = vpop.permute.xlu0 %551  ;;  %v722_v55 = vor.u32 %v721_v26, %v718_v13 }
  0xf9   : > { %v2913_v56 = vpop.permute.xlu1 %567 }
  0xfa   : > { %1075 = vrot.lane.b32.xlu0 %v1040_v63, %s1971_s6  ;;  %v723_v33 = vsel %vm633_vm3, %v713_v50, %v722_v55 }
  0xfb   : > { %1091 = vrot.lane.b32.xlu1 %v1056_v30, %s1971_s6  ;;  %v714_v30 = vsel %vm633_vm3, %v3377_v36, %v713_v50  ;;  %v1946_v50 = vld [vmem:[%s2006_s17 + $0x60] sm:$0xff]  }
  0xfc   : > { %v2920_v14 = vpop.permute.xlu0 %602  ;;  %v1123_v13 = vsel %vm1097_vm7, %v1946_v50, %v2841_v4 }
  0xfd   : > { %v2923_v43 = vpop.permute.xlu1 %618 }
  0xfe   : > { %482 = vrot.lane.b32.xlu0 %v399_v37, %s1967_s21  ;;  %v681_v37 = vsel %vm633_vm3, %v676_v40, %v3378_v5  ;;  %v1945_v40 = vld [vmem:[%s2006_s17 + $0x20] sm:$0xff]  }
  0xff   : > { %498 = vrot.lane.b32.xlu1 %v463_v48, %s1967_s21 }
 0x100   : > { %v2927_v7 = vpop.permute.xlu0 %604 }
 0x101   : > { %v2929_v9 = vpop.permute.xlu1 %620 }
 0x102   : > { %557 = vrot.lane.b32.xlu0 %v2701_v10, %s1965_s19  ;;  %v592_v10 = vrot.slane %v1938_v25, 1 }
 0x103   : > { %573 = vrot.lane.b32.xlu1 %v2707_v17, %s1965_s19  ;;  %v591_v17 = vsel %vm503_vm0, %v3374_v21, %v590_v51  ;;  %v850_v21 = vrot.slane %v2983_v29, 2 }
 0x104   : > { %v2942_v61 = vpop.permute.xlu0 %732  ;;  %v593_v24 = vsel %vm503_vm0, %v590_v51, %v592_v10  ;;  %v799_v51 = vrot.slane %v1939_v59, 2  ;;  %v970_v10 = vshll.u32 %v2983_v29, 16  ;;  %v3380_v59 = vrot.slane %v2091_v1, 2 }
 0x105   : > { %v2947_v32 = vpop.permute.xlu1 %748  ;;  %v851_v15 = vsel %vm763_vm1, %v2755_v54, %v850_v21  ;;  %vm1654_vm0 = vcmask 23552  }
 0x106   : > { %559 = vrot.lane.b32.xlu0 %v524_v62, %s1965_s19  ;;  %v784_v47 = vsel %vm763_vm1, %v3380_v59, %v3379_v20  ;;  %v800_v49 = vsel %vm763_vm1, %v2755_v54, %v799_v51 }
 0x107   : > { %575 = vrot.lane.b32.xlu1 %v540_v27, %s1965_s19  ;;  %v1941_v27 = vld [vmem:[%s2006_s17 + $0xa0] ss:$0 sps:$4 sm:$0x33]  }
 0x108   : > { %v2955_v0 = vpop.permute.xlu0 %734  ;;  %v852_v23 = vrot.slane %v1941_v27, 2 }
 0x109   : > { %v2961_v12 = vpop.permute.xlu1 %750 }
 0x10a   : > { %610 = vrot.lane.b32.xlu0 %v524_v62, %s1964_s18 }
 0x10b   : > { %626 = vrot.lane.b32.xlu1 %v591_v17, %s1964_s18  ;;  %v967_v17 = vshrl.u32 %v2983_v29, 16 }
 0x10c   : > { %v810_v2 = vpop.permute.xlu0 %809 }
 0x10d   : > { %v826_v3 = vpop.permute.xlu1 %825  ;;  %v969_v1 = vrot.slane %v967_v17, 2 }
 0x10e   : > { %612 = vrot.lane.b32.xlu0 %v3375_v28, %s1964_s18  ;;  %v3381_v28 = vld [vmem:[#allocation4_spill] sm:$0xff] }
 0x10f   : > { %628 = vrot.lane.b32.xlu1 %v593_v24, %s1964_s18  ;;  %v972_v24 = vrot.slane %v970_v10, 3  ;;  %v934_v54 = vrot.slane %v3381_v28, 2 }
 0x110   : > { %v2971_v63 = vpop.permute.xlu0 %811 }
 0x111   : > { %v2975_v18 = vpop.permute.xlu1 %827 }
 0x112   : > { %740 = vrot.lane.b32.xlu0 %v677_v53, %s1968_s26  ;;  %v935_v53 = vrot.slane %v3382_v58, 3 }
 0x113   : > { %756 = vrot.lane.b32.xlu1 %v714_v30, %s1968_s26 }
 0x114   : > { %v863_v48 = vpop.permute.xlu0 %862 }
 0x115   : > { %v879_v31 = vpop.permute.xlu1 %878 }
 0x116   : > { %742 = vrot.lane.b32.xlu0 %v681_v37, %s1968_s26 }
 0x117   : > { %758 = vrot.lane.b32.xlu1 %v723_v33, %s1968_s26 }
 0x118   : > { %v2987_v62 = vpop.permute.xlu0 %864 }
 0x119   : > { %v2989_v25 = vpop.permute.xlu1 %880 }
 0x11a   : > { %817 = vrot.lane.b32.xlu0 %v2789_v34, %s1966_s20  ;;  %v3007_v34 = vld [vmem:[%s2006_s17 + $0xa0] ss:$0 sps:$4 sm:$0x77]  }
 0x11b   : > { %833 = vrot.lane.b32.xlu1 %v2784_v45, %s1966_s20  ;;  %v1107_v45 = vsel %vm1097_vm7, %v1945_v40, %v2831_v52  ;;  %v1160_v52 = vsel %vm1134_vm8, %v1123_v13, %v2899_v6  ;;  %v976_v55 = vshrl.u32 %v3007_v34, 16  ;;  %v979_v4 = vshll.u32 %v3007_v34, 16  ;;  %v1949_v13 = vld [vmem:[%s2006_s17 + $0x58] sm:$0xff]  }
 0x11c   : > { %v993_v16 = vpop.permute.xlu0 %992  ;;  %v1144_v26 = vsel %vm1134_vm8, %v1107_v45, %v2895_v57  ;;  %v1197_v57 = vsel %vm1171_vm9, %v1160_v52, %v2923_v43  ;;  %v973_v43 = vor.u32 %v972_v24, %v969_v1 }
 0x11d   : > { %v1009_v44 = vpop.permute.xlu1 %1008  ;;  %v1181_v36 = vsel %vm1171_vm9, %v1144_v26, %v2920_v14  ;;  %v1234_v33 = vsel %vm1208_vm10, %v1197_v57, %v2947_v32  ;;  %v853_v14 = vsel %vm763_vm1, %v850_v21, %v852_v23  ;;  %v981_v20 = vrot.slane %v979_v4, 3  ;;  %v3385_v4 = vld [vmem:[#allocation3_spill] sm:$0xff] }
 0x11e   : > { %819 = vrot.lane.b32.xlu0 %v784_v47, %s1966_s20  ;;  %v1218_v5 = vsel %vm1208_vm10, %v1181_v36, %v2942_v61  ;;  %v1271_v51 = vsel %vm1245_vm11, %v1234_v33, %v826_v3  ;;  %v936_v61 = vor.u32 %v935_v53, %v934_v54  ;;  %v1947_v3 = vld [vmem:[%s2006_s17 + $0x28] sm:$0xff]   ;;  %v1041_v26 = vrot.slane %v1949_v13, 3 }
 0x11f   : > { %835 = vrot.lane.b32.xlu1 %v800_v49, %s1966_s20  ;;  %v1255_v6 = vsel %vm1245_vm11, %v1218_v5, %v810_v2  ;;  %v1308_v17 = vsel %vm1282_vm12, %v1271_v51, %v879_v31  ;;  %v978_v2 = vrot.slane %v976_v55, 2  ;;  %v1948_v31 = vld [vmem:[%s2006_s17 + $0x68] sm:$0xff]   ;;  %v3386_v57 = vrot.slane %v3385_v4, 3 }
 0x120   : > { %v995_v30 = vpop.permute.xlu0 %994  ;;  %v1292_v27 = vsel %vm1282_vm12, %v1255_v6, %v863_v48  ;;  %v1345_v59 = vsel %vm1319_vm13, %v1308_v17, %v1009_v44  ;;  %v1109_v48 = vsel %vm1097_vm7, %v1947_v3, %v2876_v39  ;;  %v937_v39 = vsel %vm893_vm4, %v2825_v38, %v936_v61 }
 0x121   : > { %v1011_v37 = vpop.permute.xlu1 %1010  ;;  %v1329_v32 = vsel %vm1319_vm13, %v1292_v27, %v993_v16  ;;  %v1125_v16 = vsel %vm1097_vm7, %v1948_v31, %v2886_v22  ;;  %v1146_v44 = vsel %vm1134_vm8, %v1109_v48, %v2907_v35  ;;  %v974_v22 = vsel %vm893_vm4, %v2835_v19, %v973_v43  ;;  %v1951_v31 = vld [vmem:[%s2006_s17 + $0x70] sm:$0xff]  }
 0x122   : > { %870 = vrot.lane.b32.xlu0 %v784_v47, %s1969_s29  ;;  %v1162_v40 = vsel %vm1134_vm8, %v1125_v16, %v2913_v56  ;;  %v1183_v45 = vsel %vm1171_vm9, %v1146_v44, %v2927_v7  ;;  %v982_v35 = vor.u32 %v981_v20, %v978_v2  ;;  %v1044_v5 = vsel %vm1023_vm5, %v1041_v26, %v3386_v57 }
 0x123   : > { %886 = vrot.lane.b32.xlu1 %v851_v15, %s1969_s29  ;;  %v3383_v15 = vld [vmem:[#allocation7_spill] sm:$0xff]  ;;  %v1199_v1 = vsel %vm1171_vm9, %v1162_v40, %v2929_v9  ;;  %v1220_v24 = vsel %vm1208_vm10, %v1183_v45, %v2955_v0  ;;  %v3384_v9 = vld [vmem:[#allocation8_spill] sm:$0xff] }
 0x124   : > { %v1070_v10 = vpop.permute.xlu0 %1069  ;;  %v1236_v50 = vsel %vm1208_vm10, %v1199_v1, %v2961_v12  ;;  %v1257_v56 = vsel %vm1245_vm11, %v1220_v24, %v2971_v63  ;;  %v941_v0 = vsel %vm893_vm4, %v936_v61, %v3384_v9  ;;  %v983_v54 = vsel %vm893_vm4, %v973_v43, %v982_v35 }
 0x125   : > { %v1086_v47 = vpop.permute.xlu1 %1085  ;;  %v1366_v21 = vsel %vm1356_vm14, %v1329_v32, %v1070_v10  ;;  %v1273_v7 = vsel %vm1245_vm11, %v1236_v50, %v2975_v18  ;;  %v1294_v19 = vsel %vm1282_vm12, %v1257_v56, %v2987_v62  ;;  %v1057_v18 = vrot.slane %v2983_v29, 3 }
 0x126   : > { %v1382_v49 = vsel %vm1356_vm14, %v1345_v59, %v1086_v47  ;;  %872 = vrot.lane.b32.xlu0 %v3383_v15, %s1969_s29  ;;  %1850 = vmatprep.mubr.msk.bf16.mxu0 %vm1436_vm15, %v1366_v21  ;;  %v1310_v12 = vsel %vm1282_vm12, %v1273_v7, %v2989_v25  ;;  %v1331_v63 = vsel %vm1319_vm13, %v1294_v19, %v995_v30  ;;  %v1059_v30 = vrot.slane %v3007_v34, 3 }
 0x127   : > { %888 = vrot.lane.b32.xlu1 %v853_v14, %s1969_s29  ;;  %1866 = vmatprep.mubr.msk.bf16.mxu1 %vm1436_vm15, %v1382_v49  ;;  %v1347_v58 = vsel %vm1319_vm13, %v1310_v12, %v1011_v37  ;;  %v1042_v25 = vsel %vm1023_vm5, %v1039_v41, %v1041_v26  ;;  %v1058_v36 = vsel %vm1023_vm5, %v1055_v11, %v1057_v18  ;;  %v1950_v49 = vld [vmem:[%s2006_s17 + $0x30] sm:$0xff]   ;;  %v1952_v26 = vld [vmem:[%s2006_s17 + $0x38] sm:$0xff]  }
 0x128   : > { %v3065_v23 = vpop.permute.xlu0 %476  ;;  %v1060_v8 = vsel %vm1023_vm5, %v1057_v18, %v1059_v30 }
 0x129   : > { %v493_v38 = vpop.permute.xlu1 %492  ;;  %v1111_v15 = vsel %vm1097_vm7, %v1950_v49, %v3065_v23 }
 0x12a   : > { %1000 = vrot.lane.b32.xlu0 %v937_v39, %s1970_s5  ;;  %v1127_v16 = vsel %vm1097_vm7, %v1951_v31, %v493_v38 }
 0x12b   : > { %1016 = vrot.lane.b32.xlu1 %v974_v22, %s1970_s5 }
 0x12c   : > { %v1072_v28 = vpop.permute.xlu0 %1071 }
 0x12d   : > { %v1088_v62 = vpop.permute.xlu1 %1087  ;;  %v1368_v53 = vsel %vm1356_vm14, %v1331_v63, %v1072_v28  ;;  %v1953_v28 = vld [vmem:[%s2006_s17 + $0x78] sm:$0xff]  }
 0x12e   : > { %v1384_v52 = vsel %vm1356_vm14, %v1347_v58, %v1088_v62  ;;  %1002 = vrot.lane.b32.xlu0 %v941_v0, %s1970_s5  ;;  %1851 = vmatmul.mubr.msk.bf16.gmra.mrb[8].mxu0 %vm1436_vm15, %v1368_v53 }
 0x12f   : > { %1018 = vrot.lane.b32.xlu1 %v983_v54, %s1970_s5  ;;  %1867 = vmatmul.mubr.msk.bf16.gmra.mrb[4].mxu1 %vm1436_vm15, %v1384_v52 }
 0x130   : > { %v479_v29 = vpop.permute.xlu0 %478 }
 0x131   : > { %v495_v55 = vpop.permute.xlu1 %494  ;;  %v1113_v12 = vsel %vm1097_vm7, %v1952_v26, %v479_v29 }
 0x132   : > { %1077 = vrot.lane.b32.xlu0 %v1042_v25, %s1971_s6  ;;  %v1129_v54 = vsel %vm1097_vm7, %v1953_v28, %v495_v55 }
 0x133   : > { %1093 = vrot.lane.b32.xlu1 %v1058_v36, %s1971_s6 }
 0x134   : > { %v554_v37 = vpop.permute.xlu0 %553 }
 0x135   : > { %v570_v41 = vpop.permute.xlu1 %569  ;;  %v1148_v44 = vsel %vm1134_vm8, %v1111_v15, %v554_v37 }
 0x136   : > { %1079 = vrot.lane.b32.xlu0 %v1044_v5, %s1971_s6  ;;  %v1164_v39 = vsel %vm1134_vm8, %v1127_v16, %v570_v41 }
 0x137   : > { %1095 = vrot.lane.b32.xlu1 %v1060_v8, %s1971_s6 }
 0x138   : > { %v556_v42 = vpop.permute.xlu0 %555 }
 0x139   : > { %v572_v11 = vpop.permute.xlu1 %571  ;;  %v1150_v18 = vsel %vm1134_vm8, %v1113_v12, %v556_v42 }
 0x13a   : > { %v1166_v58 = vsel %vm1134_vm8, %v1129_v54, %v572_v11 }
 0x13c   : > { %v607_v34 = vpop.permute.xlu0 %606 }
 0x13d   : > { %v623_v33 = vpop.permute.xlu1 %622  ;;  %v1185_v40 = vsel %vm1171_vm9, %v1148_v44, %v607_v34 }
 0x13e   : > { %v1201_v22 = vsel %vm1171_vm9, %v1164_v39, %v623_v33 }
 0x140   : > { %v609_v6 = vpop.permute.xlu0 %608 }
 0x141   : > { %v625_v14 = vpop.permute.xlu1 %624  ;;  %v1187_v62 = vsel %vm1171_vm9, %v1150_v18, %v609_v6 }
 0x142   : > { %v1203_v52 = vsel %vm1171_vm9, %v1166_v58, %v625_v14 }
 0x144   : > { %v737_v51 = vpop.permute.xlu0 %736 }
 0x145   : > { %v753_v27 = vpop.permute.xlu1 %752  ;;  %v1222_v35 = vsel %vm1208_vm10, %v1185_v40, %v737_v51 }
 0x146   : > { %v1238_v24 = vsel %vm1208_vm10, %v1201_v22, %v753_v27 }
 0x148   : > { %v739_v43 = vpop.permute.xlu0 %738 }
 0x149   : > { %v755_v61 = vpop.permute.xlu1 %754  ;;  %v1224_v25 = vsel %vm1208_vm10, %v1187_v62, %v739_v43 }
 0x14a   : > { %v1240_v36 = vsel %vm1208_vm10, %v1203_v52, %v755_v61 }
 0x14c   : > { %v814_v17 = vpop.permute.xlu0 %813 }
 0x14d   : > { %v830_v32 = vpop.permute.xlu1 %829  ;;  %v1259_v23 = vsel %vm1245_vm11, %v1222_v35, %v814_v17 }
 0x14e   : > { %v1275_v38 = vsel %vm1245_vm11, %v1238_v24, %v830_v32  ;;  %v3158_v32 = vld [vmem:[%s3318_s2] ss:$0 sm:$0xff] }
 0x150   : > { %v816_v10 = vpop.permute.xlu0 %815 }
 0x151   : > { %v832_v2 = vpop.permute.xlu1 %831  ;;  %v1261_v30 = vsel %vm1245_vm11, %v1224_v25, %v816_v10 }
 0x152   : > { %v1277_v55 = vsel %vm1245_vm11, %v1240_v36, %v832_v2 }
 0x154   : > { %v867_v20 = vpop.permute.xlu0 %866 }
 0x155   : > { %v883_v59 = vpop.permute.xlu1 %882  ;;  %v1296_v50 = vsel %vm1282_vm12, %v1259_v23, %v867_v20 }
 0x156   : > { %v1312_v56 = vsel %vm1282_vm12, %v1275_v38, %v883_v59 }
 0x158   : > { %v869_v47 = vpop.permute.xlu0 %868 }
 0x159   : > { %v885_v21 = vpop.permute.xlu1 %884  ;;  %v1298_v4 = vsel %vm1282_vm12, %v1261_v30, %v869_v47 }
 0x15a   : > { %v1314_v57 = vsel %vm1282_vm12, %v1277_v55, %v885_v21 }
 0x15c   : > { %v997_v3 = vpop.permute.xlu0 %996 }
 0x15d   : > { %v1013_v48 = vpop.permute.xlu1 %1012  ;;  %v1333_v7 = vsel %vm1319_vm13, %v1296_v50, %v997_v3 }
 0x15e   : > { %v1349_v9 = vsel %vm1319_vm13, %v1312_v56, %v1013_v48  ;;  %v1954_v56 = vld [vmem:[%s2006_s17 + $0x40] sm:$0xff]  }
 0x160   : > { %v999_v45 = vpop.permute.xlu0 %998 }
 0x161   : > { %v1015_v1 = vpop.permute.xlu1 %1014  ;;  %v1335_v5 = vsel %vm1319_vm13, %v1298_v4, %v999_v45 }
 0x162   : > { %v1351_v8 = vsel %vm1319_vm13, %v1314_v57, %v1015_v1 }
 0x164   : > { %v1074_v19 = vpop.permute.xlu0 %1073 }
 0x165   : > { %v1090_v0 = vpop.permute.xlu1 %1089  ;;  %v1370_v13 = vsel %vm1356_vm14, %v1333_v7, %v1074_v19  ;;  %v1955_v19 = vld [vmem:[%s2006_s17 + $0x80] sm:$0xff]  }
 0x166   : > { %v1386_v63 = vsel %vm1356_vm14, %v1349_v9, %v1090_v0  ;;  %1854 = vmatprep.mubr.msk.bf16.mxu0 %vm1436_vm15, %v1370_v13 }
 0x167   : > { %1870 = vmatprep.mubr.msk.bf16.mxu1 %vm1436_vm15, %v1386_v63 }
 0x168   : > { %v481_v53 = vpop.permute.xlu0 %480 }
 0x169   : > { %v497_v29 = vpop.permute.xlu1 %496  ;;  %v1115_v7 = vsel %vm1097_vm7, %v1954_v56, %v481_v53 }
 0x16a   : > { %v1131_v9 = vsel %vm1097_vm7, %v1955_v19, %v497_v29 }
 0x16c   : > { %v1076_v37 = vpop.permute.xlu0 %1075 }
 0x16d   : > { %v1092_v41 = vpop.permute.xlu1 %1091  ;;  %v1372_v42 = vsel %vm1356_vm14, %v1335_v5, %v1076_v37 }
 0x16e   : > { %v1388_v11 = vsel %vm1356_vm14, %v1351_v8, %v1092_v41  ;;  %1855 = vmatmul.mubr.msk.bf16.gmra.mrb[12].mxu0 %vm1436_vm15, %v1372_v42 }
 0x16f   : > { %1871 = vmatmul.mubr.msk.bf16.gmra.mrb[8].mxu1 %vm1436_vm15, %v1388_v11 }
 0x170   : > { %v483_v34 = vpop.permute.xlu0 %482 }
 0x171   : > { %v499_v33 = vpop.permute.xlu1 %498  ;;  %v1117_v18 = vsel %vm1097_vm7, %v2656_v46, %v483_v34 }
 0x172   : > { %v1133_v53 = vsel %vm1097_vm7, %v2653_v60, %v499_v33 }
 0x174   : > { %v558_v6 = vpop.permute.xlu0 %557 }
 0x175   : > { %v574_v14 = vpop.permute.xlu1 %573  ;;  %v1152_v0 = vsel %vm1134_vm8, %v1115_v7, %v558_v6 }
 0x176   : > { %v1168_v13 = vsel %vm1134_vm8, %v1131_v9, %v574_v14 }
 0x178   : > { %v560_v51 = vpop.permute.xlu0 %559 }
 0x179   : > { %v576_v27 = vpop.permute.xlu1 %575  ;;  %v1154_v52 = vsel %vm1134_vm8, %v1117_v18, %v560_v51 }
 0x17a   : > { %v1170_v36 = vsel %vm1134_vm8, %v1133_v53, %v576_v27 }
 0x17c   : > { %v611_v43 = vpop.permute.xlu0 %610 }
 0x17d   : > { %v627_v61 = vpop.permute.xlu1 %626  ;;  %v1189_v26 = vsel %vm1171_vm9, %v1152_v0, %v611_v43 }
 0x17e   : > { %v1205_v63 = vsel %vm1171_vm9, %v1168_v13, %v627_v61 }
 0x180   : > { %v613_v17 = vpop.permute.xlu0 %612 }
 0x181   : > { %v629_v10 = vpop.permute.xlu1 %628  ;;  %v1191_v30 = vsel %vm1171_vm9, %v1154_v52, %v613_v17 }
 0x182   : > { %v1844_v2 = vpop.f32.mrb[0].mxu0  ;;  %v1207_v57 = vsel %vm1171_vm9, %v1170_v36, %v629_v10 }
 0x183   : > { %v1520_v20 = vadd.f32 %v1844_v2, %v3158_v32  ;;  %v1511_v59 = vpop.f32.mrb[1].mxu0 }
 0x184   : > { %v1512_v47 = vadd.f32 %v3158_v32, %v1511_v59  ;;  %v1845_v21 = vpop.f32.mrb[2].mxu0  ;;  %v741_v3 = vpop.permute.xlu0 %740 }
 0x185   : > { %1657 = vst.msk [vmem:[%s3163_s16 + $0x10] sm:$0xff] %vm1654_vm0, %v1520_v20  ;;  %v1523_v48 = vadd.f32 %v1845_v21, %v3158_v32  ;;  %v757_v49 = vpop.permute.xlu1 %756  ;;  %v1514_v15 = vpop.f32.mrb[3].mxu0  ;;  %v1226_v28 = vsel %vm1208_vm10, %v1189_v26, %v741_v3 }
 0x186   : > { %1655 = vst.msk [vmem:[%s3163_s16] sm:$0xff] %vm1654_vm0, %v1512_v47  ;;  %v1515_v31 = vadd.f32 %v3158_v32, %v1514_v15  ;;  %v1242_v58 = vsel %vm1208_vm10, %v1205_v63, %v757_v49 }
 0x187   : > { %1658 = vst.msk [vmem:[%s3163_s16 + $0x18] sm:$0xff] %vm1654_vm0, %v1523_v48 }
 0x188   : > { %1656 = vst.msk [vmem:[%s3163_s16 + $0x8] sm:$0xff] %vm1654_vm0, %v1515_v31  ;;  %v743_v16 = vpop.permute.xlu0 %742 }
 0x189   : > { %v759_v44 = vpop.permute.xlu1 %758  ;;  %v1228_v5 = vsel %vm1208_vm10, %v1191_v30, %v743_v16 }
 0x18a   : > { %v1244_v41 = vsel %vm1208_vm10, %v1207_v57, %v759_v44 }
 0x18c   : > { %v818_v39 = vpop.permute.xlu0 %817 }
 0x18d   : > { %v834_v40 = vpop.permute.xlu1 %833  ;;  %v1263_v62 = vsel %vm1245_vm11, %v1226_v28, %v818_v39 }
 0x18e   : > { %v1279_v25 = vsel %vm1245_vm11, %v1242_v58, %v834_v40 }
 0x190   : > { %v820_v45 = vpop.permute.xlu0 %819 }
 0x191   : > { %v836_v22 = vpop.permute.xlu1 %835  ;;  %v1265_v42 = vsel %vm1245_vm11, %v1228_v5, %v820_v45 }
 0x192   : > { %v1281_v34 = vsel %vm1245_vm11, %v1244_v41, %v836_v22 }
 0x194   : > { %v871_v35 = vpop.permute.xlu0 %870 }
 0x195   : > { %v887_v1 = vpop.permute.xlu1 %886  ;;  %v1300_v29 = vsel %vm1282_vm12, %v1263_v62, %v871_v35 }
 0x196   : > { %v1316_v55 = vsel %vm1282_vm12, %v1279_v25, %v887_v1 }
 0x198   : > { %v873_v24 = vpop.permute.xlu0 %872 }
 0x199   : > { %v889_v23 = vpop.permute.xlu1 %888  ;;  %v1302_v33 = vsel %vm1282_vm12, %v1265_v42, %v873_v24 }
 0x19a   : > { %v1318_v6 = vsel %vm1282_vm12, %v1281_v34, %v889_v23 }
 0x19c   : > { %v1001_v38 = vpop.permute.xlu0 %1000 }
 0x19d   : > { %v1017_v50 = vpop.permute.xlu1 %1016  ;;  %v1337_v46 = vsel %vm1319_vm13, %v1300_v29, %v1001_v38 }
 0x19e   : > { %v1353_v60 = vsel %vm1319_vm13, %v1316_v55, %v1017_v50 }
 0x1a0   : > { %v1003_v12 = vpop.permute.xlu0 %1002 }
 0x1a1   : > { %v1019_v54 = vpop.permute.xlu1 %1018  ;;  %v1339_v14 = vsel %vm1319_vm13, %v1302_v33, %v1003_v12 }
 0x1a2   : > { %v1355_v27 = vsel %vm1319_vm13, %v1318_v6, %v1019_v54 }
 0x1a4   : > { %v1078_v4 = vpop.permute.xlu0 %1077 }
 0x1a5   : > { %v1094_v37 = vpop.permute.xlu1 %1093  ;;  %v1374_v8 = vsel %vm1356_vm14, %v1337_v46, %v1078_v4 }
 0x1a6   : > { %v1390_v11 = vsel %vm1356_vm14, %v1353_v60, %v1094_v37  ;;  %1858 = vmatprep.mubr.msk.bf16.mxu0 %vm1436_vm15, %v1374_v8 }
 0x1a7   : > { %1874 = vmatprep.mubr.msk.bf16.mxu1 %vm1436_vm15, %v1390_v11 }
 0x1a8   : > { %v1080_v51 = vpop.permute.xlu0 %1079 }
 0x1a9   : > { %v1096_v43 = vpop.permute.xlu1 %1095  ;;  %v1376_v61 = vsel %vm1356_vm14, %v1339_v14, %v1080_v51 }
 0x1aa   : > { %v1392_v17 = vsel %vm1356_vm14, %v1355_v27, %v1096_v43  ;;  %1859 = vmatmul.mubr.msk.bf16.gmra.mrb[16].mxu0 %vm1436_vm15, %v1376_v61 }
 0x1ab   : > { %1875 = vmatmul.mubr.msk.bf16.gmra.mrb[12].mxu1 %vm1436_vm15, %v1392_v17 }
 0x1c1   : > { %v1848_v10 = vpop.f32.mrb[4].mxu0 }
 0x1c2   : > { %v1536_v2 = vadd.f32 %v1848_v10, %v3158_v32  ;;  %v1864_v20 = vpop.f32.mrb[0].mxu1  ;;  %v1527_v59 = vpop.f32.mrb[5].mxu0 }
 0x1c3   : > { %v1600_v47 = vadd.f32 %v1864_v20, %v3158_v32  ;;  %v1528_v21 = vadd.f32 %v3158_v32, %v1527_v59  ;;  %v1591_v3 = vpop.f32.mrb[1].mxu1  ;;  %v1849_v48 = vpop.f32.mrb[6].mxu0 }
 0x1c4   : > { %1661 = vst.msk [vmem:[%s3163_s16 + $0x30] sm:$0xff] %vm1654_vm0, %v1536_v2  ;;  %v1592_v49 = vadd.f32 %v3158_v32, %v1591_v3  ;;  %v1539_v15 = vadd.f32 %v1849_v48, %v3158_v32  ;;  %v1865_v31 = vpop.f32.mrb[2].mxu1  ;;  %v1530_v16 = vpop.f32.mrb[7].mxu0 }
 0x1c5   : > { %1677 = vst.msk [vmem:[%s3163_s16 + $0xb0] sm:$0xff] %vm1654_vm0, %v1600_v47  ;;  %1659 = vst.msk [vmem:[%s3163_s16 + $0x20] sm:$0xff] %vm1654_vm0, %v1528_v21  ;;  %v1603_v44 = vadd.f32 %v1865_v31, %v3158_v32  ;;  %v1531_v39 = vadd.f32 %v3158_v32, %v1530_v16  ;;  %v1594_v40 = vpop.f32.mrb[3].mxu1 }
 0x1c6   : > { %1675 = vst.msk [vmem:[%s3163_s16 + $0xa0] sm:$0xff] %vm1654_vm0, %v1592_v49  ;;  %1662 = vst.msk [vmem:[%s3163_s16 + $0x38] sm:$0xff] %vm1654_vm0, %v1539_v15  ;;  %v1595_v45 = vadd.f32 %v3158_v32, %v1594_v40 }
 0x1c7   : > { %1678 = vst.msk [vmem:[%s3163_s16 + $0xb8] sm:$0xff] %vm1654_vm0, %v1603_v44  ;;  %1660 = vst.msk [vmem:[%s3163_s16 + $0x28] sm:$0xff] %vm1654_vm0, %v1531_v39 }
 0x1c8   : > { %1676 = vst.msk [vmem:[%s3163_s16 + $0xa8] sm:$0xff] %vm1654_vm0, %v1595_v45 }
 0x201   : > { %v1852_v22 = vpop.f32.mrb[8].mxu0 }
 0x202   : > { %v1552_v35 = vadd.f32 %v1852_v22, %v3158_v32  ;;  %v1868_v1 = vpop.f32.mrb[4].mxu1  ;;  %v1543_v24 = vpop.f32.mrb[9].mxu0 }
 0x203   : > { %v1616_v23 = vadd.f32 %v1868_v1, %v3158_v32  ;;  %v1544_v38 = vadd.f32 %v3158_v32, %v1543_v24  ;;  %v1607_v50 = vpop.f32.mrb[5].mxu1  ;;  %v1853_v56 = vpop.f32.mrb[10].mxu0 }
 0x204   : > { %1665 = vst.msk [vmem:[%s3163_s16 + $0x50] sm:$0xff] %vm1654_vm0, %v1552_v35  ;;  %v1608_v7 = vadd.f32 %v3158_v32, %v1607_v50  ;;  %v1555_v19 = vadd.f32 %v1853_v56, %v3158_v32  ;;  %v1869_v9 = vpop.f32.mrb[6].mxu1  ;;  %v1546_v0 = vpop.f32.mrb[11].mxu0 }
 0x205   : > { %1681 = vst.msk [vmem:[%s3163_s16 + $0xd0] sm:$0xff] %vm1654_vm0, %v1616_v23  ;;  %1663 = vst.msk [vmem:[%s3163_s16 + $0x40] sm:$0xff] %vm1654_vm0, %v1544_v38  ;;  %v1619_v13 = vadd.f32 %v1869_v9, %v3158_v32  ;;  %v1547_v26 = vadd.f32 %v3158_v32, %v1546_v0  ;;  %v1610_v12 = vpop.f32.mrb[7].mxu1 }
 0x206   : > { %1679 = vst.msk [vmem:[%s3163_s16 + $0xc0] sm:$0xff] %vm1654_vm0, %v1608_v7  ;;  %1666 = vst.msk [vmem:[%s3163_s16 + $0x58] sm:$0xff] %vm1654_vm0, %v1555_v19  ;;  %v1611_v63 = vadd.f32 %v3158_v32, %v1610_v12 }
 0x207   : > { %1682 = vst.msk [vmem:[%s3163_s16 + $0xd8] sm:$0xff] %vm1654_vm0, %v1619_v13  ;;  %1664 = vst.msk [vmem:[%s3163_s16 + $0x48] sm:$0xff] %vm1654_vm0, %v1547_v26 }
 0x208   : > { %1680 = vst.msk [vmem:[%s3163_s16 + $0xc8] sm:$0xff] %vm1654_vm0, %v1611_v63 }
 0x241   : > { %v1856_v28 = vpop.f32.mrb[12].mxu0 }
 0x242   : > { %v1568_v54 = vadd.f32 %v1856_v28, %v3158_v32  ;;  %v1872_v18 = vpop.f32.mrb[8].mxu1  ;;  %v1559_v58 = vpop.f32.mrb[13].mxu0 }
 0x243   : > { %v1632_v62 = vadd.f32 %v1872_v18, %v3158_v32  ;;  %v1560_v53 = vadd.f32 %v3158_v32, %v1559_v58  ;;  %v1623_v52 = vpop.f32.mrb[9].mxu1  ;;  %v1857_v25 = vpop.f32.mrb[14].mxu0 }
 0x244   : > { %1669 = vst.msk [vmem:[%s3163_s16 + $0x70] sm:$0xff] %vm1654_vm0, %v1568_v54  ;;  %v1624_v29 = vadd.f32 %v3158_v32, %v1623_v52  ;;  %v1571_v36 = vadd.f32 %v1857_v25, %v3158_v32  ;;  %v1873_v30 = vpop.f32.mrb[10].mxu1  ;;  %v1562_v55 = vpop.f32.mrb[15].mxu0 }
 0x245   : > { %1685 = vst.msk [vmem:[%s3163_s16 + $0xf0] sm:$0xff] %vm1654_vm0, %v1632_v62  ;;  %1667 = vst.msk [vmem:[%s3163_s16 + $0x60] sm:$0xff] %vm1654_vm0, %v1560_v53  ;;  %v1635_v46 = vadd.f32 %v1873_v30, %v3158_v32  ;;  %v1563_v4 = vadd.f32 %v3158_v32, %v1562_v55  ;;  %v1626_v57 = vpop.f32.mrb[11].mxu1 }
 0x246   : > { %1683 = vst.msk [vmem:[%s3163_s16 + $0xe0] sm:$0xff] %vm1654_vm0, %v1624_v29  ;;  %1670 = vst.msk [vmem:[%s3163_s16 + $0x78] sm:$0xff] %vm1654_vm0, %v1571_v36  ;;  %v1627_v5 = vadd.f32 %v3158_v32, %v1626_v57 }
 0x247   : > { %1686 = vst.msk [vmem:[%s3163_s16 + $0xf8] sm:$0xff] %vm1654_vm0, %v1635_v46  ;;  %1668 = vst.msk [vmem:[%s3163_s16 + $0x68] sm:$0xff] %vm1654_vm0, %v1563_v4 }
 0x248   : > { %1684 = vst.msk [vmem:[%s3163_s16 + $0xe8] sm:$0xff] %vm1654_vm0, %v1627_v5 }
 0x27d   : > { %v1860_v60 = vpop.f32.mrb[16].mxu0 }
 0x27e   : > { %v1584_v37 = vadd.f32 %v1860_v60, %v3158_v32  ;;  %v1876_v8 = vpop.f32.mrb[12].mxu1  ;;  %v1575_v41 = vpop.f32.mrb[17].mxu0 }
 0x27f   : > { %v1648_v42 = vadd.f32 %v1876_v8, %v3158_v32  ;;  %v1576_v11 = vadd.f32 %v3158_v32, %v1575_v41  ;;  %v1639_v34 = vpop.f32.mrb[13].mxu1  ;;  %v1861_v33 = vpop.f32.mrb[18].mxu0 }
 0x280   : > { %1673 = vst.msk [vmem:[%s3163_s16 + $0x90] sm:$0xff] %vm1654_vm0, %v1584_v37  ;;  %v1640_v6 = vadd.f32 %v3158_v32, %v1639_v34  ;;  %v1587_v14 = vadd.f32 %v1861_v33, %v3158_v32  ;;  %v1877_v51 = vpop.f32.mrb[14].mxu1  ;;  %v1578_v27 = vpop.f32.mrb[19].mxu0 }
 0x281   : > { %1689 = vst.msk [vmem:[%s3163_s16 + $0x110] sm:$0xff] %vm1654_vm0, %v1648_v42  ;;  %1671 = vst.msk [vmem:[%s3163_s16 + $0x80] sm:$0xff] %vm1654_vm0, %v1576_v11  ;;  %v1651_v43 = vadd.f32 %v1877_v51, %v3158_v32  ;;  %v1579_v61 = vadd.f32 %v3158_v32, %v1578_v27  ;;  %v1642_v17 = vpop.f32.mrb[15].mxu1 }
 0x282   : > { %1687 = vst.msk [vmem:[%s3163_s16 + $0x100] sm:$0xff] %vm1654_vm0, %v1640_v6  ;;  %1674 = vst.msk [vmem:[%s3163_s16 + $0x98] sm:$0xff] %vm1654_vm0, %v1587_v14  ;;  %v1643_v10 = vadd.f32 %v3158_v32, %v1642_v17 }
 0x283   : > { %1690 = vst.msk [vmem:[%s3163_s16 + $0x118] sm:$0xff] %vm1654_vm0, %v1651_v43  ;;  %1672 = vst.msk [vmem:[%s3163_s16 + $0x88] sm:$0xff] %vm1654_vm0, %v1579_v61 }
 0x284   : > { %1688 = vst.msk [vmem:[%s3163_s16 + $0x108] sm:$0xff] %vm1654_vm0, %v1643_v10 }
 0x285 PF: > { %s13_s12 = sadd.s32 1, %s1962_s12  }
 0x286   : > { %p10_p4 = scmp.ge.s32.totalorder %s13_s12, 4  }
 0x288   :  { %12 = sbr.rel (!%p10_p4) target bundleno = 1 (0x1), region = 62 }

</bundles_post_ra>
